<compile_context>
chip_gen: v7x
topology: tpu7x:2x2x1
jax: 0.10.0
libtpu: 0.0.40
codegen_flags: <defaults>
</compile_context>

<pallas_src>
import jax
import jax.numpy as jnp
from jax.experimental import pallas as pl
from jax.experimental.pallas import tpu as pltpu

H = 768          # BERT hidden size (fixed by the module: fc1 = Linear(768*2, 512))
D1, D2 = 512, 64


def _round_up(x, m):
    return ((x + m - 1) // m) * m


def _pick_tile(extent8, target):
    """Largest multiple-of-8 divisor of `extent8` (itself a multiple of 8) <= target."""
    c = min(_round_up(max(target, 8), 8), extent8)
    c -= c % 8
    while c > 8:
        if extent8 % c == 0:
            return c
        c -= 8
    return 8


def _make_head_kernel(inv_seq_len):
    """Kernel factory: inv_seq_len = 1/S as a *Python float* (compile-time literal)."""

    def head_kernel(q_ref, d_ref, w1q_ref, w1d_ref, b1_ref,
                    w2_ref, b2_ref, w3_ref, b3_ref,
                    o_ref, qacc_ref, dacc_ref):
        s = pl.program_id(1)
        ns = pl.num_programs(1)

        # ---- init accumulators on the first sequence block ----
        @pl.when(s == 0)
        def _():
            qacc_ref[...] = jnp.zeros_like(qacc_ref)
            dacc_ref[...] = jnp.zeros_like(dacc_ref)

        # ---- accumulate sequence partial sums; upcast fused into the reduce ----
        qacc_ref[...] += jnp.sum(q_ref[...], axis=1, dtype=jnp.float32)   # [Bblk, 768]
        dacc_ref[...] += jnp.sum(d_ref[...], axis=1, dtype=jnp.float32)   # [Bblk, 768]

        # ---- epilogue: MLP head + sigmoid, only on the last sequence block ----
        @pl.when(s == ns - 1)
        def _():
            # mean pool (f32), cast to the weight dtype for the MXU.
            qv = (qacc_ref[...] * inv_seq_len).astype(w1q_ref.dtype)       # [Bblk, 768]
            dv = (dacc_ref[...] * inv_seq_len).astype(w1d_ref.dtype)       # [Bblk, 768]

            # fc1 on cat([qv, dv]) as a split matmul (no lane concat):
            #   cat(qv, dv) @ W1 == qv @ W1[:768] + dv @ W1[768:]
            h1 = (jnp.dot(qv, w1q_ref[...], preferred_element_type=jnp.float32)
                  + jnp.dot(dv, w1d_ref[...], preferred_element_type=jnp.float32)
                  + b1_ref[...])                                            # [Bblk, 512] f32

            # fc2
            h2 = (jnp.dot(h1.astype(w2_ref.dtype), w2_ref[...],
                          preferred_element_type=jnp.float32)
                  + b2_ref[...])                                            # [Bblk, 64] f32

            # fc3 (output dim 1): lane-reduction instead of an N=1 matmul.
            logit = (jnp.sum(h2 * w3_ref[...].astype(jnp.float32),
                             axis=-1, keepdims=True)
                     + b3_ref[0])                                           # [Bblk, 1]

            o_ref[...] = jax.nn.sigmoid(logit)

    return head_kernel


def bert_similarity_head(query_hidden, doc_hidden, params, *,
                         block_b=None, block_s=None):
    """query_hidden / doc_hidden: [B, S, 768], preferably bf16.  Returns [B, 1] f32."""
    B, S, Hdim = query_hidden.shape
    assert Hdim == H and doc_hidden.shape == (B, S, H)

    # --- generation-aware defaults (v5e/v6e have 128 MiB VMEM; v7x only 64) ---
    kind = jax.devices()[0].device_kind.lower()
    big_vmem = ("v5" in kind) or ("v6" in kind)
    block_s_target = block_s if block_s is not None else (256 if big_vmem else 128)
    block_b_target = block_b if block_b is not None else (16 if B < 128 else 32)
    vmem_limit = (96 if big_vmem else 48) * 1024 * 1024

    q, d = query_hidden, doc_hidden

    # --- seq axis: pad only if ragged (<= 7 zero rows; safe since we divide by true S) ---
    if S % 8 != 0:
        Sp = _round_up(S, 8)
        pad = ((0, 0), (0, Sp - S), (0, 0))
        q = jnp.pad(q, pad)
        d = jnp.pad(d, pad)
    else:
        Sp = S
    bs = _pick_tile(Sp, block_s_target)       # multiple-of-8 divisor of Sp
    ns = Sp // bs

    # --- batch axis: never pad inputs.  A partial last batch block only produces
    # garbage in output rows >= B, which are sliced off below (per-row math only). ---
    Bp8 = _round_up(B, 8)
    bb = _pick_tile(Bp8, block_b_target)      # multiple-of-8 divisor of Bp8
    nb = -(-Bp8 // bb)
    Bp_out = nb * bb

    kernel = _make_head_kernel(1.0 / S)       # Python float -> trace literal

    hidden_spec = pl.BlockSpec((bb, bs, H), lambda i, s: (i, s, 0))
    const2d = lambda i, s: (0, 0)             # weights/biases resident across all steps

    out = pl.pallas_call(
        kernel,
        out_shape=jax.ShapeDtypeStruct((Bp_out, 1), jnp.float32),
        grid=(nb, ns),
        in_specs=[
            hidden_spec,                                   # query hidden states
            hidden_spec,                                   # doc hidden states
            pl.BlockSpec((H, D1), const2d),                # w1q  [768, 512]
            pl.BlockSpec((H, D1), const2d),                # w1d  [768, 512]
            pl.BlockSpec((1, D1), const2d),                # b1   [1, 512]
            pl.BlockSpec((D1, D2), const2d),               # w2   [512, 64]
            pl.BlockSpec((1, D2), const2d),                # b2   [1, 64]
            pl.BlockSpec((1, D2), const2d),                # w3   [1, 64]
            pl.BlockSpec(memory_space=pltpu.MemorySpace.SMEM),  # b3 [1] scalar
        ],
        out_specs=pl.BlockSpec((bb, 1), lambda i, s: (i, 0)),
        scratch_shapes=[
            pltpu.VMEM((bb, H), jnp.float32),              # query mean-pool accumulator
            pltpu.VMEM((bb, H), jnp.float32),              # doc   mean-pool accumulator
        ],
        compiler_params=pltpu.CompilerParams(
            dimension_semantics=("parallel", "arbitrary"),
            vmem_limit_bytes=vmem_limit,
        ),
    )(q, d,
      params["w1q"], params["w1d"], params["b1"],
      params["w2"], params["b2"], params["w3"], params["b3"])

    return out[:B] if Bp_out != B else out


def init_params(key):
    ks = jax.random.split(key, 6)
    scale = 0.02
    w1 = (jax.random.normal(ks[0], (2 * H, D1), jnp.float32) * scale).astype(jnp.bfloat16)
    return {
        "w1q": w1[:H],                                                       # [768, 512] bf16
        "w1d": w1[H:],                                                       # [768, 512] bf16
        "b1": jax.random.normal(ks[1], (1, D1), jnp.float32) * scale,        # f32
        "w2": (jax.random.normal(ks[2], (D1, D2), jnp.float32) * scale).astype(jnp.bfloat16),
        "b2": jax.random.normal(ks[3], (1, D2), jnp.float32) * scale,        # f32
        "w3": (jax.random.normal(ks[4], (1, D2), jnp.float32) * scale).astype(jnp.bfloat16),
        "b3": jax.random.normal(ks[5], (1,), jnp.float32) * scale,           # scalar, f32
    }


def reference(query_hidden, doc_hidden, p):
    qv = query_hidden.astype(jnp.float32).mean(axis=1)
    dv = doc_hidden.astype(jnp.float32).mean(axis=1)
    qv = qv.astype(p["w1q"].dtype)
    dv = dv.astype(p["w1d"].dtype)
    h1 = (jnp.dot(qv, p["w1q"], preferred_element_type=jnp.float32)
          + jnp.dot(dv, p["w1d"], preferred_element_type=jnp.float32)
          + p["b1"])
    h2 = (jnp.dot(h1.astype(p["w2"].dtype), p["w2"],
                  preferred_element_type=jnp.float32) + p["b2"])
    logit = jnp.sum(h2 * p["w3"].astype(jnp.float32), axis=-1, keepdims=True) + p["b3"][0]
    return jax.nn.sigmoid(logit)


if __name__ == "__main__":
    key = jax.random.PRNGKey(0)
    k_q, k_d, k_p = jax.random.split(key, 3)

    B, S = 16, 16   # small batch / seq; hidden=768 fixed by the module
    query_hidden = jax.random.normal(k_q, (B, S, H), jnp.float32).astype(jnp.bfloat16)
    doc_hidden = jax.random.normal(k_d, (B, S, H), jnp.float32).astype(jnp.bfloat16)
    params = init_params(k_p)

    # Small explicit tiles so the test exercises a non-trivial (2, 2) grid:
    # multi-block batch axis ("parallel") and multi-step seq accumulation.
    out = bert_similarity_head(query_hidden, doc_hidden, params, block_b=8, block_s=8)
    out = jax.block_until_ready(out)

    ref = reference(query_hidden, doc_hidden, params)
    assert out.shape == (B, 1)
    assert jnp.allclose(out, ref, atol=5e-3, rtol=5e-3), float(jnp.max(jnp.abs(out - ref)))

    print("KERNEL_OK")
</pallas_src>

<mosaic_0001>
module attributes {stable_mosaic.version = 11 : i64} {
  func.func @head_kernel(%arg0: i32, %arg1: i32, %arg2: memref<8x8x768xbf16, #tpu.memory_space<vmem>>, %arg3: memref<8x8x768xbf16, #tpu.memory_space<vmem>>, %arg4: memref<768x512xbf16, #tpu.memory_space<vmem>>, %arg5: memref<768x512xbf16, #tpu.memory_space<vmem>>, %arg6: memref<1x512xf32, #tpu.memory_space<vmem>>, %arg7: memref<512x64xbf16, #tpu.memory_space<vmem>>, %arg8: memref<1x64xf32, #tpu.memory_space<vmem>>, %arg9: memref<1x64xbf16, #tpu.memory_space<vmem>>, %arg10: memref<1xf32, #tpu.memory_space<smem>>, %arg11: memref<8x1xf32, #tpu.memory_space<vmem>>, %arg12: memref<8x768xf32, #tpu.memory_space<vmem>>, %arg13: memref<8x768xf32, #tpu.memory_space<vmem>>) attributes {dimension_semantics = [#tpu.dimension_semantics<parallel>, #tpu.dimension_semantics<arbitrary>], iteration_bounds = array<i64: 2, 2>, scalar_prefetch = 0 : i64, scratch_operands = 2 : i64, tpu.core_type = #tpu.core_type<tc>, window_params = [{transform_indices = @transform_0, window_bounds = array<i64: 8, 8, 768>}, {transform_indices = @transform_1, window_bounds = array<i64: 8, 8, 768>}, {pipeline_mode = #tpu.pipeline_mode<synchronous>, transform_indices = @transform_2, window_bounds = array<i64: 768, 512>}, {pipeline_mode = #tpu.pipeline_mode<synchronous>, transform_indices = @transform_3, window_bounds = array<i64: 768, 512>}, {pipeline_mode = #tpu.pipeline_mode<synchronous>, transform_indices = @transform_4, window_bounds = array<i64: 1, 512>}, {pipeline_mode = #tpu.pipeline_mode<synchronous>, transform_indices = @transform_5, window_bounds = array<i64: 512, 64>}, {pipeline_mode = #tpu.pipeline_mode<synchronous>, transform_indices = @transform_6, window_bounds = array<i64: 1, 64>}, {pipeline_mode = #tpu.pipeline_mode<synchronous>, transform_indices = @transform_7, window_bounds = array<i64: 1, 64>}, {transform_indices = @transform_8, window_bounds = array<i64: 1>}, {transform_indices = @transform_9, window_bounds = array<i64: 8, 1>}]} {
    %c0_i32 = arith.constant 0 : i32
    %0 = arith.cmpi eq, %arg1, %c0_i32 : i32
    %1 = arith.extui %0 : i1 to i32
    %c0_i32_0 = arith.constant 0 : i32
    %2 = arith.cmpi ne, %1, %c0_i32_0 : i32
    scf.if %2 {
      %cst_16 = arith.constant 0.000000e+00 : f32
      %18 = vector.broadcast %cst_16 : f32 to vector<8x768xf32>
      %c0_17 = arith.constant 0 : index
      %c0_18 = arith.constant 0 : index
      %19 = vector.load %arg12[%c0_17, %c0_18] : memref<8x768xf32, #tpu.memory_space<vmem>>, vector<8x768xf32>
      tpu.vector_store %arg12[%c0_17, %c0_18], %18 {strides = array<i32>} : memref<8x768xf32, #tpu.memory_space<vmem>>, vector<8x768xf32>,
      %cst_19 = arith.constant 0.000000e+00 : f32
      %20 = vector.broadcast %cst_19 : f32 to vector<8x768xf32>
      %c0_20 = arith.constant 0 : index
      %c0_21 = arith.constant 0 : index
      %21 = vector.load %arg13[%c0_20, %c0_21] : memref<8x768xf32, #tpu.memory_space<vmem>>, vector<8x768xf32>
      tpu.vector_store %arg13[%c0_20, %c0_21], %20 {strides = array<i32>} : memref<8x768xf32, #tpu.memory_space<vmem>>, vector<8x768xf32>,
    } else {
    }
    %c0 = arith.constant 0 : index
    %c0_1 = arith.constant 0 : index
    %3 = vector.load %arg12[%c0, %c0_1] : memref<8x768xf32, #tpu.memory_space<vmem>>, vector<8x768xf32>
    %c0_2 = arith.constant 0 : index
    %c0_3 = arith.constant 0 : index
    %c0_4 = arith.constant 0 : index
    %4 = vector.load %arg2[%c0_2, %c0_3, %c0_4] : memref<8x8x768xbf16, #tpu.memory_space<vmem>>, vector<8x8x768xbf16>
    %5 = arith.extf %4 : vector<8x8x768xbf16> to vector<8x8x768xf32>
    %cst = arith.constant dense<0.000000e+00> : vector<8x768xf32>
    %6 = vector.multi_reduction <add>, %5, %cst [1] : vector<8x8x768xf32> to vector<8x768xf32>
    %7 = arith.addf %3, %6 : vector<8x768xf32>
    %c0_5 = arith.constant 0 : index
    %c0_6 = arith.constant 0 : index
    %8 = vector.load %arg12[%c0_5, %c0_6] : memref<8x768xf32, #tpu.memory_space<vmem>>, vector<8x768xf32>
    tpu.vector_store %arg12[%c0_5, %c0_6], %7 {strides = array<i32>} : memref<8x768xf32, #tpu.memory_space<vmem>>, vector<8x768xf32>,
    %c0_7 = arith.constant 0 : index
    %c0_8 = arith.constant 0 : index
    %9 = vector.load %arg13[%c0_7, %c0_8] : memref<8x768xf32, #tpu.memory_space<vmem>>, vector<8x768xf32>
    %c0_9 = arith.constant 0 : index
    %c0_10 = arith.constant 0 : index
    %c0_11 = arith.constant 0 : index
    %10 = vector.load %arg3[%c0_9, %c0_10, %c0_11] : memref<8x8x768xbf16, #tpu.memory_space<vmem>>, vector<8x8x768xbf16>
    %11 = arith.extf %10 : vector<8x8x768xbf16> to vector<8x8x768xf32>
    %cst_12 = arith.constant dense<0.000000e+00> : vector<8x768xf32>
    %12 = vector.multi_reduction <add>, %11, %cst_12 [1] : vector<8x8x768xf32> to vector<8x768xf32>
    %13 = arith.addf %9, %12 : vector<8x768xf32>
    %c0_13 = arith.constant 0 : index
    %c0_14 = arith.constant 0 : index
    %14 = vector.load %arg13[%c0_13, %c0_14] : memref<8x768xf32, #tpu.memory_space<vmem>>, vector<8x768xf32>
    tpu.vector_store %arg13[%c0_13, %c0_14], %13 {strides = array<i32>} : memref<8x768xf32, #tpu.memory_space<vmem>>, vector<8x768xf32>,
    %c1_i32 = arith.constant 1 : i32
    %15 = arith.cmpi eq, %arg1, %c1_i32 : i32
    %16 = arith.extui %15 : i1 to i32
    %c0_i32_15 = arith.constant 0 : i32
    %17 = arith.cmpi ne, %16, %c0_i32_15 : i32
    scf.if %17 {
      %c0_16 = arith.constant 0 : index
      %c0_17 = arith.constant 0 : index
      %18 = vector.load %arg12[%c0_16, %c0_17] : memref<8x768xf32, #tpu.memory_space<vmem>>, vector<8x768xf32>
      %cst_18 = arith.constant 6.250000e-02 : f32
      %19 = vector.broadcast %cst_18 : f32 to vector<8x768xf32>
      %20 = arith.mulf %18, %19 : vector<8x768xf32>
      %21 = arith.truncf %20 : vector<8x768xf32> to vector<8x768xbf16>
      %c0_19 = arith.constant 0 : index
      %c0_20 = arith.constant 0 : index
      %22 = vector.load %arg13[%c0_19, %c0_20] : memref<8x768xf32, #tpu.memory_space<vmem>>, vector<8x768xf32>
      %cst_21 = arith.constant 6.250000e-02 : f32
      %23 = vector.broadcast %cst_21 : f32 to vector<8x768xf32>
      %24 = arith.mulf %22, %23 : vector<8x768xf32>
      %25 = arith.truncf %24 : vector<8x768xf32> to vector<8x768xbf16>
      %c0_22 = arith.constant 0 : index
      %c0_23 = arith.constant 0 : index
      %26 = vector.load %arg4[%c0_22, %c0_23] : memref<768x512xbf16, #tpu.memory_space<vmem>>, vector<768x512xbf16>
      %cst_24 = arith.constant dense<0.000000e+00> : vector<8x512xf32>
      %27 = tpu.matmul %21, %26, %cst_24 {dimension_numbers = #tpu.dot_dimension_numbers<[1], [0], [0], [1], [0, 0, 1, 1], [], []>} : vector<8x768xbf16>, vector<768x512xbf16>, vector<8x512xf32> -> vector<8x512xf32>
      %c0_25 = arith.constant 0 : index
      %c0_26 = arith.constant 0 : index
      %28 = vector.load %arg5[%c0_25, %c0_26] : memref<768x512xbf16, #tpu.memory_space<vmem>>, vector<768x512xbf16>
      %cst_27 = arith.constant dense<0.000000e+00> : vector<8x512xf32>
      %29 = tpu.matmul %25, %28, %cst_27 {dimension_numbers = #tpu.dot_dimension_numbers<[1], [0], [0], [1], [0, 0, 1, 1], [], []>} : vector<8x768xbf16>, vector<768x512xbf16>, vector<8x512xf32> -> vector<8x512xf32>
      %30 = arith.addf %27, %29 : vector<8x512xf32>
      %c0_28 = arith.constant 0 : index
      %c0_29 = arith.constant 0 : index
      %31 = vector.load %arg6[%c0_28, %c0_29] : memref<1x512xf32, #tpu.memory_space<vmem>>, vector<1x512xf32>
      %32 = vector.broadcast %31 : vector<1x512xf32> to vector<8x512xf32>
      %33 = arith.addf %30, %32 : vector<8x512xf32>
      %34 = arith.truncf %33 : vector<8x512xf32> to vector<8x512xbf16>
      %c0_30 = arith.constant 0 : index
      %c0_31 = arith.constant 0 : index
      %35 = vector.load %arg7[%c0_30, %c0_31] : memref<512x64xbf16, #tpu.memory_space<vmem>>, vector<512x64xbf16>
      %cst_32 = arith.constant dense<0.000000e+00> : vector<8x64xf32>
      %36 = tpu.matmul %34, %35, %cst_32 {dimension_numbers = #tpu.dot_dimension_numbers<[1], [0], [0], [1], [0, 0, 1, 1], [], []>} : vector<8x512xbf16>, vector<512x64xbf16>, vector<8x64xf32> -> vector<8x64xf32>
      %c0_33 = arith.constant 0 : index
      %c0_34 = arith.constant 0 : index
      %37 = vector.load %arg8[%c0_33, %c0_34] : memref<1x64xf32, #tpu.memory_space<vmem>>, vector<1x64xf32>
      %38 = vector.broadcast %37 : vector<1x64xf32> to vector<8x64xf32>
      %39 = arith.addf %36, %38 : vector<8x64xf32>
      %c0_35 = arith.constant 0 : index
      %c0_36 = arith.constant 0 : index
      %40 = vector.load %arg9[%c0_35, %c0_36] : memref<1x64xbf16, #tpu.memory_space<vmem>>, vector<1x64xbf16>
      %41 = arith.extf %40 : vector<1x64xbf16> to vector<1x64xf32>
      %42 = vector.broadcast %41 : vector<1x64xf32> to vector<8x64xf32>
      %43 = arith.mulf %39, %42 : vector<8x64xf32>
      %cst_37 = arith.constant dense<0.000000e+00> : vector<8xf32>
      %44 = vector.multi_reduction <add>, %43, %cst_37 [1] : vector<8x64xf32> to vector<8xf32>
      %45 = vector.shape_cast %44 : vector<8xf32> to vector<8x1xf32>
      %c0_38 = arith.constant 0 : index
      %46 = memref.load %arg10[%c0_38] : memref<1xf32, #tpu.memory_space<smem>>
      %47 = vector.broadcast %46 : f32 to vector<8x1xf32>
      %48 = arith.addf %45, %47 : vector<8x1xf32>
      %49 = arith.negf %48 : vector<8x1xf32>
      %50 = math.exp %49 : vector<8x1xf32>
      %cst_39 = arith.constant 1.000000e+00 : f32
      %51 = vector.broadcast %cst_39 : f32 to vector<8x1xf32>
      %52 = arith.addf %51, %50 : vector<8x1xf32>
      %53 = arith.divf %51, %52 : vector<8x1xf32>
      %c0_40 = arith.constant 0 : index
      %c0_41 = arith.constant 0 : index
      %54 = vector.load %arg11[%c0_40, %c0_41] : memref<8x1xf32, #tpu.memory_space<vmem>>, vector<8x1xf32>
      tpu.vector_store %arg11[%c0_40, %c0_41], %53 {strides = array<i32>} : memref<8x1xf32, #tpu.memory_space<vmem>>, vector<8x1xf32>,
    } else {
    }
    return
  }
  func.func @transform_0(%arg0: i32, %arg1: i32) -> (i32, i32, i32) {
    %c0_i32 = arith.constant 0 : i32
    %c0_i32_0 = arith.constant 0 : i32
    return %arg0, %arg1, %c0_i32 : i32, i32, i32
  }
  func.func @transform_1(%arg0: i32, %arg1: i32) -> (i32, i32, i32) {
    %c0_i32 = arith.constant 0 : i32
    %c0_i32_0 = arith.constant 0 : i32
    return %arg0, %arg1, %c0_i32 : i32, i32, i32
  }
  func.func @transform_2(%arg0: i32, %arg1: i32) -> (i32, i32) {
    %c0_i32 = arith.constant 0 : i32
    %c0_i32_0 = arith.constant 0 : i32
    %c0_i32_1 = arith.constant 0 : i32
    return %c0_i32, %c0_i32_0 : i32, i32
  }
  func.func @transform_3(%arg0: i32, %arg1: i32) -> (i32, i32) {
    %c0_i32 = arith.constant 0 : i32
    %c0_i32_0 = arith.constant 0 : i32
    %c0_i32_1 = arith.constant 0 : i32
    return %c0_i32, %c0_i32_0 : i32, i32
  }
  func.func @transform_4(%arg0: i32, %arg1: i32) -> (i32, i32) {
    %c0_i32 = arith.constant 0 : i32
    %c0_i32_0 = arith.constant 0 : i32
    %c0_i32_1 = arith.constant 0 : i32
    return %c0_i32, %c0_i32_0 : i32, i32
  }
  func.func @transform_5(%arg0: i32, %arg1: i32) -> (i32, i32) {
    %c0_i32 = arith.constant 0 : i32
    %c0_i32_0 = arith.constant 0 : i32
    %c0_i32_1 = arith.constant 0 : i32
    return %c0_i32, %c0_i32_0 : i32, i32
  }
  func.func @transform_6(%arg0: i32, %arg1: i32) -> (i32, i32) {
    %c0_i32 = arith.constant 0 : i32
    %c0_i32_0 = arith.constant 0 : i32
    %c0_i32_1 = arith.constant 0 : i32
    return %c0_i32, %c0_i32_0 : i32, i32
  }
  func.func @transform_7(%arg0: i32, %arg1: i32) -> (i32, i32) {
    %c0_i32 = arith.constant 0 : i32
    %c0_i32_0 = arith.constant 0 : i32
    %c0_i32_1 = arith.constant 0 : i32
    return %c0_i32, %c0_i32_0 : i32, i32
  }
  func.func @transform_8(%arg0: i32, %arg1: i32) -> i32 {
    %c0_i32 = arith.constant 0 : i32
    %c0_i32_0 = arith.constant 0 : i32
    return %c0_i32 : i32
  }
  func.func @transform_9(%arg0: i32, %arg1: i32) -> (i32, i32) {
    %c0_i32 = arith.constant 0 : i32
    %c0_i32_0 = arith.constant 0 : i32
    return %arg0, %c0_i32 : i32, i32
  }
}

</mosaic_0001>

<bundles_post_ra>
// kernel: tpu_custom_call.1
= control target key start
LH: loop header
LB: loop body
LE: loop exit
PB: predicated region body
PF: predicated region fallthrough
CT: control target
= control target key end

     0   :  { %s7651_s0 = inlined_call_operand.hbm [shape: bf16[16,16,768], index: 0, kind: input, shape index: {}]   ;;  %s7652_s1 = inlined_call_operand.hbm [shape: bf16[16,16,768], index: 1, kind: input, shape index: {}]   ;;  %s7653_s2 = inlined_call_operand.hbm [shape: bf16[768,512], index: 2, kind: input, shape index: {}]   ;;  %s7654_s3 = inlined_call_operand.hbm [shape: bf16[768,512], index: 3, kind: input, shape index: {}]   ;;  %s7655_s4 = inlined_call_operand.vmem [shape: f32[1,512], index: 4, kind: input, shape index: {}]   ;;  %s7656_s5 = inlined_call_operand.vmem [shape: bf16[512,64], index: 5, kind: input, shape index: {}]   ;;  %s7657_s6 = inlined_call_operand.vmem [shape: f32[1,64], index: 6, kind: input, shape index: {}]   ;;  %s7658_s7 = inlined_call_operand.vmem [shape: bf16[1,64], index: 7, kind: input, shape index: {}]   ;;  %s7659_s8 = inlined_call_operand.<no memory space> [shape: f32[1], index: 8, kind: input, shape index: {}]   ;;  %s7660_s9 = inlined_call_operand.vmem [shape: f32[16,1], index: 9, kind: output, shape index: {}]  }
   0x1   :  { %7668 = sst [smem:[#allocation31_spill]] %s7651_s0 }
   0x2   :  { %7669 = sst [smem:[#allocation32_spill]] %s7653_s2 }
   0x3   :  { %7670 = sst [smem:[#allocation33_spill]] %s7654_s3 }
   0x4   :  { %7671 = sst [smem:[#allocation34_spill]] %s7655_s4 }
   0x5   :  { %7672 = sst [smem:[#allocation35_spill]] %s7657_s6 }
   0x6   :  { %7673 = sst [smem:[#allocation36_spill]] %s7658_s7 }
   0x7   :  { %14 = sst [smem:[#allocation4]] %s7659_s8 }
   0x8   :  { %15 = vsyncpa [#allocation6], 0 }
   0x9   :  { %17 = vsyncpa [#allocation6 + $0x1], 0 }
   0xa   :  { %18 = vsyncpa [#allocation8], 0 }
   0xb   :  { %20 = vsyncpa [#allocation8 + $0x1], 0 }
   0xc   :  { %21 = vsyncpa [#allocation11], 0  ;;  %s6235_s11 = smov 0   ;;  %s6237_s12 = smov 0  }
   0xd   :  { %s6239_s13 = smov 0   ;;  %s6241_s14 = smov 0  }
   0xe   :  { %s6243_s15 = smov 0   ;;  %s6245_s16 = smov 0  }
   0xf   :  { %s6247_s17 = smov 0   ;;  %s6249_s8 = smov 0  }
  0x10 LB: > { %7674 = sst [smem:[#allocation16_spill]] %s6166_s17  ;;  %s7661_s18 = sadd.s32 4294967295, %s6170_s8   ;;  %s6170_s8 = sphi %s6249_s8, %s27_s8   ;;  %s6166_s17 = sphi %s6247_s17, %s7856_s17   ;;  %s6162_s16 = sphi %s6245_s16, %s7861_s16   ;;  %s6158_s15 = sphi %s6243_s15, %s7854_s15   ;;  %s6154_s14 = sphi %s6241_s14, %s7860_s14   ;;  %s6150_s13 = sphi %s6239_s13, %s7859_s13   ;;  %s6146_s12 = sphi %s6237_s12, %s7858_s12   ;;  %s6142_s11 = sphi %s6235_s11, %s7857_s11  }
  0x11   : > { %p55_p0 = scmp.ne.s32.totalorder %s6150_s13, %s6146_s12  ;;  %p56_p1 = scmp.eq.s32.totalorder %s6170_s8, 0 }
  0x12   : > { %p61_p2 = scmp.ne.s32.totalorder %s6146_s12, %s6142_s11  ;;  %p6281_p3 = scmp.eq.s32.totalorder %s7661_s18, 0 }
  0x13   : > { %p57_p4 = por %p56_p1, %p55_p0  ;;  %p4774_p5 = scmp.ge.s32.totalorder %s6170_s8, 1 }
  0x14   : > { %s7675_s20 = scalar_select %p6281_p3, 1, 0 }
  0x15   : > { %p6288_p6 = por %p6281_p3, %p61_p2  ;;  %p273_p7 = scmp.lt.s32.totalorder %s6170_s8, 5 }
  0x16   : > { %s6172_s23 = smov [#allocation9]   ;;  %p5289_p10 = scmp.lt.s32.totalorder %s6170_s8, 4 }
  0x17   : > { %s7676_s21 = scalar_select %p6288_p6, 1, 0 }
  0x18   : > { %p6293_p8 = pnand %p4774_p5, %p273_p7  ;;  %s285_s24 = sshll.u32 %s6172_s23, 4  ;;  %s6297_s24 = int_to_ptr.vmem [resolvable:$true] %s285_s24 }
  0x19   : > { %p6308_p12 = pnand %p5289_p10, %p57_p4  ;;  %s6173_s27 = smov [#allocation10]  }
  0x1a   : > { %p5273_p9 = pneg %p6293_p8  ;;  %s298_s28 = sshll.u32 %s6173_s27, 4  ;;  %s6312_s28 = int_to_ptr.vmem [resolvable:$true] %s298_s28 }
  0x1b   : > { %s7680_s2 = sld [smem:[#allocation32_spill]] }
  0x1c   : > { %p6304_p11 = pnand %p5273_p9, %p6281_p3 }
  0x1e   : > { %p5978_p0 = pneg %p6304_p11 }
  0x21   : > { %s5976_s10 = scalar_lea.hbm %s7680_s2, 24576 }
  0x22   : > { %p5977_p13 = scmp.ne.s32.totalorder %s7680_s2, %s5976_s10  ;;  %p5983_p4 = scmp.lt.u32.totalorder %s5976_s10, %s7680_s2 }
  0x24   : > { %p5979_p1 = pnand %p5978_p0, %p5977_p13 }
  0x26   : > { %p5980_p2 = pneg %p5979_p1 }
  0x28   : > { %p5985_p5 = pnand %p5983_p4, %p5980_p2 }
  0x2a   : > { %5988 = shalt.err (!%p5985_p5)
}
  0x2b   : > { %s5989_s27 = scalar_lea.vmem %s6297_s24, 24576  ;;  %p5997_p3 = scmp.lt.s32.totalorder %s6297_s24, %s6297_s24 }
  0x2c   : > { %p5990_p7 = scmp.ne.s32.totalorder %s6297_s24, %s5989_s27  ;;  %p5998_p13 = scmp.lt.s32.totalorder %s5989_s27, %s5989_s27 }
  0x2e   : > { %p5992_p9 = pnand %p5990_p7, %p5978_p0  ;;  %p5999_p1 = por %p5998_p13, %p5997_p3 }
  0x30   : > { %p5993_p10 = pneg %p5992_p9 }
  0x32   : > { %p6000_p6 = pnand %p5999_p1, %p5993_p10 }
  0x34   : > { %6003 = shalt.err (!%p6000_p6)
}
  0x35   : > { %s6174_s18 = smov 256   ;;  %s6175_s19 = smov 16  }
  0x36   : > { %5276 = dma.hbm_to_vmem [thread:$0]  (!%p6304_p11), %s7680_s2, 24576, %s6297_s24, [#allocation8], %s6174_s18, %s6174_s18, %s6175_s19  }
  0x37   : > { %s7681_s3 = sld [smem:[#allocation33_spill]] }
  0x3d   : > { %s6004_s23 = scalar_lea.hbm %s7681_s3, 24576 }
  0x3e   : > { %p6005_p3 = scmp.ne.s32.totalorder %s7681_s3, %s6004_s23  ;;  %p6011_p4 = scmp.lt.u32.totalorder %s6004_s23, %s7681_s3 }
  0x40   : > { %p6007_p6 = pnand %p6005_p3, %p5978_p0 }
  0x42   : > { %p6008_p2 = pneg %p6007_p6 }
  0x44   : > { %p6013_p5 = pnand %p6011_p4, %p6008_p2 }
  0x46   : > { %6016 = shalt.err (!%p6013_p5)
}
  0x47   : > { %s6017_s24 = scalar_lea.vmem %s6312_s28, 24576  ;;  %p6025_p13 = scmp.lt.s32.totalorder %s6312_s28, %s6312_s28 }
  0x48   : > { %p6018_p7 = scmp.ne.s32.totalorder %s6312_s28, %s6017_s24  ;;  %p6026_p1 = scmp.lt.s32.totalorder %s6017_s24, %s6017_s24 }
  0x4a   : > { %p6020_p9 = pnand %p6018_p7, %p5978_p0  ;;  %p6027_p3 = por %p6026_p1, %p6025_p13 }
  0x4c   : > { %p6021_p10 = pneg %p6020_p9 }
  0x4e   : > { %p6028_p6 = pnand %p6027_p3, %p6021_p10 }
  0x50   : > { %6031 = shalt.err (!%p6028_p6)
}
  0x51   : > { %5279 = dma.hbm_to_vmem [thread:$0]  (!%p6304_p11), %s7681_s3, 24576, %s6312_s28, [#allocation11], %s6174_s18, %s6174_s18, %s6175_s19  }
  0x52   : > { %s36_s7 = sadd.s32 1, %s6162_s16  ;;  %s39_s29 = sadd.s32 1, %s6166_s17 }
  0x53   : > { %p37_p0 = scmp.ge.s32.totalorder %s36_s7, 2  ;;  %s327_s30 = sand.u32 1, %s6150_s13  }
  0x54   : > { %s5255_s10 = smul.u32 6, %s6162_s16  ;;  %s7684_s0 = sld [smem:[#allocation31_spill]] }
  0x55   : > { %s7863_s7 = smov (%p37_p0, %s36_s7), 0  ;;  %s7865_s29 = smov (!%p37_p0, %s39_s29), %s6166_s17 }
  0x56   : > { %7682 = sst [smem:[#allocation17_spill]] %s7863_s7  ;;  %s44_s25 = ssub.s32 %s6162_s16, %s7863_s7 }
  0x57   : > { %p41_p2 = scmp.ge.s32.totalorder %s7865_s29, 2  ;;  %s6375_s11 = smul.u32 192, %s327_s30 }
  0x58   : > { %s5256_s23 = smul.u32 96, %s6166_s17  ;;  %p6034_p5 = pneg %p6308_p12 }
  0x59   : > { %s7867_s29 = smov (%p41_p2, %s7865_s29), 0  ;;  %s331_s2 = scalar_lea.vmem [#allocation5], %s6375_s11 }
  0x5a   : > { %7683 = sst [smem:[#allocation18_spill]] %s7867_s29  ;;  %s6380_s28 = sadd.s32 %s5256_s23, %s5255_s10 }
  0x5b   : > { %s43_s18 = ssub.s32 %s6166_s17, %s7867_s29  ;;  %s4780_s19 = sshll.u32 %s6380_s28, 6 }
  0x5c   : > { %s45_s27 = sor.u32 %s44_s25, %s43_s18  ;;  %s6390_s6 = scalar_lea.hbm %s7684_s0, %s4780_s19 }
  0x5d   : > { %p46_p11 = scmp.eq.s32.totalorder %s45_s27, 0  ;;  %s341_s3 = sshll.u32 %s331_s2, 4  ;;  %s6393_s3 = int_to_ptr.vmem [resolvable:$true] %s341_s3 }
  0x5e   : > { %s7685_s10 = sadd.s32 1, %s6150_s13  ;;  %s6400_s29 = scalar_lea.sflag [#allocation6], %s327_s30 }
  0x5f   : > { %s6398_s23 = scalar_select %p46_p11, %s6150_s13, %s7685_s10  }
  0x60   : > { %s6032_s25 = scalar_lea.hbm %s6390_s6, 3072  ;;  %s6037_s27 = scalar_lea.hbm %s7684_s0, 12288 }
  0x61   : > { %p6033_p4 = scmp.ne.s32.totalorder %s6390_s6, %s6032_s25  ;;  %p6038_p10 = scmp.lt.u32.totalorder %s6390_s6, %s7684_s0 }
  0x62   : > { %p6039_p13 = scmp.lt.u32.totalorder %s6037_s27, %s6032_s25  ;;  %p6041_p3 = scmp.lt.u32.totalorder %s6032_s25, %s6390_s6 }
  0x63   : > { %p6035_p7 = pnand %p6034_p5, %p6033_p4 }
  0x64   : > { %p6040_p1 = por %p6039_p13, %p6038_p10 }
  0x65   : > { %p6036_p9 = pneg %p6035_p7 }
  0x66   : > { %p6042_p6 = por %p6041_p3, %p6040_p1 }
  0x68   : > { %p6043_p0 = pnand %p6042_p6, %p6036_p9 }
  0x6a   : > { %6046 = shalt.err (!%p6043_p0)
}
  0x6b   : > { %s6047_s30 = scalar_lea.vmem %s6393_s3, 3072  ;;  %s6176_s10 = smov [#allocation5]  }
  0x6c   : > { %p6048_p2 = scmp.ne.s32.totalorder %s6393_s3, %s6047_s30  ;;  %s6052_s18 = sshll.u32 %s6176_s10, 4  ;;  %s6053_s18 = int_to_ptr.vmem [resolvable:$false] %s6052_s18 }
  0x6d   : > { %s6054_s24 = scalar_lea.vmem %s6053_s18, 6144  ;;  %p6055_p7 = scmp.lt.s32.totalorder %s6393_s3, %s6053_s18 }
  0x6e   : > { %p6050_p11 = pnand %p6048_p2, %p6034_p5  ;;  %p6056_p10 = scmp.lt.s32.totalorder %s6054_s24, %s6047_s30 }
  0x70   : > { %p6051_p4 = pneg %p6050_p11  ;;  %p6057_p13 = por %p6056_p10, %p6055_p7 }
  0x72   : > { %p6058_p1 = pnand %p6057_p13, %p6051_p4 }
  0x74   : > { %6061 = shalt.err (!%p6058_p1)
}
  0x75   : > { %s6177_s25 = smov 768   ;;  %s6178_s27 = smov 384  }
  0x76   : > { %s6179_s2 = smov 24   ;;  %s6436_s10 = scalar_lea.hbm %s7652_s1, %s4780_s19 }
  0x77   : > { %5283 = dma.hbm_to_vmem [thread:$0]  (!%p6308_p12), %s6390_s6, 3072, %s6393_s3, %s6400_s29, %s6177_s25, %s6178_s27, %s6179_s2  }
  0x78   : > { %s351_s18 = sand.u32 1, %s6170_s8   ;;  %s355_s24 = scalar_lea.vmem [#allocation7], %s6375_s11 }
  0x79   : > { %s365_s0 = sshll.u32 %s355_s24, 4  ;;  %s6442_s7 = scalar_lea.sflag [#allocation8], %s351_s18  ;;  %s6440_s0 = int_to_ptr.vmem [resolvable:$true] %s365_s0 }
  0x7a   : > { %s6062_s17 = scalar_lea.hbm %s6436_s10, 3072  ;;  %s6067_s28 = scalar_lea.hbm %s7652_s1, 12288 }
  0x7b   : > { %p6063_p9 = scmp.ne.s32.totalorder %s6436_s10, %s6062_s17  ;;  %p6068_p0 = scmp.lt.u32.totalorder %s6436_s10, %s7652_s1 }
  0x7c   : > { %p6069_p2 = scmp.lt.u32.totalorder %s6067_s28, %s6062_s17  ;;  %p6071_p4 = scmp.lt.u32.totalorder %s6062_s17, %s6436_s10 }
  0x7d   : > { %p6065_p3 = pnand %p6063_p9, %p6034_p5 }
  0x7e   : > { %p6070_p11 = por %p6069_p2, %p6068_p0 }
  0x7f   : > { %p6066_p6 = pneg %p6065_p3 }
  0x80   : > { %p6072_p7 = por %p6071_p4, %p6070_p11 }
  0x82   : > { %p6073_p10 = pnand %p6072_p7, %p6066_p6 }
  0x84   : > { %6076 = shalt.err (!%p6073_p10)
}
  0x85   : > { %s6077_s11 = scalar_lea.vmem %s6440_s0, 3072  ;;  %s6180_s4 = smov [#allocation7]  }
  0x86   : > { %p6078_p13 = scmp.ne.s32.totalorder %s6440_s0, %s6077_s11  ;;  %s6082_s30 = sshll.u32 %s6180_s4, 4  ;;  %s6083_s30 = int_to_ptr.vmem [resolvable:$false] %s6082_s30 }
  0x87   : > { %s6084_s18 = scalar_lea.vmem %s6083_s30, 6144  ;;  %p6085_p3 = scmp.lt.s32.totalorder %s6440_s0, %s6083_s30 }
  0x88   : > { %p6080_p1 = pnand %p6078_p13, %p6034_p5  ;;  %p6086_p0 = scmp.lt.s32.totalorder %s6084_s18, %s6077_s11 }
  0x8a   : > { %p6081_p9 = pneg %p6080_p1  ;;  %p6087_p2 = por %p6086_p0, %p6085_p3 }
  0x8c   : > { %p6088_p11 = pnand %p6087_p2, %p6081_p9 }
  0x8e   : > { %6091 = shalt.err (!%p6088_p11)
}
  0x8f   : > { %5286 = dma.hbm_to_vmem [thread:$0]  (!%p6308_p12), %s6436_s10, 3072, %s6440_s0, %s6442_s7, %s6177_s25, %s6178_s27, %s6179_s2  }
  0x90   : > { %377 = sbr.rel (%p6293_p8) target bundleno = 1376 (0x560), region = 56 }
  0x97   : > { %s379_s17 = sand.u32 1, %s6146_s12   ;;  %p7686_p5 = scmp.ne.s32.totalorder %s7676_s21, 0 }
  0x98   : > { %s5260_s24 = smul.u32 192, %s379_s17  ;;  %s380_s3 = scalar_lea.sflag [#allocation6], %s379_s17 }
  0x9a   : > { %s6474_s29 = scalar_lea.vmem [#allocation5], %s5260_s24 }
  0x9b   : > { %6125 = dma.done.wait (%p7686_p5), %s380_s3, 3072  }
  0x9c   : > { %6127 = vsyncadd (%p7686_p5), %s380_s3, 4294964224  ;;  %s7687_s26 = sadd.s32 4294967295, %s6170_s8   ;;  %s6482_s7 = scalar_lea.vmem [#allocation7], %s5260_s24 }
  0x9d   : > { %s388_s28 = sand.u32 1, %s7687_s26  }
  0x9e   : > { %s389_s0 = scalar_lea.sflag [#allocation8], %s388_s28 }
  0x9f   : > { %6129 = dma.done.wait (%p7686_p5), %s389_s0, 3072  }
  0xa0   : > { %6131 = vsyncadd (%p7686_p5), %s389_s0, 4294964224  ;;  %p7688_p8 = scmp.ne.s32.totalorder %s7675_s20, 0 }
  0xa2   : > { %6133 = dma.done.wait (%p7688_p8), [#allocation8], 24576  }
  0xa3   : > { %6135 = vsyncadd (%p7688_p8), [#allocation8], 4294942720 }
  0xa4   : > { %6137 = dma.done.wait (%p7688_p8), [#allocation11], 24576  }
  0xa5   : > { %6139 = vsyncadd (%p7688_p8), [#allocation11], 4294942720  ;;  %p441_p12 = scmp.lt.s32.totalorder %s6158_s15, 1  ;;  %p4788_p6 = scmp.ne.s32.totalorder %s6154_s14, 0 }
  0xa6   : > { %v6181_v0 = vmov (!%p4788_p6), 0.0  }
  0xa7   : > { %s7869_s15 = smov (!%p441_p12, %s6158_s15), 1  ;;  %449 = sbr.rel (%p4788_p6) target bundleno = 174 (0xae), region = 76 }
  0xa8   : > { %s4787_s22 = sshll.u32 %s7869_s15, 3  ;;  %450 = vst [vmem:[#allocation2] sm:$0xff] (!%p4788_p6), %v6181_v0  ;;  %451 = vst [vmem:[#allocation2 + $0x8] sm:$0xff] (!%p4788_p6), %v6181_v0 }
  0xa9   : > { %s6501_s27 = scalar_lea.vmem %s7660_s9, %s4787_s22  ;;  %452 = vst [vmem:[#allocation2 + $0x10] sm:$0xff] (!%p4788_p6), %v6181_v0  ;;  %453 = vst [vmem:[#allocation2 + $0x18] sm:$0xff] (!%p4788_p6), %v6181_v0 }
  0xaa   : > { %454 = vst [vmem:[#allocation2 + $0x20] sm:$0xff] (!%p4788_p6), %v6181_v0  ;;  %455 = vst [vmem:[#allocation2 + $0x28] sm:$0xff] (!%p4788_p6), %v6181_v0 }
  0xab   : > { %456 = vst [vmem:[#allocation3] sm:$0xff] (!%p4788_p6), %v6181_v0  ;;  %457 = vst [vmem:[#allocation3 + $0x8] sm:$0xff] (!%p4788_p6), %v6181_v0 }
  0xac   : > { %458 = vst [vmem:[#allocation3 + $0x10] sm:$0xff] (!%p4788_p6), %v6181_v0  ;;  %459 = vst [vmem:[#allocation3 + $0x18] sm:$0xff] (!%p4788_p6), %v6181_v0 }
  0xad   : > { %460 = vst [vmem:[#allocation3 + $0x20] sm:$0xff] (!%p4788_p6), %v6181_v0  ;;  %461 = vst [vmem:[#allocation3 + $0x28] sm:$0xff] (!%p4788_p6), %v6181_v0 }
  0xae PF: > { %v6505_v1 = vld [vmem:[%s6474_s29] sm:$0xff]  ;;  %v6508_v2 = vld [vmem:[%s6474_s29 + $0x8] sm:$0xff]  ;;  %v6511_v3 = vld [vmem:[%s6474_s29 + $0x10] sm:$0xff]  ;;  %vm876_vm0 = vcmask 1041409   ;;  %vm878_vm1 = vcmask 1042434   ;;  %vm880_vm2 = vcmask 1043459  }
  0xaf   : > { %v6514_v4 = vld [vmem:[%s6474_s29 + $0x18] sm:$0xff]  ;;  %v6517_v5 = vld [vmem:[%s6474_s29 + $0x20] sm:$0xff]  ;;  %v6520_v6 = vld [vmem:[%s6474_s29 + $0x28] sm:$0xff]  ;;  %v492_v7 = vunpack.c.l.bf16 %v6505_v1  ;;  %v493_v8 = vunpack.c.h.bf16 %v6505_v1  ;;  %v494_v12 = vunpack.c.l.bf16 %v6508_v2  ;;  %v495_v13 = vunpack.c.h.bf16 %v6508_v2  ;;  %p4789_p4 = scmp.ne.s32.totalorder %s6154_s14, 1 }
  0xb0   : > { %v6525_v9 = vld [vmem:[%s6474_s29 + $0x30] sm:$0xff]  ;;  %v6528_v10 = vld [vmem:[%s6474_s29 + $0x38] sm:$0xff]  ;;  %v6531_v11 = vld [vmem:[%s6474_s29 + $0x40] sm:$0xff]  ;;  %v496_v14 = vunpack.c.l.bf16 %v6511_v3  ;;  %v497_v15 = vunpack.c.h.bf16 %v6511_v3  ;;  %v498_v18 = vunpack.c.l.bf16 %v6514_v4  ;;  %v499_v19 = vunpack.c.h.bf16 %v6514_v4  ;;  %s7851_s14 = sld [smem:[#allocation34_spill]] (!%p4789_p4)  ;;  %s7852_s2 = sld [smem:[#allocation36_spill]] (!%p4789_p4) }
  0xb1   : > { %v6538_v16 = vld [vmem:[%s6474_s29 + $0x48] sm:$0xff]  ;;  %v6541_v17 = vld [vmem:[%s6474_s29 + $0x50] sm:$0xff]  ;;  %v500_v20 = vunpack.c.l.bf16 %v6517_v5  ;;  %v501_v21 = vunpack.c.h.bf16 %v6517_v5  ;;  %v6548_v22 = vld [vmem:[%s6474_s29 + $0x58] sm:$0xff]  ;;  %v502_v24 = vunpack.c.l.bf16 %v6520_v6  ;;  %v503_v25 = vunpack.c.h.bf16 %v6520_v6  ;;  %s7853_s6 = sld [smem:[#allocation35_spill]] (!%p4789_p4)  ;;  %s4637_s11 = sld [smem:[#allocation4]] (!%p4789_p4) }
  0xb2   : > { %v6551_v23 = vld [vmem:[%s6474_s29 + $0x60] sm:$0xff]  ;;  %v504_v26 = vunpack.c.l.bf16 %v6525_v9  ;;  %v505_v27 = vunpack.c.h.bf16 %v6525_v9  ;;  %v6558_v28 = vld [vmem:[%s6474_s29 + $0x68] sm:$0xff]  ;;  %v6561_v29 = vld [vmem:[%s6474_s29 + $0x70] sm:$0xff]  ;;  %v506_v30 = vunpack.c.l.bf16 %v6528_v10  ;;  %v507_v31 = vunpack.c.h.bf16 %v6528_v10 }
  0xb3   : > { %v508_v32 = vunpack.c.l.bf16 %v6531_v11  ;;  %v509_v33 = vunpack.c.h.bf16 %v6531_v11  ;;  %v6568_v34 = vld [vmem:[%s6474_s29 + $0x78] sm:$0xff]  ;;  %v6571_v35 = vld [vmem:[%s6474_s29 + $0x80] sm:$0xff]  ;;  %v510_v36 = vunpack.c.l.bf16 %v6538_v16  ;;  %v6578_v40 = vld [vmem:[%s6474_s29 + $0x88] sm:$0xff]  ;;  %v540_v60 = vrot.slane %v492_v7, 4 }
  0xb4   : > { %v6581_v41 = vld [vmem:[%s6474_s29 + $0x90] sm:$0xff]  ;;  %v6588_v46 = vld [vmem:[%s6474_s29 + $0x98] sm:$0xff]  ;;  %v6591_v47 = vld [vmem:[%s6474_s29 + $0xa0] sm:$0xff]  ;;  %v546_v62 = vrot.slane %v493_v8, 4  ;;  %v552_v63 = vrot.slane %v494_v12, 4  ;;  %v558_v55 = vrot.slane %v495_v13, 4 }
  0xb5   : > { %v6598_v52 = vld [vmem:[%s6474_s29 + $0xa8] sm:$0xff]  ;;  %v6601_v53 = vld [vmem:[%s6474_s29 + $0xb0] sm:$0xff]  ;;  %v564_v56 = vrot.slane %v496_v14, 4  ;;  %v570_v58 = vrot.slane %v497_v15, 4  ;;  %v576_v59 = vrot.slane %v498_v18, 4  ;;  %v582_v57 = vrot.slane %v499_v19, 4 }
  0xb6   : > { %v541_v0 = vadd.f32 %v540_v60, %v492_v7  ;;  %v547_v61 = vadd.f32 %v546_v62, %v493_v8  ;;  %v553_v54 = vadd.f32 %v552_v63, %v494_v12  ;;  %v559_v51 = vadd.f32 %v558_v55, %v495_v13  ;;  %v6652_v55 = vld [vmem:[%s6474_s29 + $0xb8] sm:$0xff] }
  0xb7   : > { %v565_v50 = vadd.f32 %v564_v56, %v496_v14  ;;  %v571_v49 = vadd.f32 %v570_v58, %v497_v15  ;;  %v577_v48 = vadd.f32 %v576_v59, %v498_v18  ;;  %v583_v1 = vadd.f32 %v582_v57, %v499_v19 }
  0xb8   : > { %v542_v7 = vrot.slane %v541_v0, 2  ;;  %v548_v8 = vrot.slane %v547_v61, 2  ;;  %v554_v60 = vrot.slane %v553_v54, 2  ;;  %v560_v62 = vrot.slane %v559_v51, 2 }
  0xb9   : > { %v566_v12 = vrot.slane %v565_v50, 2  ;;  %v572_v63 = vrot.slane %v571_v49, 2  ;;  %v578_v2 = vrot.slane %v577_v48, 2  ;;  %v584_v13 = vrot.slane %v583_v1, 2 }
  0xba   : > { %v543_v14 = vadd.f32 %v542_v7, %v541_v0  ;;  %v549_v56 = vadd.f32 %v548_v8, %v547_v61  ;;  %v555_v3 = vadd.f32 %v554_v60, %v553_v54  ;;  %v561_v15 = vadd.f32 %v560_v62, %v559_v51 }
  0xbb   : > { %v567_v58 = vadd.f32 %v566_v12, %v565_v50  ;;  %v573_v45 = vadd.f32 %v572_v63, %v571_v49  ;;  %v579_v18 = vadd.f32 %v578_v2, %v577_v48  ;;  %v585_v59 = vadd.f32 %v584_v13, %v583_v1 }
  0xbc   : > { %v544_v4 = vrot.slane %v543_v14, 1  ;;  %v550_v19 = vrot.slane %v549_v56, 1  ;;  %v556_v57 = vrot.slane %v555_v3, 1  ;;  %v562_v44 = vrot.slane %v561_v15, 1 }
  0xbd   : > { %v568_v39 = vrot.slane %v567_v58, 1  ;;  %v574_v38 = vrot.slane %v573_v45, 1  ;;  %v580_v54 = vrot.slane %v579_v18, 1  ;;  %v586_v51 = vrot.slane %v585_v59, 1 }
  0xbe   : > { %v6656_v37 = vadd.f32 %v544_v4, %v543_v14  ;;  %v6658_v0 = vadd.f32 %v550_v19, %v549_v56  ;;  %v6660_v50 = vadd.f32 %v556_v57, %v555_v3  ;;  %v6662_v48 = vadd.f32 %v562_v44, %v561_v15 }
  0xbf   : > { %v6664_v49 = vadd.f32 %v568_v39, %v567_v58  ;;  %v6666_v61 = vadd.f32 %v574_v38, %v573_v45  ;;  %v588_v1 = vrot.slane %v500_v20, 4  ;;  %v594_v7 = vrot.slane %v501_v21, 4 }
  0xc0   : > { %v600_v8 = vrot.slane %v502_v24, 4  ;;  %v606_v60 = vrot.slane %v503_v25, 4  ;;  %v612_v44 = vrot.slane %v504_v26, 4  ;;  %v618_v39 = vrot.slane %v505_v27, 4 }
  0xc1   : > { %7689 = vst [vmem:[#allocation19_spill] sm:$0xff] %v6666_v61  ;;  %v624_v38 = vrot.slane %v506_v30, 4  ;;  %v630_v45 = vrot.slane %v507_v31, 4  ;;  %v589_v62 = vadd.f32 %v588_v1, %v500_v20  ;;  %v595_v12 = vadd.f32 %v594_v7, %v501_v21 }
  0xc2   : > { %v601_v63 = vadd.f32 %v600_v8, %v502_v24  ;;  %v607_v2 = vadd.f32 %v606_v60, %v503_v25  ;;  %v613_v13 = vadd.f32 %v612_v44, %v504_v26  ;;  %v619_v14 = vadd.f32 %v618_v39, %v505_v27 }
  0xc3   : > { %v625_v56 = vadd.f32 %v624_v38, %v506_v30  ;;  %v631_v20 = vadd.f32 %v630_v45, %v507_v31  ;;  %v590_v5 = vrot.slane %v589_v62, 2  ;;  %v596_v21 = vrot.slane %v595_v12, 2 }
  0xc4   : > { %v602_v3 = vrot.slane %v601_v63, 2  ;;  %v608_v15 = vrot.slane %v607_v2, 2  ;;  %v614_v24 = vrot.slane %v613_v13, 2  ;;  %v620_v58 = vrot.slane %v619_v14, 2 }
  0xc5   : > { %v626_v6 = vrot.slane %v625_v56, 2  ;;  %v632_v25 = vrot.slane %v631_v20, 2  ;;  %v591_v4 = vadd.f32 %v590_v5, %v589_v62  ;;  %v597_v19 = vadd.f32 %v596_v21, %v595_v12 }
  0xc6   : > { %v603_v26 = vadd.f32 %v602_v3, %v601_v63  ;;  %v609_v57 = vadd.f32 %v608_v15, %v607_v2  ;;  %v615_v9 = vadd.f32 %v614_v24, %v613_v13  ;;  %v621_v27 = vadd.f32 %v620_v58, %v619_v14 }
  0xc7   : > { %v627_v1 = vadd.f32 %v626_v6, %v625_v56  ;;  %v633_v7 = vadd.f32 %v632_v25, %v631_v20  ;;  %v592_v30 = vrot.slane %v591_v4, 1  ;;  %v598_v8 = vrot.slane %v597_v19, 1 }
  0xc8   : > { %v604_v10 = vrot.slane %v603_v26, 1  ;;  %v610_v31 = vrot.slane %v609_v57, 1  ;;  %v6700_v60 = vadd.f32 %v580_v54, %v579_v18  ;;  %v6702_v44 = vadd.f32 %v586_v51, %v585_v59 }
  0xc9   : > { %v616_v39 = vrot.slane %v615_v9, 1  ;;  %v622_v38 = vrot.slane %v621_v27, 1  ;;  %v6704_v45 = vadd.f32 %v592_v30, %v591_v4  ;;  %v6706_v62 = vadd.f32 %v598_v8, %v597_v19 }
  0xca   : > { %v628_v12 = vrot.slane %v627_v1, 1  ;;  %v634_v63 = vrot.slane %v633_v7, 1  ;;  %v6708_v2 = vadd.f32 %v604_v10, %v603_v26  ;;  %v6710_v13 = vadd.f32 %v610_v31, %v609_v57 }
  0xcb   : > { %v6712_v14 = vadd.f32 %v616_v39, %v615_v9  ;;  %v6714_v56 = vadd.f32 %v622_v38, %v621_v27  ;;  %v636_v18 = vrot.slane %v508_v32, 4  ;;  %v642_v59 = vrot.slane %v509_v33, 4 }
  0xcc   : > { %7690 = vst [vmem:[#allocation20_spill] sm:$0xff] %v6708_v2  ;;  %7691 = vst [vmem:[#allocation21_spill] sm:$0xff] %v6710_v13  ;;  %v648_v54 = vrot.slane %v510_v36, 4  ;;  %v7692_v51 = vunpack.c.h.bf16 %v6538_v16  ;;  %v7693_v5 = vunpack.c.l.bf16 %v6541_v17  ;;  %v7694_v3 = vunpack.c.h.bf16 %v6541_v17 }
  0xcd   : > { %v7695_v24 = vunpack.c.l.bf16 %v6548_v22  ;;  %v7696_v6 = vunpack.c.h.bf16 %v6548_v22  ;;  %v637_v4 = vadd.f32 %v636_v18, %v508_v32  ;;  %v643_v19 = vadd.f32 %v642_v59, %v509_v33 }
  0xce   : > { %v654_v20 = vrot.slane %v7692_v51, 4  ;;  %v660_v21 = vrot.slane %v7693_v5, 4  ;;  %v666_v15 = vrot.slane %v7694_v3, 4  ;;  %v649_v26 = vadd.f32 %v648_v54, %v510_v36 }
  0xcf   : > { %v672_v58 = vrot.slane %v7695_v24, 4  ;;  %v678_v25 = vrot.slane %v7696_v6, 4  ;;  %v7697_v57 = vmov %v7692_v51  ;;  %v7698_v27 = vmov %v7693_v5 }
  0xd0   : > { %v655_v9 = vadd.f32 %v654_v20, %v7697_v57  ;;  %v661_v30 = vadd.f32 %v660_v21, %v7698_v27  ;;  %v7699_v8 = vmov %v7694_v3  ;;  %v7700_v31 = vmov %v7695_v24 }
  0xd1   : > { %v667_v10 = vadd.f32 %v666_v15, %v7699_v8  ;;  %v673_v39 = vadd.f32 %v672_v58, %v7700_v31  ;;  %v7701_v32 = vmov %v7696_v6  ;;  %v638_v11 = vrot.slane %v637_v4, 2 }
  0xd2   : > { %v679_v38 = vadd.f32 %v678_v25, %v7701_v32  ;;  %v644_v33 = vrot.slane %v643_v19, 2  ;;  %v650_v18 = vrot.slane %v649_v26, 2  ;;  %v656_v59 = vrot.slane %v655_v9, 2 }
  0xd3   : > { %v662_v36 = vrot.slane %v661_v30, 2  ;;  %v668_v54 = vrot.slane %v667_v10, 2  ;;  %v674_v16 = vrot.slane %v673_v39, 2  ;;  %v639_v20 = vadd.f32 %v638_v11, %v637_v4 }
  0xd4   : > { %v680_v51 = vrot.slane %v679_v38, 2  ;;  %v645_v5 = vadd.f32 %v644_v33, %v643_v19  ;;  %v651_v21 = vadd.f32 %v650_v18, %v649_v26  ;;  %v657_v3 = vadd.f32 %v656_v59, %v655_v9 }
  0xd5   : > { %v663_v17 = vadd.f32 %v662_v36, %v661_v30  ;;  %v669_v15 = vadd.f32 %v668_v54, %v667_v10  ;;  %v675_v24 = vadd.f32 %v674_v16, %v673_v39  ;;  %v640_v58 = vrot.slane %v639_v20, 1 }
  0xd6   : > { %v681_v6 = vadd.f32 %v680_v51, %v679_v38  ;;  %v646_v57 = vrot.slane %v645_v5, 1  ;;  %v652_v22 = vrot.slane %v651_v21, 1  ;;  %v658_v25 = vrot.slane %v657_v3, 1 }
  0xd7   : > { %v6748_v27 = vadd.f32 %v628_v12, %v627_v1  ;;  %v6750_v8 = vadd.f32 %v634_v63, %v633_v7  ;;  %v664_v31 = vrot.slane %v663_v17, 1  ;;  %v670_v32 = vrot.slane %v669_v15, 1 }
  0xd8   : > { %v6752_v42 = vadd.f32 %v640_v58, %v639_v20  ;;  %v6754_v4 = vadd.f32 %v646_v57, %v645_v5  ;;  %v676_v19 = vrot.slane %v675_v24, 1  ;;  %v682_v26 = vrot.slane %v681_v6, 1 }
  0xd9   : > { %v6756_v9 = vadd.f32 %v652_v22, %v651_v21  ;;  %v6758_v30 = vadd.f32 %v658_v25, %v657_v3  ;;  %v6760_v10 = vadd.f32 %v664_v31, %v663_v17  ;;  %v6762_v39 = vadd.f32 %v670_v32, %v669_v15 }
  0xda   : > { %7702 = vst [vmem:[#allocation22_spill] sm:$0xff] %v6752_v42  ;;  %7703 = vst [vmem:[#allocation23_spill] sm:$0xff] %v6754_v4  ;;  %v7704_v1 = vunpack.c.l.bf16 %v6551_v23  ;;  %v7705_v12 = vunpack.c.h.bf16 %v6551_v23  ;;  %v7706_v38 = vunpack.c.l.bf16 %v6558_v28  ;;  %v7707_v33 = vunpack.c.h.bf16 %v6558_v28 }
  0xdb   : > { %v7708_v59 = vunpack.c.l.bf16 %v6561_v29  ;;  %v7709_v54 = vunpack.c.h.bf16 %v6561_v29  ;;  %v7710_v51 = vunpack.c.l.bf16 %v6568_v34  ;;  %v7711_v5 = vunpack.c.h.bf16 %v6568_v34 }
  0xdc   : > { %v684_v7 = vrot.slane %v7704_v1, 4  ;;  %v690_v63 = vrot.slane %v7705_v12, 4  ;;  %v696_v11 = vrot.slane %v7706_v38, 4  ;;  %v702_v18 = vrot.slane %v7707_v33, 4 }
  0xdd   : > { %v708_v36 = vrot.slane %v7708_v59, 4  ;;  %v714_v16 = vrot.slane %v7709_v54, 4  ;;  %v720_v20 = vrot.slane %v7710_v51, 4  ;;  %v726_v21 = vrot.slane %v7711_v5, 4 }
  0xde   : > { %v7712_v3 = vmov %v7704_v1  ;;  %v7713_v15 = vmov %v7705_v12  ;;  %v7714_v57 = vmov %v7706_v38  ;;  %v7715_v25 = vmov %v7707_v33 }
  0xdf   : > { %v685_v17 = vadd.f32 %v684_v7, %v7712_v3  ;;  %v691_v58 = vadd.f32 %v690_v63, %v7713_v15  ;;  %v697_v22 = vadd.f32 %v696_v11, %v7714_v57  ;;  %v703_v31 = vadd.f32 %v702_v18, %v7715_v25 }
  0xe0   : > { %v7716_v32 = vmov %v7708_v59  ;;  %v7717_v12 = vmov %v7709_v54  ;;  %v7718_v33 = vmov %v7710_v51  ;;  %v7719_v7 = vmov %v7711_v5 }
  0xe1   : > { %v709_v1 = vadd.f32 %v708_v36, %v7716_v32  ;;  %v715_v38 = vadd.f32 %v714_v16, %v7717_v12  ;;  %v721_v59 = vadd.f32 %v720_v20, %v7718_v33  ;;  %v727_v54 = vadd.f32 %v726_v21, %v7719_v7 }
  0xe2   : > { %v686_v23 = vrot.slane %v685_v17, 2  ;;  %v692_v63 = vrot.slane %v691_v58, 2  ;;  %v698_v51 = vrot.slane %v697_v22, 2  ;;  %v704_v5 = vrot.slane %v703_v31, 2 }
  0xe3   : > { %v710_v11 = vrot.slane %v709_v1, 2  ;;  %v716_v3 = vrot.slane %v715_v38, 2  ;;  %v722_v28 = vrot.slane %v721_v59, 2  ;;  %v728_v18 = vrot.slane %v727_v54, 2 }
  0xe4   : > { %v687_v15 = vadd.f32 %v686_v23, %v685_v17  ;;  %v693_v57 = vadd.f32 %v692_v63, %v691_v58  ;;  %v699_v36 = vadd.f32 %v698_v51, %v697_v22  ;;  %v705_v25 = vadd.f32 %v704_v5, %v703_v31 }
  0xe5   : > { %v711_v29 = vadd.f32 %v710_v11, %v709_v1  ;;  %v717_v16 = vadd.f32 %v716_v3, %v715_v38  ;;  %v723_v32 = vadd.f32 %v722_v28, %v721_v59  ;;  %v729_v12 = vadd.f32 %v728_v18, %v727_v54 }
  0xe6   : > { %v688_v20 = vrot.slane %v687_v15, 1  ;;  %v694_v33 = vrot.slane %v693_v57, 1  ;;  %v700_v34 = vrot.slane %v699_v36, 1  ;;  %v706_v21 = vrot.slane %v705_v25, 1 }
  0xe7   : > { %v6796_v7 = vadd.f32 %v676_v19, %v675_v24  ;;  %v6798_v43 = vadd.f32 %v682_v26, %v681_v6  ;;  %v712_v4 = vrot.slane %v711_v29, 1  ;;  %v718_v42 = vrot.slane %v717_v16, 1 }
  0xe8   : > { %v6800_v13 = vadd.f32 %v688_v20, %v687_v15  ;;  %v6802_v17 = vadd.f32 %v694_v33, %v693_v57  ;;  %v724_v58 = vrot.slane %v723_v32, 1  ;;  %v730_v22 = vrot.slane %v729_v12, 1 }
  0xe9   : > { %7720 = vst [vmem:[#allocation24_spill] sm:$0xff] %v6796_v7  ;;  %7721 = vst [vmem:[#allocation25_spill] sm:$0xff] %v6798_v43  ;;  %v6804_v31 = vadd.f32 %v700_v34, %v699_v36  ;;  %v6806_v1 = vadd.f32 %v706_v21, %v705_v25  ;;  %v6808_v38 = vadd.f32 %v712_v4, %v711_v29  ;;  %v7724_v24 = vunpack.c.l.bf16 %v6571_v35 }
  0xea   : > { %v6810_v59 = vadd.f32 %v718_v42, %v717_v16  ;;  %v7725_v19 = vunpack.c.h.bf16 %v6571_v35  ;;  %v7726_v54 = vunpack.c.l.bf16 %v6578_v40  ;;  %v7727_v63 = vunpack.c.h.bf16 %v6578_v40 }
  0xeb   : > { %7722 = vst [vmem:[#allocation26_spill] sm:$0xff] %v6808_v38  ;;  %v732_v6 = vrot.slane %v7724_v24, 4  ;;  %v7728_v5 = vunpack.c.l.bf16 %v6581_v41  ;;  %v7729_v4 = vunpack.c.h.bf16 %v6581_v41  ;;  %v7730_v42 = vunpack.c.l.bf16 %v6588_v46 }
  0xec   : > { %7723 = vst [vmem:[#allocation27_spill] sm:$0xff] %v6810_v59  ;;  %v738_v26 = vrot.slane %v7725_v19, 4  ;;  %v744_v23 = vrot.slane %v7726_v54, 4  ;;  %v750_v51 = vrot.slane %v7727_v63, 4  ;;  %v7731_v18 = vunpack.c.h.bf16 %v6588_v46 }
  0xed   : > { %v756_v11 = vrot.slane %v7728_v5, 4  ;;  %v762_v3 = vrot.slane %v7729_v4, 4  ;;  %v768_v28 = vrot.slane %v7730_v42, 4  ;;  %v7732_v57 = vmov %v7724_v24 }
  0xee   : > { %v774_v15 = vrot.slane %v7731_v18, 4  ;;  %v733_v36 = vadd.f32 %v732_v6, %v7732_v57  ;;  %v7733_v25 = vmov %v7725_v19  ;;  %v7734_v16 = vmov %v7726_v54 }
  0xef   : > { %v739_v29 = vadd.f32 %v738_v26, %v7733_v25  ;;  %v745_v20 = vadd.f32 %v744_v23, %v7734_v16  ;;  %v7735_v33 = vmov %v7727_v63  ;;  %v7736_v21 = vmov %v7728_v5 }
  0xf0   : > { %v751_v34 = vadd.f32 %v750_v51, %v7735_v33  ;;  %v757_v24 = vadd.f32 %v756_v11, %v7736_v21  ;;  %v7737_v19 = vmov %v7729_v4  ;;  %v7738_v63 = vmov %v7730_v42 }
  0xf1   : > { %v763_v54 = vadd.f32 %v762_v3, %v7737_v19  ;;  %v769_v5 = vadd.f32 %v768_v28, %v7738_v63  ;;  %v7739_v6 = vmov %v7731_v18  ;;  %v734_v35 = vrot.slane %v733_v36, 2 }
  0xf2   : > { %v775_v4 = vadd.f32 %v774_v15, %v7739_v6  ;;  %v740_v26 = vrot.slane %v739_v29, 2  ;;  %v746_v42 = vrot.slane %v745_v20, 2  ;;  %v752_v18 = vrot.slane %v751_v34, 2 }
  0xf3   : > { %v758_v23 = vrot.slane %v757_v24, 2  ;;  %v764_v57 = vrot.slane %v763_v54, 2  ;;  %v770_v40 = vrot.slane %v769_v5, 2  ;;  %v735_v25 = vadd.f32 %v734_v35, %v733_v36 }
  0xf4   : > { %v776_v51 = vrot.slane %v775_v4, 2  ;;  %v741_v16 = vadd.f32 %v740_v26, %v739_v29  ;;  %v747_v11 = vadd.f32 %v746_v42, %v745_v20  ;;  %v753_v33 = vadd.f32 %v752_v18, %v751_v34 }
  0xf5   : > { %v759_v41 = vadd.f32 %v758_v23, %v757_v24  ;;  %v765_v3 = vadd.f32 %v764_v57, %v763_v54  ;;  %v771_v21 = vadd.f32 %v770_v40, %v769_v5  ;;  %v736_v28 = vrot.slane %v735_v25, 1 }
  0xf6   : > { %v777_v19 = vadd.f32 %v776_v51, %v775_v4  ;;  %v742_v63 = vrot.slane %v741_v16, 1  ;;  %v748_v46 = vrot.slane %v747_v11, 1  ;;  %v754_v15 = vrot.slane %v753_v33, 1 }
  0xf7   : > { %v6844_v6 = vadd.f32 %v724_v58, %v723_v32  ;;  %v6846_v59 = vadd.f32 %v730_v22, %v729_v12  ;;  %v760_v38 = vrot.slane %v759_v41, 1  ;;  %v766_v43 = vrot.slane %v765_v3, 1 }
  0xf8   : > { %v6848_v7 = vadd.f32 %v736_v28, %v735_v25  ;;  %v6850_v36 = vadd.f32 %v742_v63, %v741_v16  ;;  %v772_v29 = vrot.slane %v771_v21, 1  ;;  %v778_v20 = vrot.slane %v777_v19, 1 }
  0xf9   : > { %v6852_v34 = vadd.f32 %v748_v46, %v747_v11  ;;  %v6854_v24 = vadd.f32 %v754_v15, %v753_v33  ;;  %v6856_v54 = vadd.f32 %v760_v38, %v759_v41  ;;  %v6858_v5 = vadd.f32 %v766_v43, %v765_v3 }
  0xfa   : > { %v7742_v32 = vunpack.c.l.bf16 %v6591_v47  ;;  %v7743_v58 = vunpack.c.h.bf16 %v6591_v47  ;;  %v7744_v4 = vunpack.c.l.bf16 %v6598_v52  ;;  %v7745_v26 = vunpack.c.h.bf16 %v6598_v52 }
  0xfb   : > { %7740 = vst [vmem:[#allocation28_spill] sm:$0xff] %v6852_v34  ;;  %7741 = vst [vmem:[#allocation29_spill] sm:$0xff] %v6854_v24  ;;  %v7746_v18 = vunpack.c.l.bf16 %v6601_v53  ;;  %v7747_v38 = vunpack.c.h.bf16 %v6601_v53  ;;  %v7748_v43 = vunpack.c.l.bf16 %v6652_v55  ;;  %v7749_v51 = vunpack.c.h.bf16 %v6652_v55 }
  0xfc   : > { %v780_v12 = vrot.slane %v7742_v32, 4  ;;  %v786_v22 = vrot.slane %v7743_v58, 4  ;;  %v792_v35 = vrot.slane %v7744_v4, 4  ;;  %v798_v42 = vrot.slane %v7745_v26, 4 }
  0xfd   : > { %v804_v23 = vrot.slane %v7746_v18, 4  ;;  %v810_v57 = vrot.slane %v7747_v38, 4  ;;  %v816_v40 = vrot.slane %v7748_v43, 4  ;;  %v822_v25 = vrot.slane %v7749_v51, 4 }
  0xfe   : > { %v7750_v16 = vmov %v7742_v32  ;;  %v7751_v33 = vmov %v7743_v58  ;;  %v7752_v3 = vmov %v7744_v4  ;;  %v7753_v63 = vmov %v7745_v26 }
  0xff   : > { %v781_v11 = vadd.f32 %v780_v12, %v7750_v16  ;;  %v787_v41 = vadd.f32 %v786_v22, %v7751_v33  ;;  %v793_v28 = vadd.f32 %v792_v35, %v7752_v3  ;;  %v799_v46 = vadd.f32 %v798_v42, %v7753_v63 }
 0x100   : > { %v7754_v15 = vmov %v7746_v18  ;;  %v7755_v58 = vmov %v7747_v38  ;;  %v7756_v26 = vmov %v7748_v43  ;;  %v7757_v12 = vmov %v7749_v51 }
 0x101   : > { %v805_v32 = vadd.f32 %v804_v23, %v7754_v15  ;;  %v811_v4 = vadd.f32 %v810_v57, %v7755_v58  ;;  %v817_v18 = vadd.f32 %v816_v40, %v7756_v26  ;;  %v823_v47 = vadd.f32 %v822_v25, %v7757_v12 }
 0x102   : > { %v782_v22 = vrot.slane %v781_v11, 2  ;;  %v788_v38 = vrot.slane %v787_v41, 2  ;;  %v794_v35 = vrot.slane %v793_v28, 2  ;;  %v800_v43 = vrot.slane %v799_v46, 2 }
 0x103   : > { %vm882_vm3 = vcmask 1044484   ;;  %v806_v52 = vrot.slane %v805_v32, 2  ;;  %v812_v42 = vrot.slane %v811_v4, 2  ;;  %v818_v51 = vrot.slane %v817_v18, 2 }
 0x104   : > { %v824_v16 = vrot.slane %v823_v47, 2  ;;  %vm884_vm4 = vcmask 1045509   ;;  %v783_v23 = vadd.f32 %v782_v22, %v781_v11  ;;  %v789_v53 = vadd.f32 %v788_v38, %v787_v41  ;;  %v7758_v38 = vld [vmem:[#allocation20_spill] sm:$0xff] }
 0x105   : > { %v795_v57 = vadd.f32 %v794_v35, %v793_v28  ;;  %v801_v33 = vadd.f32 %v800_v43, %v799_v46  ;;  %vm886_vm5 = vcmask 1046534   ;;  %v807_v40 = vadd.f32 %v806_v52, %v805_v32  ;;  %v7759_v35 = vld [vmem:[#allocation19_spill] sm:$0xff]  ;;  %v7760_v43 = vld [vmem:[#allocation21_spill] sm:$0xff] }
 0x106   : > { %v813_v3 = vadd.f32 %v812_v42, %v811_v4  ;;  %v819_v55 = vadd.f32 %v818_v51, %v817_v18  ;;  %v825_v25 = vadd.f32 %v824_v16, %v823_v47  ;;  %vm888_vm6 = vcmask 1047559   ;;  %v7761_v51 = vld [vmem:[#allocation22_spill] sm:$0xff] }
 0x107   : > { %v784_v63 = vrot.slane %v783_v23, 1  ;;  %v790_v15 = vrot.slane %v789_v53, 1  ;;  %v796_v58 = vrot.slane %v795_v57, 1  ;;  %v802_v26 = vrot.slane %v801_v33, 1 }
 0x108   : > { %v773_v12 = vadd.f32 %v772_v29, %v771_v21  ;;  %v779_v24 = vadd.f32 %v778_v20, %v777_v19  ;;  %v808_v34 = vrot.slane %v807_v40, 1  ;;  %v814_v61 = vrot.slane %v813_v3, 1 }
 0x109   : > { %v6892_v2 = vadd.f32 %v784_v63, %v783_v23  ;;  %v6894_v11 = vadd.f32 %v790_v15, %v789_v53  ;;  %v820_v41 = vrot.slane %v819_v55, 1  ;;  %v826_v28 = vrot.slane %v825_v25, 1  ;;  %v7762_v23 = vld [vmem:[#allocation23_spill] sm:$0xff]  ;;  %v7763_v63 = vld [vmem:[#allocation24_spill] sm:$0xff] }
 0x10a   : > { %v797_v46 = vadd.f32 %v796_v58, %v795_v57  ;;  %v803_v32 = vadd.f32 %v802_v26, %v801_v33  ;;  %v809_v4 = vadd.f32 %v808_v34, %v807_v40  ;;  %v815_v18 = vadd.f32 %v814_v61, %v813_v3  ;;  %v6964_v40 = vld [vmem:[%s6482_s7 + $0x8] sm:$0xff]  ;;  %v7764_v58 = vld [vmem:[#allocation25_spill] sm:$0xff] }
 0x10b   : > { %v877_v47 = vsel %vm876_vm0, %v6700_v60, %v6656_v37  ;;  %v890_v21 = vsel %vm876_vm0, %v6702_v44, %v6658_v0  ;;  %v897_v19 = vsel %vm876_vm0, %v6704_v45, %v6660_v50  ;;  %v904_v29 = vsel %vm876_vm0, %v6706_v62, %v6662_v48 }
 0x10c   : > { %v879_v20 = vsel %vm878_vm1, %v6712_v14, %v877_v47  ;;  %v891_v61 = vsel %vm878_vm1, %v6714_v56, %v890_v21  ;;  %v898_v37 = vsel %vm878_vm1, %v6748_v27, %v897_v19  ;;  %v905_v0 = vsel %vm878_vm1, %v6750_v8, %v904_v29  ;;  %v462_v27 = vld [vmem:[#allocation2] sm:$0xff]  ;;  %v463_v8 = vld [vmem:[#allocation2 + $0x8] sm:$0xff]  ;;  %v7768_v29 = vld [vmem:[#allocation29_spill] sm:$0xff] }
 0x10d   : > { %v881_v60 = vsel %vm880_vm2, %v6756_v9, %v879_v20  ;;  %v892_v50 = vsel %vm880_vm2, %v6758_v30, %v891_v61  ;;  %v899_v48 = vsel %vm880_vm2, %v6760_v10, %v898_v37  ;;  %v906_v44 = vsel %vm880_vm2, %v6762_v39, %v905_v0  ;;  %v464_v39 = vld [vmem:[#allocation2 + $0x10] sm:$0xff]  ;;  %v467_v47 = vld [vmem:[#allocation2 + $0x28] sm:$0xff]  ;;  %v6987_v61 = vld [vmem:[%s6482_s7 + $0x20] sm:$0xff] }
 0x10e   : > { %v883_v45 = vsel %vm882_vm3, %v6800_v13, %v881_v60  ;;  %v893_v62 = vsel %vm882_vm3, %v6802_v17, %v892_v50  ;;  %v900_v14 = vsel %vm882_vm3, %v6804_v31, %v899_v48  ;;  %v907_v56 = vsel %vm882_vm3, %v6806_v1, %v906_v44  ;;  %v465_v17 = vld [vmem:[#allocation2 + $0x18] sm:$0xff]  ;;  %v7767_v21 = vld [vmem:[#allocation28_spill] sm:$0xff]  ;;  %v6999_v44 = vld [vmem:[%s6482_s7 + $0x30] sm:$0xff] }
 0x10f   : > { %v885_v9 = vsel %vm884_vm4, %v6844_v6, %v883_v45  ;;  %v894_v30 = vsel %vm884_vm4, %v6846_v59, %v893_v62  ;;  %v901_v13 = vsel %vm884_vm4, %v6848_v7, %v900_v14  ;;  %v908_v10 = vsel %vm884_vm4, %v6850_v36, %v907_v56  ;;  %v6996_v48 = vld [vmem:[%s6482_s7 + $0x28] sm:$0xff] }
 0x110   : > { %v887_v31 = vsel %vm886_vm5, %v6856_v54, %v885_v9  ;;  %v895_v1 = vsel %vm886_vm5, %v6858_v5, %v894_v30  ;;  %v902_v6 = vsel %vm886_vm5, %v773_v12, %v901_v13  ;;  %v909_v59 = vsel %vm886_vm5, %v779_v24, %v908_v10  ;;  %v6957_v24 = vld [vmem:[%s6482_s7] sm:$0xff]  ;;  %v6971_v12 = vld [vmem:[%s6482_s7 + $0x10] sm:$0xff]  ;;  %v7014_v13 = vld [vmem:[%s6482_s7 + $0x48] sm:$0xff] }
 0x111   : > { %v889_v34 = vsel %vm888_vm6, %v797_v46, %v887_v31  ;;  %v896_v7 = vsel %vm888_vm6, %v803_v32, %v895_v1  ;;  %v903_v22 = vsel %vm888_vm6, %v809_v4, %v902_v6  ;;  %v910_v36 = vsel %vm888_vm6, %v815_v18, %v909_v59  ;;  %v7765_v46 = vld [vmem:[#allocation26_spill] sm:$0xff]  ;;  %v7766_v4 = vld [vmem:[#allocation27_spill] sm:$0xff]  ;;  %v7017_v10 = vld [vmem:[%s6482_s7 + $0x50] sm:$0xff] }
 0x112   : > { %v911_v54 = vsel %vm876_vm0, %v7758_v38, %v6664_v49  ;;  %v918_v5 = vsel %vm876_vm0, %v7760_v43, %v7759_v35  ;;  %v931_v52 = vadd.f32 %v889_v34, %v462_v27  ;;  %v932_v42 = vadd.f32 %v896_v7, %v463_v8  ;;  %v7006_v27 = vld [vmem:[%s6482_s7 + $0x38] sm:$0xff]  ;;  %v7025_v1 = vld [vmem:[%s6482_s7 + $0x60] sm:$0xff] }
 0x113   : > { %v912_v16 = vsel %vm878_vm1, %v7761_v51, %v911_v54  ;;  %v919_v53 = vsel %vm878_vm1, %v7762_v23, %v918_v5  ;;  %v933_v57 = vadd.f32 %v903_v22, %v464_v39  ;;  %v934_v33 = vadd.f32 %v910_v36, %v465_v17  ;;  %v7022_v31 = vld [vmem:[%s6482_s7 + $0x58] sm:$0xff]  ;;  %v7032_v22 = vld [vmem:[%s6482_s7 + $0x68] sm:$0xff]  ;;  %v7035_v36 = vld [vmem:[%s6482_s7 + $0x70] sm:$0xff] }
 0x114   : > { %v821_v49 = vadd.f32 %v820_v41, %v819_v55  ;;  %v827_v3 = vadd.f32 %v826_v28, %v825_v25  ;;  %v913_v15 = vsel %vm880_vm2, %v7763_v63, %v912_v16  ;;  %v920_v26 = vsel %vm880_vm2, %v7764_v58, %v919_v53  ;;  %937 = vst [vmem:[#allocation2] sm:$0xff] %v931_v52  ;;  %v6978_v55 = vld [vmem:[%s6482_s7 + $0x18] sm:$0xff]  ;;  %v466_v28 = vld [vmem:[#allocation2 + $0x20] sm:$0xff]  ;;  %v7052_v53 = vld [vmem:[%s6482_s7 + $0x88] sm:$0xff] }
 0x115   : > { %938 = vst [vmem:[#allocation2 + $0x8] sm:$0xff] %v932_v42  ;;  %v914_v32 = vsel %vm882_vm3, %v7765_v46, %v913_v15  ;;  %v921_v18 = vsel %vm882_vm3, %v7766_v4, %v920_v26  ;;  %939 = vst [vmem:[#allocation2 + $0x10] sm:$0xff] %v933_v57  ;;  %v973_v25 = vunpack.c.l.bf16 %v6957_v24  ;;  %v974_v41 = vunpack.c.h.bf16 %v6957_v24  ;;  %v7042_v5 = vld [vmem:[%s6482_s7 + $0x78] sm:$0xff]  ;;  %v7045_v52 = vld [vmem:[%s6482_s7 + $0x80] sm:$0xff] }
 0x116   : > { %940 = vst [vmem:[#allocation2 + $0x18] sm:$0xff] %v934_v33  ;;  %v915_v19 = vsel %vm884_vm4, %v7767_v21, %v914_v32  ;;  %v922_v20 = vsel %vm884_vm4, %v7768_v29, %v921_v18  ;;  %v975_v37 = vunpack.c.l.bf16 %v6964_v40  ;;  %v976_v0 = vunpack.c.h.bf16 %v6964_v40  ;;  %v7055_v57 = vld [vmem:[%s6482_s7 + $0x90] sm:$0xff]  ;;  %v7062_v15 = vld [vmem:[%s6482_s7 + $0x98] sm:$0xff]  ;;  %v7065_v58 = vld [vmem:[%s6482_s7 + $0xa0] sm:$0xff] }
 0x117   : > { %v916_v60 = vsel %vm886_vm5, %v6892_v2, %v915_v19  ;;  %v923_v50 = vsel %vm886_vm5, %v6894_v11, %v922_v20  ;;  %v977_v45 = vunpack.c.l.bf16 %v6971_v12  ;;  %v978_v62 = vunpack.c.h.bf16 %v6971_v12  ;;  %v7009_v2 = vld [vmem:[%s6482_s7 + $0x40] sm:$0xff]  ;;  %v7072_v18 = vld [vmem:[%s6482_s7 + $0xa8] sm:$0xff] }
 0x118   : > { %v917_v14 = vsel %vm888_vm6, %v821_v49, %v916_v60  ;;  %v924_v56 = vsel %vm888_vm6, %v827_v3, %v923_v50  ;;  %v979_v11 = vunpack.c.l.bf16 %v6978_v55  ;;  %v980_v8 = vunpack.c.h.bf16 %v6978_v55 }
 0x119   : > { %v935_v9 = vadd.f32 %v917_v14, %v466_v28  ;;  %v936_v30 = vadd.f32 %v924_v56, %v467_v47  ;;  %v981_v39 = vunpack.c.l.bf16 %v6987_v61  ;;  %v982_v17 = vunpack.c.h.bf16 %v6987_v61  ;;  %v7075_v28 = vld [vmem:[%s6482_s7 + $0xb0] sm:$0xff] }
 0x11a   : > { %v983_v6 = vunpack.c.l.bf16 %v6996_v48  ;;  %v984_v59 = vunpack.c.h.bf16 %v6996_v48  ;;  %v985_v34 = vunpack.c.l.bf16 %v6999_v44  ;;  %v986_v7 = vunpack.c.h.bf16 %v6999_v44 }
 0x11b   : > { %941 = vst [vmem:[#allocation2 + $0x20] sm:$0xff] %v935_v9  ;;  %942 = vst [vmem:[#allocation2 + $0x28] sm:$0xff] %v936_v30  ;;  %v987_v38 = vunpack.c.l.bf16 %v7006_v27  ;;  %v988_v54 = vunpack.c.h.bf16 %v7006_v27  ;;  %v989_v35 = vunpack.c.l.bf16 %v7009_v2  ;;  %v990_v43 = vunpack.c.h.bf16 %v7009_v2 }
 0x11c   : > { %v991_v42 = vunpack.c.l.bf16 %v7014_v13  ;;  %v1021_v50 = vrot.slane %v973_v25, 4  ;;  %v1027_v56 = vrot.slane %v974_v41, 4  ;;  %v1033_v9 = vrot.slane %v975_v37, 4 }
 0x11d   : > { %v1039_v21 = vrot.slane %v976_v0, 4  ;;  %v1045_v19 = vrot.slane %v977_v45, 4  ;;  %v1051_v20 = vrot.slane %v978_v62, 4  ;;  %v1057_v60 = vrot.slane %v979_v11, 4 }
 0x11e   : > { %v1063_v29 = vrot.slane %v980_v8, 4  ;;  %v1022_v30 = vadd.f32 %v1021_v50, %v973_v25  ;;  %v1028_v14 = vadd.f32 %v1027_v56, %v974_v41  ;;  %v1034_v47 = vadd.f32 %v1033_v9, %v975_v37 }
 0x11f   : > { %v1040_v4 = vadd.f32 %v1039_v21, %v976_v0  ;;  %v1046_v32 = vadd.f32 %v1045_v19, %v977_v45  ;;  %v1052_v46 = vadd.f32 %v1051_v20, %v978_v62  ;;  %v1058_v26 = vadd.f32 %v1057_v60, %v979_v11  ;;  %v7126_v21 = vld [vmem:[%s6482_s7 + $0xb8] sm:$0xff] }
 0x120   : > { %v1064_v24 = vadd.f32 %v1063_v29, %v980_v8  ;;  %v1023_v25 = vrot.slane %v1022_v30, 2  ;;  %v1029_v41 = vrot.slane %v1028_v14, 2  ;;  %v1035_v50 = vrot.slane %v1034_v47, 2 }
 0x121   : > { %v1041_v56 = vrot.slane %v1040_v4, 2  ;;  %v1047_v37 = vrot.slane %v1046_v32, 2  ;;  %v1053_v9 = vrot.slane %v1052_v46, 2  ;;  %v1059_v40 = vrot.slane %v1058_v26, 2 }
 0x122   : > { %v1065_v0 = vrot.slane %v1064_v24, 2  ;;  %v1024_v45 = vadd.f32 %v1023_v25, %v1022_v30  ;;  %v1030_v19 = vadd.f32 %v1029_v41, %v1028_v14  ;;  %v1036_v12 = vadd.f32 %v1035_v50, %v1034_v47 }
 0x123   : > { %v1042_v62 = vadd.f32 %v1041_v56, %v1040_v4  ;;  %v1048_v20 = vadd.f32 %v1047_v37, %v1046_v32  ;;  %v1054_v63 = vadd.f32 %v1053_v9, %v1052_v46  ;;  %v1060_v11 = vadd.f32 %v1059_v40, %v1058_v26 }
 0x124   : > { %v1066_v60 = vadd.f32 %v1065_v0, %v1064_v24  ;;  %v1025_v55 = vrot.slane %v1024_v45, 1  ;;  %v1031_v8 = vrot.slane %v1030_v19, 1  ;;  %v1037_v29 = vrot.slane %v1036_v12, 1 }
 0x125   : > { %v1043_v3 = vrot.slane %v1042_v62, 1  ;;  %v1049_v23 = vrot.slane %v1048_v20, 1  ;;  %v1055_v16 = vrot.slane %v1054_v63, 1  ;;  %v1061_v47 = vrot.slane %v1060_v11, 1 }
 0x126   : > { %v7130_v51 = vadd.f32 %v1025_v55, %v1024_v45  ;;  %v7132_v30 = vadd.f32 %v1031_v8, %v1030_v19  ;;  %v1067_v4 = vrot.slane %v1066_v60, 1  ;;  %v7134_v32 = vadd.f32 %v1037_v29, %v1036_v12 }
 0x127   : > { %v7136_v26 = vadd.f32 %v1043_v3, %v1042_v62  ;;  %v7138_v46 = vadd.f32 %v1049_v23, %v1048_v20  ;;  %v7140_v14 = vadd.f32 %v1055_v16, %v1054_v63  ;;  %v1069_v24 = vrot.slane %v981_v39, 4 }
 0x128   : > { %v1075_v25 = vrot.slane %v982_v17, 4  ;;  %v1081_v41 = vrot.slane %v983_v6, 4  ;;  %v1087_v50 = vrot.slane %v984_v59, 4  ;;  %v1093_v3 = vrot.slane %v985_v34, 4 }
 0x129   : > { %7769 = vst [vmem:[#allocation20_spill] sm:$0xff] %v7138_v46  ;;  %7770 = vst [vmem:[#allocation19_spill] sm:$0xff] %v7140_v14  ;;  %v1099_v23 = vrot.slane %v986_v7, 4  ;;  %v1105_v16 = vrot.slane %v987_v38, 4  ;;  %v1111_v63 = vrot.slane %v988_v54, 4  ;;  %v1070_v56 = vadd.f32 %v1069_v24, %v981_v39 }
 0x12a   : > { %v1076_v37 = vadd.f32 %v1075_v25, %v982_v17  ;;  %v1082_v9 = vadd.f32 %v1081_v41, %v983_v6  ;;  %v1088_v40 = vadd.f32 %v1087_v50, %v984_v59  ;;  %v1094_v0 = vadd.f32 %v1093_v3, %v985_v34 }
 0x12b   : > { %v1100_v45 = vadd.f32 %v1099_v23, %v986_v7  ;;  %v1106_v19 = vadd.f32 %v1105_v16, %v987_v38  ;;  %v1112_v39 = vadd.f32 %v1111_v63, %v988_v54  ;;  %v1071_v61 = vrot.slane %v1070_v56, 2 }
 0x12c   : > { %v1077_v17 = vrot.slane %v1076_v37, 2  ;;  %v1083_v12 = vrot.slane %v1082_v9, 2  ;;  %v1089_v62 = vrot.slane %v1088_v40, 2  ;;  %v1095_v6 = vrot.slane %v1094_v0, 2 }
 0x12d   : > { %v1101_v20 = vrot.slane %v1100_v45, 2  ;;  %v1107_v48 = vrot.slane %v1106_v19, 2  ;;  %v1113_v59 = vrot.slane %v1112_v39, 2  ;;  %v1072_v55 = vadd.f32 %v1071_v61, %v1070_v56 }
 0x12e   : > { %v1078_v8 = vadd.f32 %v1077_v17, %v1076_v37  ;;  %v1084_v34 = vadd.f32 %v1083_v12, %v1082_v9  ;;  %v1090_v29 = vadd.f32 %v1089_v62, %v1088_v40  ;;  %v1096_v44 = vadd.f32 %v1095_v6, %v1094_v0 }
 0x12f   : > { %v1102_v7 = vadd.f32 %v1101_v20, %v1100_v45  ;;  %v1108_v24 = vadd.f32 %v1107_v48, %v1106_v19  ;;  %v1114_v25 = vadd.f32 %v1113_v59, %v1112_v39  ;;  %v1073_v38 = vrot.slane %v1072_v55, 1 }
 0x130   : > { %v1079_v41 = vrot.slane %v1078_v8, 1  ;;  %v1085_v27 = vrot.slane %v1084_v34, 1  ;;  %v1091_v54 = vrot.slane %v1090_v29, 1  ;;  %v7174_v50 = vadd.f32 %v1061_v47, %v1060_v11 }
 0x131   : > { %v7176_v3 = vadd.f32 %v1067_v4, %v1066_v60  ;;  %v1097_v23 = vrot.slane %v1096_v44, 1  ;;  %v1103_v16 = vrot.slane %v1102_v7, 1  ;;  %v7178_v63 = vadd.f32 %v1073_v38, %v1072_v55 }
 0x132   : > { %v7180_v56 = vadd.f32 %v1079_v41, %v1078_v8  ;;  %v1109_v37 = vrot.slane %v1108_v24, 1  ;;  %v1115_v9 = vrot.slane %v1114_v25, 1  ;;  %v7182_v40 = vadd.f32 %v1085_v27, %v1084_v34 }
 0x133   : > { %v7184_v0 = vadd.f32 %v1091_v54, %v1090_v29  ;;  %v7186_v45 = vadd.f32 %v1097_v23, %v1096_v44  ;;  %v7188_v19 = vadd.f32 %v1103_v16, %v1102_v7  ;;  %v1117_v11 = vrot.slane %v989_v35, 4 }
 0x134   : > { %7771 = vst [vmem:[#allocation21_spill] sm:$0xff] %v7182_v40  ;;  %v1123_v60 = vrot.slane %v990_v43, 4  ;;  %v1129_v47 = vrot.slane %v991_v42, 4  ;;  %v7773_v4 = vunpack.c.h.bf16 %v7014_v13  ;;  %v7774_v61 = vunpack.c.l.bf16 %v7017_v10 }
 0x135   : > { %7772 = vst [vmem:[#allocation22_spill] sm:$0xff] %v7184_v0  ;;  %v7775_v12 = vunpack.c.h.bf16 %v7017_v10  ;;  %v7776_v6 = vunpack.c.l.bf16 %v7022_v31  ;;  %v7777_v48 = vunpack.c.h.bf16 %v7022_v31  ;;  %v1118_v55 = vadd.f32 %v1117_v11, %v989_v35 }
 0x136   : > { %v1135_v39 = vrot.slane %v7773_v4, 4  ;;  %v1141_v17 = vrot.slane %v7774_v61, 4  ;;  %v1124_v8 = vadd.f32 %v1123_v60, %v990_v43  ;;  %v1130_v34 = vadd.f32 %v1129_v47, %v991_v42 }
 0x137   : > { %v1147_v62 = vrot.slane %v7775_v12, 4  ;;  %v1153_v20 = vrot.slane %v7776_v6, 4  ;;  %v1159_v59 = vrot.slane %v7777_v48, 4  ;;  %v7778_v29 = vmov %v7773_v4 }
 0x138   : > { %v1136_v44 = vadd.f32 %v1135_v39, %v7778_v29  ;;  %v7779_v7 = vmov %v7774_v61  ;;  %v7780_v41 = vmov %v7775_v12  ;;  %v7781_v54 = vmov %v7776_v6 }
 0x139   : > { %v1142_v38 = vadd.f32 %v1141_v17, %v7779_v7  ;;  %v1148_v27 = vadd.f32 %v1147_v62, %v7780_v41  ;;  %v1154_v23 = vadd.f32 %v1153_v20, %v7781_v54  ;;  %v7782_v35 = vmov %v7777_v48 }
 0x13a   : > { %v1160_v16 = vadd.f32 %v1159_v59, %v7782_v35  ;;  %v1119_v2 = vrot.slane %v1118_v55, 2  ;;  %v1125_v43 = vrot.slane %v1124_v8, 2  ;;  %v1131_v11 = vrot.slane %v1130_v34, 2 }
 0x13b   : > { %v1137_v60 = vrot.slane %v1136_v44, 2  ;;  %v1143_v42 = vrot.slane %v1142_v38, 2  ;;  %v1149_v47 = vrot.slane %v1148_v27, 2  ;;  %v1155_v13 = vrot.slane %v1154_v23, 2 }
 0x13c   : > { %v1161_v4 = vrot.slane %v1160_v16, 2  ;;  %v1120_v39 = vadd.f32 %v1119_v2, %v1118_v55  ;;  %v1126_v61 = vadd.f32 %v1125_v43, %v1124_v8  ;;  %v1132_v17 = vadd.f32 %v1131_v11, %v1130_v34 }
 0x13d   : > { %v1138_v12 = vadd.f32 %v1137_v60, %v1136_v44  ;;  %v1144_v10 = vadd.f32 %v1143_v42, %v1142_v38  ;;  %v1150_v62 = vadd.f32 %v1149_v47, %v1148_v27  ;;  %v1156_v6 = vadd.f32 %v1155_v13, %v1154_v23 }
 0x13e   : > { %v1162_v48 = vadd.f32 %v1161_v4, %v1160_v16  ;;  %v1121_v20 = vrot.slane %v1120_v39, 1  ;;  %v1127_v29 = vrot.slane %v1126_v61, 1  ;;  %v1133_v31 = vrot.slane %v1132_v17, 1 }
 0x13f   : > { %v1139_v59 = vrot.slane %v1138_v12, 1  ;;  %v7222_v7 = vadd.f32 %v1109_v37, %v1108_v24  ;;  %v7224_v41 = vadd.f32 %v1115_v9, %v1114_v25  ;;  %v1145_v54 = vrot.slane %v1144_v10, 1 }
 0x140   : > { %v1151_v35 = vrot.slane %v1150_v62, 1  ;;  %v7226_v33 = vadd.f32 %v1121_v20, %v1120_v39  ;;  %v7228_v55 = vadd.f32 %v1127_v29, %v1126_v61  ;;  %v1157_v8 = vrot.slane %v1156_v6, 1 }
 0x141   : > { %v1163_v34 = vrot.slane %v1162_v48, 1  ;;  %v7230_v44 = vadd.f32 %v1133_v31, %v1132_v17  ;;  %v7232_v38 = vadd.f32 %v1139_v59, %v1138_v12  ;;  %v7234_v27 = vadd.f32 %v1145_v54, %v1144_v10 }
 0x142   : > { %7783 = vst [vmem:[#allocation23_spill] sm:$0xff] %v7226_v33  ;;  %7784 = vst [vmem:[#allocation24_spill] sm:$0xff] %v7228_v55  ;;  %v7236_v23 = vadd.f32 %v1151_v35, %v1150_v62  ;;  %v7785_v24 = vunpack.c.l.bf16 %v7025_v1  ;;  %v7786_v37 = vunpack.c.h.bf16 %v7025_v1  ;;  %v7787_v16 = vunpack.c.l.bf16 %v7032_v22 }
 0x143   : > { %v7788_v43 = vunpack.c.h.bf16 %v7032_v22  ;;  %v7789_v60 = vunpack.c.l.bf16 %v7035_v36  ;;  %v7790_v47 = vunpack.c.h.bf16 %v7035_v36  ;;  %v7791_v4 = vunpack.c.l.bf16 %v7042_v5 }
 0x144   : > { %v1165_v25 = vrot.slane %v7785_v24, 4  ;;  %v1171_v9 = vrot.slane %v7786_v37, 4  ;;  %v1177_v2 = vrot.slane %v7787_v16, 4  ;;  %v7792_v61 = vunpack.c.h.bf16 %v7042_v5 }
 0x145   : > { %v1183_v11 = vrot.slane %v7788_v43, 4  ;;  %v1189_v42 = vrot.slane %v7789_v60, 4  ;;  %v1195_v13 = vrot.slane %v7790_v47, 4  ;;  %v1201_v39 = vrot.slane %v7791_v4, 4 }
 0x146   : > { %v1207_v17 = vrot.slane %v7792_v61, 4  ;;  %v7793_v12 = vmov %v7785_v24  ;;  %v7794_v62 = vmov %v7786_v37  ;;  %v7795_v29 = vmov %v7787_v16 }
 0x147   : > { %v1166_v10 = vadd.f32 %v1165_v25, %v7793_v12  ;;  %v1172_v20 = vadd.f32 %v1171_v9, %v7794_v62  ;;  %v1178_v31 = vadd.f32 %v1177_v2, %v7795_v29  ;;  %v7796_v59 = vmov %v7788_v43 }
 0x148   : > { %v1184_v54 = vadd.f32 %v1183_v11, %v7796_v59  ;;  %v7797_v35 = vmov %v7789_v60  ;;  %v7798_v37 = vmov %v7790_v47  ;;  %v7799_v43 = vmov %v7791_v4 }
 0x149   : > { %v1190_v24 = vadd.f32 %v1189_v42, %v7797_v35  ;;  %v1196_v16 = vadd.f32 %v1195_v13, %v7798_v37  ;;  %v1202_v60 = vadd.f32 %v1201_v39, %v7799_v43  ;;  %v7800_v25 = vmov %v7792_v61 }
 0x14a   : > { %v1208_v47 = vadd.f32 %v1207_v17, %v7800_v25  ;;  %v1167_v1 = vrot.slane %v1166_v10, 2  ;;  %v1173_v9 = vrot.slane %v1172_v20, 2  ;;  %v1179_v4 = vrot.slane %v1178_v31, 2 }
 0x14b   : > { %v1185_v61 = vrot.slane %v1184_v54, 2  ;;  %v1191_v2 = vrot.slane %v1190_v24, 2  ;;  %v1197_v12 = vrot.slane %v1196_v16, 2  ;;  %v1203_v22 = vrot.slane %v1202_v60, 2 }
 0x14c   : > { %v1209_v11 = vrot.slane %v1208_v47, 2  ;;  %v1168_v62 = vadd.f32 %v1167_v1, %v1166_v10  ;;  %v1174_v29 = vadd.f32 %v1173_v9, %v1172_v20  ;;  %v1180_v42 = vadd.f32 %v1179_v4, %v1178_v31 }
 0x14d   : > { %v1186_v59 = vadd.f32 %v1185_v61, %v1184_v54  ;;  %v1192_v36 = vadd.f32 %v1191_v2, %v1190_v24  ;;  %v1198_v13 = vadd.f32 %v1197_v12, %v1196_v16  ;;  %v1204_v35 = vadd.f32 %v1203_v22, %v1202_v60 }
 0x14e   : > { %v1210_v37 = vadd.f32 %v1209_v11, %v1208_v47  ;;  %v1169_v39 = vrot.slane %v1168_v62, 1  ;;  %v1175_v43 = vrot.slane %v1174_v29, 1  ;;  %v1181_v5 = vrot.slane %v1180_v42, 1 }
 0x14f   : > { %v1187_v17 = vrot.slane %v1186_v59, 1  ;;  %v7270_v25 = vadd.f32 %v1157_v8, %v1156_v6  ;;  %v7272_v49 = vadd.f32 %v1163_v34, %v1162_v48  ;;  %v1193_v55 = vrot.slane %v1192_v36, 1 }
 0x150   : > { %v1199_v33 = vrot.slane %v1198_v13, 1  ;;  %v7274_v0 = vadd.f32 %v1169_v39, %v1168_v62  ;;  %v7276_v10 = vadd.f32 %v1175_v43, %v1174_v29  ;;  %v1205_v20 = vrot.slane %v1204_v35, 1 }
 0x151   : > { %7801 = vst [vmem:[#allocation25_spill] sm:$0xff] %v7270_v25  ;;  %7802 = vst [vmem:[#allocation26_spill] sm:$0xff] %v7272_v49  ;;  %v1211_v31 = vrot.slane %v1210_v37, 1  ;;  %v7278_v54 = vadd.f32 %v1181_v5, %v1180_v42  ;;  %v7280_v24 = vadd.f32 %v1187_v17, %v1186_v59  ;;  %v7282_v16 = vadd.f32 %v1193_v55, %v1192_v36 }
 0x152   : > { %v7284_v60 = vadd.f32 %v1199_v33, %v1198_v13  ;;  %v7805_v6 = vunpack.c.l.bf16 %v7045_v52  ;;  %v7806_v8 = vunpack.c.h.bf16 %v7045_v52  ;;  %v7807_v47 = vunpack.c.l.bf16 %v7052_v53 }
 0x153   : > { %7803 = vst [vmem:[#allocation27_spill] sm:$0xff] %v7282_v16  ;;  %v7808_v9 = vunpack.c.h.bf16 %v7052_v53  ;;  %v7809_v61 = vunpack.c.l.bf16 %v7055_v57  ;;  %v7810_v55 = vunpack.c.h.bf16 %v7055_v57  ;;  %v7811_v33 = vunpack.c.l.bf16 %v7062_v15 }
 0x154   : > { %7804 = vst [vmem:[#allocation28_spill] sm:$0xff] %v7284_v60  ;;  %v1213_v48 = vrot.slane %v7805_v6, 4  ;;  %v1219_v34 = vrot.slane %v7806_v8, 4  ;;  %v1225_v1 = vrot.slane %v7807_v47, 4  ;;  %v7812_v11 = vunpack.c.h.bf16 %v7062_v15 }
 0x155   : > { %v1231_v4 = vrot.slane %v7808_v9, 4  ;;  %v1237_v2 = vrot.slane %v7809_v61, 4  ;;  %v1243_v12 = vrot.slane %v7810_v55, 4  ;;  %v1249_v22 = vrot.slane %v7811_v33, 4 }
 0x156   : > { %v1255_v62 = vrot.slane %v7812_v11, 4  ;;  %v7813_v29 = vmov %v7805_v6  ;;  %v7814_v59 = vmov %v7806_v8  ;;  %v7815_v13 = vmov %v7807_v47 }
 0x157   : > { %v1214_v42 = vadd.f32 %v1213_v48, %v7813_v29  ;;  %v1220_v36 = vadd.f32 %v1219_v34, %v7814_v59  ;;  %v1226_v39 = vadd.f32 %v1225_v1, %v7815_v13  ;;  %v7816_v43 = vmov %v7808_v9 }
 0x158   : > { %v1232_v5 = vadd.f32 %v1231_v4, %v7816_v43  ;;  %v7817_v17 = vmov %v7809_v61  ;;  %v7818_v8 = vmov %v7810_v55  ;;  %v7819_v9 = vmov %v7811_v33 }
 0x159   : > { %v1238_v6 = vadd.f32 %v1237_v2, %v7817_v17  ;;  %v1244_v47 = vadd.f32 %v1243_v12, %v7818_v8  ;;  %v1250_v61 = vadd.f32 %v1249_v22, %v7819_v9  ;;  %v7820_v48 = vmov %v7812_v11 }
 0x15a   : > { %v1256_v55 = vadd.f32 %v1255_v62, %v7820_v48  ;;  %v1215_v52 = vrot.slane %v1214_v42, 2  ;;  %v1221_v34 = vrot.slane %v1220_v36, 2  ;;  %v1227_v33 = vrot.slane %v1226_v39, 2 }
 0x15b   : > { %v1233_v11 = vrot.slane %v1232_v5, 2  ;;  %v1239_v1 = vrot.slane %v1238_v6, 2  ;;  %v1245_v29 = vrot.slane %v1244_v47, 2  ;;  %v1251_v53 = vrot.slane %v1250_v61, 2 }
 0x15c   : > { %v1257_v4 = vrot.slane %v1256_v55, 2  ;;  %v1216_v59 = vadd.f32 %v1215_v52, %v1214_v42  ;;  %v1222_v13 = vadd.f32 %v1221_v34, %v1220_v36  ;;  %v1228_v2 = vadd.f32 %v1227_v33, %v1226_v39 }
 0x15d   : > { %v1234_v43 = vadd.f32 %v1233_v11, %v1232_v5  ;;  %v1240_v57 = vadd.f32 %v1239_v1, %v1238_v6  ;;  %v1246_v12 = vadd.f32 %v1245_v29, %v1244_v47  ;;  %v1252_v17 = vadd.f32 %v1251_v53, %v1250_v61 }
 0x15e   : > { %v1258_v8 = vadd.f32 %v1257_v4, %v1256_v55  ;;  %v1217_v22 = vrot.slane %v1216_v59, 1  ;;  %v1223_v9 = vrot.slane %v1222_v13, 1  ;;  %v1229_v15 = vrot.slane %v1228_v2, 1 }
 0x15f   : > { %v1235_v62 = vrot.slane %v1234_v43, 1  ;;  %v7318_v48 = vadd.f32 %v1205_v20, %v1204_v35  ;;  %v7320_v60 = vadd.f32 %v1211_v31, %v1210_v37  ;;  %v1241_v16 = vrot.slane %v1240_v57, 1 }
 0x160   : > { %v1247_v49 = vrot.slane %v1246_v12, 1  ;;  %v7322_v25 = vadd.f32 %v1217_v22, %v1216_v59  ;;  %v7324_v42 = vadd.f32 %v1223_v9, %v1222_v13  ;;  %v1253_v36 = vrot.slane %v1252_v17, 1 }
 0x161   : > { %v1259_v39 = vrot.slane %v1258_v8, 1  ;;  %v7326_v5 = vadd.f32 %v1229_v15, %v1228_v2  ;;  %v7328_v6 = vadd.f32 %v1235_v62, %v1234_v43  ;;  %v7330_v47 = vadd.f32 %v1241_v16, %v1240_v57 }
 0x162   : > { %v7332_v61 = vadd.f32 %v1247_v49, %v1246_v12  ;;  %v7823_v35 = vunpack.c.l.bf16 %v7065_v58  ;;  %v7824_v20 = vunpack.c.h.bf16 %v7065_v58  ;;  %v7825_v55 = vunpack.c.l.bf16 %v7072_v18 }
 0x163   : > { %7821 = vst [vmem:[#allocation29_spill] sm:$0xff] %v7326_v5  ;;  %7822 = vst [vmem:[#allocation30_spill] sm:$0xff] %v7328_v6  ;;  %v7826_v34 = vunpack.c.h.bf16 %v7072_v18  ;;  %v7827_v11 = vunpack.c.l.bf16 %v7075_v28  ;;  %v7828_v16 = vunpack.c.h.bf16 %v7075_v28  ;;  %v7829_v49 = vunpack.c.l.bf16 %v7126_v21 }
 0x164   : > { %v1261_v37 = vrot.slane %v7823_v35, 4  ;;  %v1267_v31 = vrot.slane %v7824_v20, 4  ;;  %v1273_v52 = vrot.slane %v7825_v55, 4  ;;  %v7830_v4 = vunpack.c.h.bf16 %v7126_v21 }
 0x165   : > { %v1279_v33 = vrot.slane %v7826_v34, 4  ;;  %v1285_v1 = vrot.slane %v7827_v11, 4  ;;  %v1291_v29 = vrot.slane %v7828_v16, 4  ;;  %v1297_v53 = vrot.slane %v7829_v49, 4 }
 0x166   : > { %v1303_v59 = vrot.slane %v7830_v4, 4  ;;  %v7831_v13 = vmov %v7823_v35  ;;  %v7832_v43 = vmov %v7824_v20  ;;  %v7833_v12 = vmov %v7825_v55 }
 0x167   : > { %v1262_v2 = vadd.f32 %v1261_v37, %v7831_v13  ;;  %v1268_v57 = vadd.f32 %v1267_v31, %v7832_v43  ;;  %v1274_v22 = vadd.f32 %v1273_v52, %v7833_v12  ;;  %v7834_v9 = vmov %v7826_v34 }
 0x168   : > { %v1280_v15 = vadd.f32 %v1279_v33, %v7834_v9  ;;  %v7835_v62 = vmov %v7827_v11  ;;  %v7836_v20 = vmov %v7828_v16  ;;  %v7837_v34 = vmov %v7829_v49 }
 0x169   : > { %v1286_v35 = vadd.f32 %v1285_v1, %v7835_v62  ;;  %v1292_v55 = vadd.f32 %v1291_v29, %v7836_v20  ;;  %v1298_v11 = vadd.f32 %v1297_v53, %v7837_v34  ;;  %v7838_v37 = vmov %v7830_v4 }
 0x16a   : > { %v1304_v16 = vadd.f32 %v1303_v59, %v7838_v37  ;;  %v1263_v58 = vrot.slane %v1262_v2, 2  ;;  %v1269_v31 = vrot.slane %v1268_v57, 2  ;;  %v1275_v49 = vrot.slane %v1274_v22, 2 }
 0x16b   : > { %v1281_v4 = vrot.slane %v1280_v15, 2  ;;  %v1287_v52 = vrot.slane %v1286_v35, 2  ;;  %v1293_v13 = vrot.slane %v1292_v55, 2  ;;  %v1299_v18 = vrot.slane %v1298_v11, 2 }
 0x16c   : > { %v1305_v33 = vrot.slane %v1304_v16, 2  ;;  %v1264_v43 = vadd.f32 %v1263_v58, %v1262_v2  ;;  %v1270_v12 = vadd.f32 %v1269_v31, %v1268_v57  ;;  %v1276_v1 = vadd.f32 %v1275_v49, %v1274_v22  ;;  %v7839_v58 = vld [vmem:[#allocation20_spill] sm:$0xff]  ;;  %v7840_v31 = vld [vmem:[#allocation21_spill] sm:$0xff] }
 0x16d   : > { %v1282_v9 = vadd.f32 %v1281_v4, %v1280_v15  ;;  %v1288_v28 = vadd.f32 %v1287_v52, %v1286_v35  ;;  %v1294_v29 = vadd.f32 %v1293_v13, %v1292_v55  ;;  %v1300_v62 = vadd.f32 %v1299_v18, %v1298_v11  ;;  %v7842_v4 = vld [vmem:[#allocation22_spill] sm:$0xff]  ;;  %v7843_v18 = vld [vmem:[#allocation23_spill] sm:$0xff] }
 0x16e   : > { %v1306_v20 = vadd.f32 %v1305_v33, %v1304_v16  ;;  %v1265_v53 = vrot.slane %v1264_v43, 1  ;;  %v1271_v34 = vrot.slane %v1270_v12, 1  ;;  %v1277_v21 = vrot.slane %v1276_v1, 1  ;;  %v7844_v33 = vld [vmem:[#allocation24_spill] sm:$0xff] }
 0x16f   : > { %v1283_v59 = vrot.slane %v1282_v9, 1  ;;  %v1254_v37 = vadd.f32 %v1253_v36, %v1252_v17  ;;  %v1260_v6 = vadd.f32 %v1259_v39, %v1258_v8  ;;  %v1289_v5 = vrot.slane %v1288_v28, 1 }
 0x170   : > { %v1295_v14 = vrot.slane %v1294_v29, 1  ;;  %v7366_v40 = vadd.f32 %v1265_v53, %v1264_v43  ;;  %v7368_v46 = vadd.f32 %v1271_v34, %v1270_v12  ;;  %v1301_v2 = vrot.slane %v1300_v62, 1  ;;  %v7846_v34 = vld [vmem:[#allocation26_spill] sm:$0xff] }
 0x171   : > { %v1307_v57 = vrot.slane %v1306_v20, 1  ;;  %v1278_v22 = vadd.f32 %v1277_v21, %v1276_v1  ;;  %v1284_v15 = vadd.f32 %v1283_v59, %v1282_v9  ;;  %v1290_v35 = vadd.f32 %v1289_v5, %v1288_v28  ;;  %v7847_v59 = vld [vmem:[#allocation27_spill] sm:$0xff] }
 0x172   : > { %v1296_v55 = vadd.f32 %v1295_v14, %v1294_v29  ;;  %v1357_v11 = vsel %vm876_vm0, %v7174_v50, %v7130_v51  ;;  %v1364_v17 = vsel %vm876_vm0, %v7176_v3, %v7132_v30  ;;  %v1371_v8 = vsel %vm876_vm0, %v7178_v63, %v7134_v32  ;;  %v7845_v29 = vld [vmem:[#allocation25_spill] sm:$0xff] }
 0x173   : > { %v1378_v36 = vsel %vm876_vm0, %v7180_v56, %v7136_v26  ;;  %v1358_v39 = vsel %vm878_vm1, %v7186_v45, %v1357_v11  ;;  %v1365_v14 = vsel %vm878_vm1, %v7188_v19, %v1364_v17  ;;  %v1372_v51 = vsel %vm878_vm1, %v7222_v7, %v1371_v8  ;;  %v943_v7 = vld [vmem:[#allocation3] sm:$0xff] }
 0x174   : > { %v1379_v30 = vsel %vm878_vm1, %v7224_v41, %v1378_v36  ;;  %v1359_v50 = vsel %vm880_vm2, %v7230_v44, %v1358_v39  ;;  %v1366_v32 = vsel %vm880_vm2, %v7232_v38, %v1365_v14  ;;  %v1373_v26 = vsel %vm880_vm2, %v7234_v27, %v1372_v51  ;;  %v944_v41 = vld [vmem:[#allocation3 + $0x8] sm:$0xff]  ;;  %v5364_v51 = vld [vmem:[#allocation10 + $0x4] ss:$16 sps:$4 sm:$0xff] (!%p4789_p4)  }
 0x175   : > { %v1380_v3 = vsel %vm880_vm2, %v7236_v23, %v1379_v30  ;;  %v1360_v63 = vsel %vm882_vm3, %v7274_v0, %v1359_v50  ;;  %v1367_v56 = vsel %vm882_vm3, %v7276_v10, %v1366_v32  ;;  %v1374_v45 = vsel %vm882_vm3, %v7278_v54, %v1373_v26  ;;  %v945_v23 = vld [vmem:[#allocation3 + $0x10] sm:$0xff]  ;;  %v946_v10 = vld [vmem:[#allocation3 + $0x18] sm:$0xff]  ;;  %2801 = vmatprep.subr.bf16.mxu0 (!%p4789_p4), %v5364_v51 }
 0x176   : > { %v1381_v19 = vsel %vm882_vm3, %v7280_v24, %v1380_v3  ;;  %v1361_v44 = vsel %vm884_vm4, %v7318_v48, %v1360_v63  ;;  %v1368_v38 = vsel %vm884_vm4, %v7320_v60, %v1367_v56  ;;  %v1375_v0 = vsel %vm884_vm4, %v7322_v25, %v1374_v45  ;;  %v5366_v30 = vld [vmem:[#allocation10 + $0x204] ss:$16 sps:$4 sm:$0xff] (!%p4789_p4)   ;;  %v5368_v50 = vld [vmem:[#allocation10] ss:$16 sps:$4 sm:$0xff] (!%p4789_p4)  }
 0x177   : > { %v1382_v27 = vsel %vm884_vm4, %v7324_v42, %v1381_v19  ;;  %v1362_v54 = vsel %vm886_vm5, %v7330_v47, %v1361_v44  ;;  %v1369_v24 = vsel %vm886_vm5, %v7332_v61, %v1368_v38  ;;  %v1376_v5 = vsel %vm886_vm5, %v1254_v37, %v1375_v0  ;;  %v7841_v47 = vld [vmem:[#allocation19_spill] sm:$0xff]  ;;  %2842 = vmatprep.subr.bf16.mxu1 (!%p4789_p4), %v5366_v30 }
 0x178   : > { %v1383_v48 = vsel %vm886_vm5, %v1260_v6, %v1382_v27  ;;  %v1363_v60 = vsel %vm888_vm6, %v1278_v22, %v1362_v54  ;;  %v1370_v16 = vsel %vm888_vm6, %v1284_v15, %v1369_v24  ;;  %v1377_v25 = vsel %vm888_vm6, %v1290_v35, %v1376_v5  ;;  %v7848_v22 = vld [vmem:[#allocation28_spill] sm:$0xff]  ;;  %v947_v35 = vld [vmem:[#allocation3 + $0x20] sm:$0xff]  ;;  %2802 = vmatpush1.bf16.msra.mxu0 (!%p4789_p4), %v5368_v50 }
 0x179   : > { %v1384_v42 = vsel %vm888_vm6, %v1296_v55, %v1383_v48  ;;  %v1385_v49 = vsel %vm876_vm0, %v7840_v31, %v7839_v58  ;;  %v1392_v61 = vsel %vm876_vm0, %v7842_v4, %v7841_v47  ;;  %v1405_v52 = vadd.f32 %v1363_v60, %v943_v7  ;;  %v948_v55 = vld [vmem:[#allocation3 + $0x28] sm:$0xff]  ;;  %v5369_v32 = vld [vmem:[#allocation10 + $0x200] ss:$16 sps:$4 sm:$0xff] (!%p4789_p4)   ;;  %v5376_v63 = vld [vmem:[#allocation10 + $0x44] ss:$16 sps:$4 sm:$0xff] (!%p4789_p4)  }
 0x17a   : > { %v1406_v13 = vadd.f32 %v1370_v16, %v944_v41  ;;  %v1386_v6 = vsel %vm878_vm1, %v7843_v18, %v1385_v49  ;;  %v1393_v43 = vsel %vm878_vm1, %v7844_v33, %v1392_v61  ;;  %v1407_v12 = vadd.f32 %v1377_v25, %v945_v23  ;;  %2843 = vmatpush1.bf16.msra.mxu1 (!%p4789_p4), %v5369_v32  ;;  %v5374_v26 = vld [vmem:[#allocation10 + $0x20] ss:$16 sps:$4 sm:$0xff] (!%p4789_p4)   ;;  %v5378_v56 = vld [vmem:[#allocation10 + $0x244] ss:$16 sps:$4 sm:$0xff] (!%p4789_p4)  }
 0x17b   : > { %v1408_v1 = vadd.f32 %v1384_v42, %v946_v10  ;;  %v1302_v9 = vadd.f32 %v1301_v2, %v1300_v62  ;;  %v1308_v28 = vadd.f32 %v1307_v57, %v1306_v20  ;;  %v1387_v53 = vsel %vm880_vm2, %v7845_v29, %v1386_v6  ;;  %1411 = vst [vmem:[#allocation3] sm:$0xff] %v1405_v52  ;;  %v7849_v62 = vld [vmem:[#allocation29_spill] sm:$0xff]  ;;  %v7850_v2 = vld [vmem:[#allocation30_spill] sm:$0xff] }
 0x17c   : > { %v1394_v21 = vsel %vm880_vm2, %v7846_v34, %v1393_v43  ;;  %1412 = vst [vmem:[#allocation3 + $0x8] sm:$0xff] %v1406_v13  ;;  %v1388_v37 = vsel %vm882_vm3, %v7847_v59, %v1387_v53  ;;  %1413 = vst [vmem:[#allocation3 + $0x10] sm:$0xff] %v1407_v12  ;;  %v5375_v3 = vld [vmem:[#allocation10 + $0x220] ss:$16 sps:$4 sm:$0xff] (!%p4789_p4)   ;;  %v5382_v7 = vld [vmem:[#allocation10 + $0x64] ss:$16 sps:$4 sm:$0xff] (!%p4789_p4)  }
 0x17d   : > { %v1395_v15 = vsel %vm882_vm3, %v7848_v22, %v1394_v21  ;;  %1414 = vst [vmem:[#allocation3 + $0x18] sm:$0xff] %v1408_v1  ;;  %v1389_v20 = vsel %vm884_vm4, %v7849_v62, %v1388_v37  ;;  %1420 = sbr.rel (%p4789_p4) target bundleno = 1376 (0x560), region = 80  ;;  %v5380_v45 = vld [vmem:[#allocation10 + $0x40] ss:$16 sps:$4 sm:$0xff] (!%p4789_p4)   ;;  %v5384_v41 = vld [vmem:[#allocation10 + $0x264] ss:$16 sps:$4 sm:$0xff] (!%p4789_p4)  }
 0x17e   : > { %v1396_v57 = vsel %vm884_vm4, %v7850_v2, %v1395_v15  ;;  %v1390_v11 = vsel %vm886_vm5, %v7366_v40, %v1389_v20  ;;  %v5370_v40 = vld [vmem:[#allocation10 + $0x24] ss:$16 sps:$4 sm:$0xff] (!%p4789_p4)   ;;  %v5381_v19 = vld [vmem:[#allocation10 + $0x240] ss:$16 sps:$4 sm:$0xff] (!%p4789_p4)   ;;  %vm4633_vm7 = vcmask (!%p4789_p4), 523264   ;;  %vm4646_vm8 = vcmask (!%p4789_p4), 7168  }
 0x17f   : > { %v1397_v17 = vsel %vm886_vm5, %v7368_v46, %v1396_v57  ;;  %v1391_v8 = vsel %vm888_vm6, %v1302_v9, %v1390_v11  ;;  %v5372_v46 = vld [vmem:[#allocation10 + $0x224] ss:$16 sps:$4 sm:$0xff] (!%p4789_p4)   ;;  %2803 = vmatprep.subr.bf16.mxu0 (!%p4789_p4), %v5370_v40  ;;  %v5386_v44 = vld [vmem:[#allocation10 + $0x60] ss:$16 sps:$4 sm:$0xff] (!%p4789_p4)  }
 0x180   : > { %v1398_v36 = vsel %vm888_vm6, %v1308_v28, %v1397_v17  ;;  %v1409_v39 = vadd.f32 %v1391_v8, %v947_v35  ;;  %2844 = vmatprep.subr.bf16.mxu1 (!%p4789_p4), %v5372_v46  ;;  %2804 = vmatpush1.bf16.msra.mxu0 (!%p4789_p4), %v5374_v26  ;;  %v5387_v38 = vld [vmem:[#allocation10 + $0x260] ss:$16 sps:$4 sm:$0xff] (!%p4789_p4)   ;;  %v5388_v0 = vld [vmem:[#allocation10 + $0x84] ss:$16 sps:$4 sm:$0xff] (!%p4789_p4)  }
 0x181   : > { %v1410_v14 = vadd.f32 %v1398_v36, %v948_v55  ;;  %2845 = vmatpush1.bf16.msra.mxu1 (!%p4789_p4), %v5375_v3  ;;  %2805 = vmatprep.subr.bf16.mxu0 (!%p4789_p4), %v5376_v63  ;;  %v5390_v27 = vld [vmem:[#allocation10 + $0x284] ss:$16 sps:$4 sm:$0xff] (!%p4789_p4)   ;;  %v5392_v23 = vld [vmem:[#allocation10 + $0x80] ss:$16 sps:$4 sm:$0xff] (!%p4789_p4)  }
 0x182   : > { %1415 = vst [vmem:[#allocation3 + $0x20] sm:$0xff] %v1409_v39  ;;  %2846 = vmatprep.subr.bf16.mxu1 (!%p4789_p4), %v5378_v56  ;;  %v5393_v10 = vld [vmem:[#allocation10 + $0x280] ss:$16 sps:$4 sm:$0xff] (!%p4789_p4)   ;;  %v5394_v54 = vld [vmem:[#allocation10 + $0xa4] ss:$16 sps:$4 sm:$0xff] (!%p4789_p4)  }
 0x183   : > { %1416 = vst [vmem:[#allocation3 + $0x28] sm:$0xff] %v1410_v14  ;;  %v5396_v24 = vld [vmem:[#allocation10 + $0x2a4] ss:$16 sps:$4 sm:$0xff] (!%p4789_p4)   ;;  %v5398_v5 = vld [vmem:[#allocation10 + $0xa0] ss:$16 sps:$4 sm:$0xff] (!%p4789_p4)   ;;  %v1440_v34 = vld [vmem:[#allocation3 + $0x8] sm:$0xff] (!%p4789_p4) }
 0x184   : > { %2806 = vmatpush1.bf16.msra.mxu0 %v5380_v45  ;;  %v5399_v48 = vld [vmem:[#allocation10 + $0x2a0] ss:$16 sps:$4 sm:$0xff]   ;;  %v5400_v60 = vld [vmem:[#allocation10 + $0xc4] ss:$16 sps:$4 sm:$0xff]   ;;  %v1446_v37 = vmul.f32 0.0625, %v1440_v34  ;;  %v1442_v22 = vld [vmem:[#allocation3 + $0x18] sm:$0xff] }
 0x185   : > { %2847 = vmatpush1.bf16.msra.mxu1 %v5381_v19  ;;  %2807 = vmatprep.subr.bf16.mxu0 %v5382_v7  ;;  %v5402_v16 = vld [vmem:[#allocation10 + $0x2c4] ss:$16 sps:$4 sm:$0xff]   ;;  %v5404_v25 = vld [vmem:[#allocation10 + $0xc0] ss:$16 sps:$4 sm:$0xff]   ;;  %v1448_v15 = vmul.f32 0.0625, %v1442_v22 }
 0x186   : > { %2848 = vmatprep.subr.bf16.mxu1 %v5384_v41  ;;  %v5405_v42 = vld [vmem:[#allocation10 + $0x2c0] ss:$16 sps:$4 sm:$0xff]   ;;  %v5406_v58 = vld [vmem:[#allocation10 + $0xe4] ss:$16 sps:$4 sm:$0xff]   ;;  %v1452_v62 = vpack.c.bf16 %v1446_v37, %v1446_v37  ;;  %v5465_v19 = vld [vmem:[#allocation10 + $0xc] ss:$16 sps:$4 sm:$0xff]  }
 0x187   : > { %v5408_v31 = vld [vmem:[#allocation10 + $0x2e4] ss:$16 sps:$4 sm:$0xff]   ;;  %v5410_v49 = vld [vmem:[#allocation10 + $0xe0] ss:$16 sps:$4 sm:$0xff]   ;;  %v7453_v20 = vpack.c.bf16 %v1448_v15, %v1448_v15  ;;  %v5505_v34 = vld [vmem:[#allocation10 + $0xe8] ss:$16 sps:$4 sm:$0xff]  }
 0x188   : > { %2808 = vmatpush1.bf16.msra.mxu0 %v5386_v44  ;;  %v5411_v47 = vld [vmem:[#allocation10 + $0x2e0] ss:$16 sps:$4 sm:$0xff]   ;;  %v5412_v4 = vld [vmem:[#allocation10 + $0x104] ss:$16 sps:$4 sm:$0xff]   ;;  %2833 = vmatprep.mubr.bf16.mxu0 %v1452_v62  ;;  %v5511_v22 = vld [vmem:[#allocation10 + $0x108] ss:$16 sps:$4 sm:$0xff]  }
 0x189   : > { %2849 = vmatpush1.bf16.msra.mxu1 %v5387_v38  ;;  %2809 = vmatprep.subr.bf16.mxu0 %v5388_v0  ;;  %v5414_v61 = vld [vmem:[#allocation10 + $0x304] ss:$16 sps:$4 sm:$0xff]   ;;  %v5416_v52 = vld [vmem:[#allocation10 + $0x100] ss:$16 sps:$4 sm:$0xff]   ;;  %v5463_v38 = vld [vmem:[#allocation10 + $0x8] ss:$16 sps:$4 sm:$0xff]  }
 0x18a   : > { %2850 = vmatprep.subr.bf16.mxu1 %v5390_v27  ;;  %v5417_v13 = vld [vmem:[#allocation10 + $0x300] ss:$16 sps:$4 sm:$0xff]   ;;  %v5418_v18 = vld [vmem:[#allocation10 + $0x124] ss:$16 sps:$4 sm:$0xff]   ;;  %2874 = vmatprep.mubr.bf16.mxu1 %v7453_v20  ;;  %v5471_v27 = vld [vmem:[#allocation10 + $0x2c] ss:$16 sps:$4 sm:$0xff]  }
 0x18b   : > { %v5420_v6 = vld [vmem:[#allocation10 + $0x324] ss:$16 sps:$4 sm:$0xff]   ;;  %v5422_v33 = vld [vmem:[#allocation10 + $0x120] ss:$16 sps:$4 sm:$0xff]  }
 0x18c   : > { %2810 = vmatpush1.bf16.msra.mxu0 %v5392_v23  ;;  %v5423_v43 = vld [vmem:[#allocation10 + $0x320] ss:$16 sps:$4 sm:$0xff]   ;;  %v5424_v12 = vld [vmem:[#allocation10 + $0x144] ss:$16 sps:$4 sm:$0xff]  }
 0x18d   : > { %2851 = vmatpush1.bf16.msra.mxu1 %v5393_v10  ;;  %2811 = vmatprep.subr.bf16.mxu0 %v5394_v54  ;;  %v5426_v1 = vld [vmem:[#allocation10 + $0x344] ss:$16 sps:$4 sm:$0xff]   ;;  %v5428_v9 = vld [vmem:[#allocation10 + $0x140] ss:$16 sps:$4 sm:$0xff]   ;;  %v5469_v10 = vld [vmem:[#allocation10 + $0x28] ss:$16 sps:$4 sm:$0xff]  }
 0x18e   : > { %2852 = vmatprep.subr.bf16.mxu1 %v5396_v24  ;;  %v5429_v28 = vld [vmem:[#allocation10 + $0x340] ss:$16 sps:$4 sm:$0xff]   ;;  %v5430_v29 = vld [vmem:[#allocation10 + $0x164] ss:$16 sps:$4 sm:$0xff]   ;;  %v5477_v24 = vld [vmem:[#allocation10 + $0x4c] ss:$16 sps:$4 sm:$0xff]  }
 0x18f   : > { %v5432_v53 = vld [vmem:[#allocation10 + $0x364] ss:$16 sps:$4 sm:$0xff]   ;;  %v5434_v21 = vld [vmem:[#allocation10 + $0x160] ss:$16 sps:$4 sm:$0xff]  }
 0x190   : > { %2812 = vmatpush1.bf16.msra.mxu0 %v5398_v5  ;;  %v5435_v59 = vld [vmem:[#allocation10 + $0x360] ss:$16 sps:$4 sm:$0xff]   ;;  %v5436_v35 = vld [vmem:[#allocation10 + $0x184] ss:$16 sps:$4 sm:$0xff]  }
 0x191   : > { %2853 = vmatpush1.bf16.msra.mxu1 %v5399_v48  ;;  %2813 = vmatprep.subr.bf16.mxu0 %v5400_v60  ;;  %v5438_v55 = vld [vmem:[#allocation10 + $0x384] ss:$16 sps:$4 sm:$0xff]   ;;  %v5440_v2 = vld [vmem:[#allocation10 + $0x180] ss:$16 sps:$4 sm:$0xff]   ;;  %v5475_v48 = vld [vmem:[#allocation10 + $0x48] ss:$16 sps:$4 sm:$0xff]  }
 0x192   : > { %2854 = vmatprep.subr.bf16.mxu1 %v5402_v16  ;;  %v5441_v57 = vld [vmem:[#allocation10 + $0x380] ss:$16 sps:$4 sm:$0xff]   ;;  %v5442_v11 = vld [vmem:[#allocation10 + $0x1a4] ss:$16 sps:$4 sm:$0xff]   ;;  %v5483_v16 = vld [vmem:[#allocation10 + $0x6c] ss:$16 sps:$4 sm:$0xff]  }
 0x193   : > { %v5444_v17 = vld [vmem:[#allocation10 + $0x3a4] ss:$16 sps:$4 sm:$0xff]   ;;  %v5446_v8 = vld [vmem:[#allocation10 + $0x1a0] ss:$16 sps:$4 sm:$0xff]  }
 0x194   : > { %2814 = vmatpush1.bf16.msra.mxu0 %v5404_v25  ;;  %v5447_v36 = vld [vmem:[#allocation10 + $0x3a0] ss:$16 sps:$4 sm:$0xff]   ;;  %v5448_v39 = vld [vmem:[#allocation10 + $0x1c4] ss:$16 sps:$4 sm:$0xff]  }
 0x195   : > { %2855 = vmatpush1.bf16.msra.mxu1 %v5405_v42  ;;  %2815 = vmatprep.subr.bf16.mxu0 %v5406_v58  ;;  %v5450_v14 = vld [vmem:[#allocation10 + $0x3c4] ss:$16 sps:$4 sm:$0xff]   ;;  %v5452_v51 = vld [vmem:[#allocation10 + $0x1c0] ss:$16 sps:$4 sm:$0xff]   ;;  %v5481_v42 = vld [vmem:[#allocation10 + $0x68] ss:$16 sps:$4 sm:$0xff]  }
 0x196   : > { %2856 = vmatprep.subr.bf16.mxu1 %v5408_v31  ;;  %v5453_v30 = vld [vmem:[#allocation10 + $0x3c0] ss:$16 sps:$4 sm:$0xff]   ;;  %v5454_v50 = vld [vmem:[#allocation10 + $0x1e4] ss:$16 sps:$4 sm:$0xff]   ;;  %v5489_v31 = vld [vmem:[#allocation10 + $0x8c] ss:$16 sps:$4 sm:$0xff]  }
 0x197   : > { %v1439_v32 = vld [vmem:[#allocation3] sm:$0xff]  ;;  %v1441_v40 = vld [vmem:[#allocation3 + $0x10] sm:$0xff] }
 0x198   : > { %2816 = vmatpush1.bf16.msra.mxu0 %v5410_v49  ;;  %v5456_v46 = vld [vmem:[#allocation10 + $0x3e4] ss:$16 sps:$4 sm:$0xff]   ;;  %v5458_v26 = vld [vmem:[#allocation10 + $0x1e0] ss:$16 sps:$4 sm:$0xff]   ;;  %v1445_v63 = vmul.f32 0.0625, %v1439_v32  ;;  %v1447_v56 = vmul.f32 0.0625, %v1441_v40 }
 0x199   : > { %2857 = vmatpush1.bf16.msra.mxu1 %v5411_v47  ;;  %2817 = vmatprep.subr.bf16.mxu0 %v5412_v4  ;;  %v5459_v3 = vld [vmem:[#allocation10 + $0x3e0] ss:$16 sps:$4 sm:$0xff]   ;;  %v5462_v45 = vld [vmem:[#allocation10 + $0x404] ss:$16 sps:$4 sm:$0xff]   ;;  %v5487_v47 = vld [vmem:[#allocation10 + $0x88] ss:$16 sps:$4 sm:$0xff]  }
 0x19a   : > { %2858 = vmatprep.subr.bf16.mxu1 %v5414_v61  ;;  %v7456_v7 = vpack.c.bf16 %v1445_v63, %v1445_v63  ;;  %v7458_v41 = vpack.c.bf16 %v1447_v56, %v1447_v56  ;;  %v5460_v44 = vld [vmem:[#allocation10 + $0x400] ss:$16 sps:$4 sm:$0xff]   ;;  %v5468_v0 = vld [vmem:[#allocation10 + $0x424] ss:$16 sps:$4 sm:$0xff]   ;;  %v5495_v61 = vld [vmem:[#allocation10 + $0xac] ss:$16 sps:$4 sm:$0xff]  }
 0x19b   : > { %v5466_v23 = vld [vmem:[#allocation10 + $0x420] ss:$16 sps:$4 sm:$0xff]   ;;  %v5474_v54 = vld [vmem:[#allocation10 + $0x444] ss:$16 sps:$4 sm:$0xff]   ;;  %v5535_v32 = vld [vmem:[#allocation10 + $0x188] ss:$16 sps:$4 sm:$0xff]  }
 0x19c   : > { %2818 = vmatpush1.bf16.msra.mxu0 %v5416_v52  ;;  %v5472_v5 = vld [vmem:[#allocation10 + $0x440] ss:$16 sps:$4 sm:$0xff]   ;;  %v5480_v60 = vld [vmem:[#allocation10 + $0x464] ss:$16 sps:$4 sm:$0xff]   ;;  %v5549_v56 = vld [vmem:[#allocation10 + $0x1cc] ss:$16 sps:$4 sm:$0xff]  }
 0x19d   : > { %2859 = vmatpush1.bf16.msra.mxu1 %v5417_v13  ;;  %2819 = vmatprep.subr.bf16.mxu0 %v5418_v18  ;;  %v5478_v25 = vld [vmem:[#allocation10 + $0x460] ss:$16 sps:$4 sm:$0xff]   ;;  %v5486_v58 = vld [vmem:[#allocation10 + $0x484] ss:$16 sps:$4 sm:$0xff]   ;;  %v5493_v13 = vld [vmem:[#allocation10 + $0xa8] ss:$16 sps:$4 sm:$0xff]  }
 0x19e   : > { %2860 = vmatprep.subr.bf16.mxu1 %v5420_v6  ;;  %v5484_v49 = vld [vmem:[#allocation10 + $0x480] ss:$16 sps:$4 sm:$0xff]   ;;  %v5492_v4 = vld [vmem:[#allocation10 + $0x4a4] ss:$16 sps:$4 sm:$0xff]   ;;  %v5501_v6 = vld [vmem:[#allocation10 + $0xcc] ss:$16 sps:$4 sm:$0xff]  }
 0x19f   : > { %v5490_v52 = vld [vmem:[#allocation10 + $0x4a0] ss:$16 sps:$4 sm:$0xff]   ;;  %v5498_v18 = vld [vmem:[#allocation10 + $0x4c4] ss:$16 sps:$4 sm:$0xff]  }
 0x1a0   : > { %2820 = vmatpush1.bf16.msra.mxu0 %v5422_v33  ;;  %v1444_v33 = vld [vmem:[#allocation3 + $0x28] sm:$0xff]  ;;  %v5508_v37 = vld [vmem:[#allocation10 + $0x500] ss:$16 sps:$4 sm:$0xff]   ;;  %v5516_v15 = vld [vmem:[#allocation10 + $0x524] ss:$16 sps:$4 sm:$0xff]  }
 0x1a1   : > { %2861 = vmatpush1.bf16.msra.mxu1 %v5423_v43  ;;  %2821 = vmatprep.subr.bf16.mxu0 %v5424_v12  ;;  %v1450_v43 = vmul.f32 0.0625, %v1444_v33  ;;  %v5496_v12 = vld [vmem:[#allocation10 + $0x4c0] ss:$16 sps:$4 sm:$0xff]   ;;  %v5540_v40 = vld [vmem:[#allocation10 + $0x5a4] ss:$16 sps:$4 sm:$0xff]  }
 0x1a2   : > { %2862 = vmatprep.subr.bf16.mxu1 %v5426_v1  ;;  %v5499_v1 = vld [vmem:[#allocation10 + $0xc8] ss:$16 sps:$4 sm:$0xff]   ;;  %v5546_v63 = vld [vmem:[#allocation10 + $0x5c4] ss:$16 sps:$4 sm:$0xff]  }
 0x1a3   : > { %v5583_v33 = vld [vmem:[#allocation10 + $0x488] ss:$16 sps:$4 sm:$0xff]  }
 0x1a4   : > { %2822 = vmatpush1.bf16.msra.mxu0 %v5428_v9  ;;  %v5504_v9 = vld [vmem:[#allocation10 + $0x4e4] ss:$16 sps:$4 sm:$0xff]  }
 0x1a5   : > { %2863 = vmatpush1.bf16.msra.mxu1 %v5429_v28  ;;  %2823 = vmatprep.subr.bf16.mxu0 %v5430_v29  ;;  %v5507_v28 = vld [vmem:[#allocation10 + $0xec] ss:$16 sps:$4 sm:$0xff]   ;;  %v7462_v29 = vpack.c.bf16 %v1450_v43, %v1450_v43 }
 0x1a6   : > { %2864 = vmatprep.subr.bf16.mxu1 %v5432_v53  ;;  %v5502_v53 = vld [vmem:[#allocation10 + $0x4e0] ss:$16 sps:$4 sm:$0xff]   ;;  %v5588_v43 = vld [vmem:[#allocation10 + $0x2ac] ss:$16 sps:$4 sm:$0xff]  }
 0x1a8   : > { %2824 = vmatpush1.bf16.msra.mxu0 %v5434_v21  ;;  %v5510_v21 = vld [vmem:[#allocation10 + $0x504] ss:$16 sps:$4 sm:$0xff]  }
 0x1a9   : > { %2865 = vmatpush1.bf16.msra.mxu1 %v5435_v59  ;;  %2825 = vmatprep.subr.bf16.mxu0 %v5436_v35  ;;  %v5513_v59 = vld [vmem:[#allocation10 + $0x10c] ss:$16 sps:$4 sm:$0xff]  }
 0x1aa   : > { %2866 = vmatprep.subr.bf16.mxu1 %v5438_v55  ;;  %v5519_v35 = vld [vmem:[#allocation10 + $0x12c] ss:$16 sps:$4 sm:$0xff]   ;;  %v5514_v55 = vld [vmem:[#allocation10 + $0x520] ss:$16 sps:$4 sm:$0xff]  }
 0x1ac   : > { %2826 = vmatpush1.bf16.msra.mxu0 %v5440_v2  ;;  %v5522_v2 = vld [vmem:[#allocation10 + $0x544] ss:$16 sps:$4 sm:$0xff]  }
 0x1ad   : > { %2867 = vmatpush1.bf16.msra.mxu1 %v5441_v57  ;;  %2827 = vmatprep.subr.bf16.mxu0 %v5442_v11  ;;  %v5525_v57 = vld [vmem:[#allocation10 + $0x14c] ss:$16 sps:$4 sm:$0xff]   ;;  %v5520_v11 = vld [vmem:[#allocation10 + $0x540] ss:$16 sps:$4 sm:$0xff]  }
 0x1ae   : > { %2868 = vmatprep.subr.bf16.mxu1 %v5444_v17  ;;  %v5523_v17 = vld [vmem:[#allocation10 + $0x148] ss:$16 sps:$4 sm:$0xff]  }
 0x1b0   : > { %2828 = vmatpush1.bf16.msra.mxu0 %v5446_v8  ;;  %v5528_v8 = vld [vmem:[#allocation10 + $0x564] ss:$16 sps:$4 sm:$0xff]  }
 0x1b1   : > { %2869 = vmatpush1.bf16.msra.mxu1 %v5447_v36  ;;  %2829 = vmatprep.subr.bf16.mxu0 %v5448_v39  ;;  %v5531_v36 = vld [vmem:[#allocation10 + $0x16c] ss:$16 sps:$4 sm:$0xff]   ;;  %v5526_v39 = vld [vmem:[#allocation10 + $0x560] ss:$16 sps:$4 sm:$0xff]  }
 0x1b2   : > { %2870 = vmatprep.subr.bf16.mxu1 %v5450_v14  ;;  %v5529_v14 = vld [vmem:[#allocation10 + $0x168] ss:$16 sps:$4 sm:$0xff]  }
 0x1b4   : > { %2830 = vmatpush1.bf16.msra.mxu0 %v5452_v51  ;;  %v5534_v51 = vld [vmem:[#allocation10 + $0x584] ss:$16 sps:$4 sm:$0xff]  }
 0x1b5   : > { %2871 = vmatpush1.bf16.msra.mxu1 %v5453_v30  ;;  %2831 = vmatprep.subr.bf16.mxu0 %v5454_v50  ;;  %v5537_v30 = vld [vmem:[#allocation10 + $0x18c] ss:$16 sps:$4 sm:$0xff]   ;;  %v5532_v50 = vld [vmem:[#allocation10 + $0x580] ss:$16 sps:$4 sm:$0xff]  }
 0x1b6   : > { %2872 = vmatprep.subr.bf16.mxu1 %v5456_v46  ;;  %v5543_v46 = vld [vmem:[#allocation10 + $0x1ac] ss:$16 sps:$4 sm:$0xff]  }
 0x1b8   : > { %2832 = vmatpush1.bf16.msra.mxu0 %v5458_v26  ;;  %v5538_v26 = vld [vmem:[#allocation10 + $0x5a0] ss:$16 sps:$4 sm:$0xff]  }
 0x1b9   : > { %2873 = vmatpush1.bf16.msra.mxu1 %v5459_v3  ;;  %2883 = vmatprep.subr.bf16.mxu0 %v5462_v45  ;;  %v5541_v3 = vld [vmem:[#allocation10 + $0x1a8] ss:$16 sps:$4 sm:$0xff]   ;;  %v5544_v45 = vld [vmem:[#allocation10 + $0x5c0] ss:$16 sps:$4 sm:$0xff]  }
 0x1ba   : > { %2924 = vmatprep.subr.bf16.mxu1 %v5465_v19  ;;  %v5547_v19 = vld [vmem:[#allocation10 + $0x1c8] ss:$16 sps:$4 sm:$0xff]  }
 0x1bb   : > { %2834 = vmatmul.mubr.bf16.vlgmr.msra.gmra.mrb[0].mxu0 %v7456_v7 }
 0x1bc   : > { %2875 = vmatmul.mubr.bf16.vlgmr.msra.gmra.mrb[0].mxu1 %v7458_v41  ;;  %2884 = vmatpush1.bf16.msra.mxu0 %v5460_v44  ;;  %v1443_v44 = vld [vmem:[#allocation3 + $0x20] sm:$0xff] }
 0x1bd   : > { %2925 = vmatpush1.bf16.msra.mxu1 %v5463_v38  ;;  %2885 = vmatprep.subr.bf16.mxu0 %v5468_v0  ;;  %v5552_v38 = vld [vmem:[#allocation10 + $0x5e4] ss:$16 sps:$4 sm:$0xff]   ;;  %v5555_v0 = vld [vmem:[#allocation10 + $0x1ec] ss:$16 sps:$4 sm:$0xff]  }
 0x1be   : > { %2926 = vmatprep.subr.bf16.mxu1 %v5471_v27  ;;  %2956 = vmatprep.mubr.bf16.mxu1 %v1452_v62  ;;  %v5517_v62 = vld [vmem:[#allocation10 + $0x128] ss:$16 sps:$4 sm:$0xff]   ;;  %v1449_v27 = vmul.f32 0.0625, %v1443_v44  ;;  %v5642_v44 = vld [vmem:[#allocation10 + $0x3cc] ss:$16 sps:$4 sm:$0xff]  }
 0x1bf   : > { %2915 = vmatprep.mubr.bf16.mxu0 %v7462_v29 }
 0x1c0   : > { %2886 = vmatpush1.bf16.msra.mxu0 %v5466_v23  ;;  %v5550_v23 = vld [vmem:[#allocation10 + $0x5e0] ss:$16 sps:$4 sm:$0xff]  }
 0x1c1   : > { %2927 = vmatpush1.bf16.msra.mxu1 %v5469_v10  ;;  %2887 = vmatprep.subr.bf16.mxu0 %v5474_v54  ;;  %v5553_v10 = vld [vmem:[#allocation10 + $0x1e8] ss:$16 sps:$4 sm:$0xff]   ;;  %v5558_v54 = vld [vmem:[#allocation10 + $0x20c] ss:$16 sps:$4 sm:$0xff]  }
 0x1c2   : > { %2928 = vmatprep.subr.bf16.mxu1 %v5477_v24  ;;  %v5561_v24 = vld [vmem:[#allocation10 + $0x40c] ss:$16 sps:$4 sm:$0xff]  }
 0x1c4   : > { %2888 = vmatpush1.bf16.msra.mxu0 %v5472_v5  ;;  %v7465_v5 = vpack.c.bf16 %v1449_v27, %v1449_v27  ;;  %v5643_v27 = vld [vmem:[#allocation10 + $0x5c8] ss:$16 sps:$4 sm:$0xff]  }
 0x1c5   : > { %2929 = vmatpush1.bf16.msra.mxu1 %v5475_v48  ;;  %2889 = vmatprep.subr.bf16.mxu0 %v5480_v60  ;;  %v5556_v48 = vld [vmem:[#allocation10 + $0x208] ss:$16 sps:$4 sm:$0xff]  }
 0x1c6   : > { %2930 = vmatprep.subr.bf16.mxu1 %v5483_v16  ;;  %v5559_v60 = vld [vmem:[#allocation10 + $0x408] ss:$16 sps:$4 sm:$0xff]   ;;  %v5564_v16 = vld [vmem:[#allocation10 + $0x22c] ss:$16 sps:$4 sm:$0xff]  }
 0x1c8   : > { %2890 = vmatpush1.bf16.msra.mxu0 %v5478_v25  ;;  %v5567_v25 = vld [vmem:[#allocation10 + $0x42c] ss:$16 sps:$4 sm:$0xff]  }
 0x1c9   : > { %2931 = vmatpush1.bf16.msra.mxu1 %v5481_v42  ;;  %2891 = vmatprep.subr.bf16.mxu0 %v5486_v58  ;;  %v5562_v42 = vld [vmem:[#allocation10 + $0x228] ss:$16 sps:$4 sm:$0xff]  }
 0x1ca   : > { %2932 = vmatprep.subr.bf16.mxu1 %v5489_v31  ;;  %v5565_v58 = vld [vmem:[#allocation10 + $0x428] ss:$16 sps:$4 sm:$0xff]   ;;  %v5570_v31 = vld [vmem:[#allocation10 + $0x24c] ss:$16 sps:$4 sm:$0xff]  }
 0x1cc   : > { %2892 = vmatpush1.bf16.msra.mxu0 %v5484_v49  ;;  %v5573_v49 = vld [vmem:[#allocation10 + $0x44c] ss:$16 sps:$4 sm:$0xff]  }
 0x1cd   : > { %2933 = vmatpush1.bf16.msra.mxu1 %v5487_v47  ;;  %2893 = vmatprep.subr.bf16.mxu0 %v5492_v4  ;;  %v5568_v47 = vld [vmem:[#allocation10 + $0x248] ss:$16 sps:$4 sm:$0xff]  }
 0x1ce   : > { %2934 = vmatprep.subr.bf16.mxu1 %v5495_v61  ;;  %v5571_v4 = vld [vmem:[#allocation10 + $0x448] ss:$16 sps:$4 sm:$0xff]   ;;  %v5576_v61 = vld [vmem:[#allocation10 + $0x26c] ss:$16 sps:$4 sm:$0xff]  }
 0x1d0   : > { %2894 = vmatpush1.bf16.msra.mxu0 %v5490_v52  ;;  %v5574_v52 = vld [vmem:[#allocation10 + $0x268] ss:$16 sps:$4 sm:$0xff]  }
 0x1d1   : > { %2935 = vmatpush1.bf16.msra.mxu1 %v5493_v13  ;;  %2895 = vmatprep.subr.bf16.mxu0 %v5498_v18  ;;  %v5577_v13 = vld [vmem:[#allocation10 + $0x468] ss:$16 sps:$4 sm:$0xff]   ;;  %v5582_v18 = vld [vmem:[#allocation10 + $0x28c] ss:$16 sps:$4 sm:$0xff]  }
 0x1d2   : > { %2936 = vmatprep.subr.bf16.mxu1 %v5501_v6  ;;  %v5585_v6 = vld [vmem:[#allocation10 + $0x48c] ss:$16 sps:$4 sm:$0xff]  }
 0x1d4   : > { %2896 = vmatpush1.bf16.msra.mxu0 %v5496_v12  ;;  %v5591_v12 = vld [vmem:[#allocation10 + $0x4ac] ss:$16 sps:$4 sm:$0xff]  }
 0x1d5   : > { %2937 = vmatpush1.bf16.msra.mxu1 %v5499_v1  ;;  %2897 = vmatprep.subr.bf16.mxu0 %v5504_v9  ;;  %v5586_v1 = vld [vmem:[#allocation10 + $0x2a8] ss:$16 sps:$4 sm:$0xff]  }
 0x1d6   : > { %2938 = vmatprep.subr.bf16.mxu1 %v5507_v28  ;;  %v5589_v9 = vld [vmem:[#allocation10 + $0x4a8] ss:$16 sps:$4 sm:$0xff]   ;;  %v5594_v28 = vld [vmem:[#allocation10 + $0x2cc] ss:$16 sps:$4 sm:$0xff]  }
 0x1d8   : > { %2898 = vmatpush1.bf16.msra.mxu0 %v5502_v53  ;;  %v5592_v53 = vld [vmem:[#allocation10 + $0x2c8] ss:$16 sps:$4 sm:$0xff]  }
 0x1d9   : > { %2939 = vmatpush1.bf16.msra.mxu1 %v5505_v34  ;;  %2899 = vmatprep.subr.bf16.mxu0 %v5510_v21  ;;  %v5595_v34 = vld [vmem:[#allocation10 + $0x4c8] ss:$16 sps:$4 sm:$0xff]   ;;  %v5600_v21 = vld [vmem:[#allocation10 + $0x2ec] ss:$16 sps:$4 sm:$0xff]  }
 0x1da   : > { %2940 = vmatprep.subr.bf16.mxu1 %v5513_v59  ;;  %v5603_v59 = vld [vmem:[#allocation10 + $0x4ec] ss:$16 sps:$4 sm:$0xff]  }
 0x1dc   : > { %2900 = vmatpush1.bf16.msra.mxu0 %v5508_v37  ;;  %v5598_v37 = vld [vmem:[#allocation10 + $0x2e8] ss:$16 sps:$4 sm:$0xff]  }
 0x1dd   : > { %2941 = vmatpush1.bf16.msra.mxu1 %v5511_v22  ;;  %2901 = vmatprep.subr.bf16.mxu0 %v5516_v15  ;;  %v5601_v22 = vld [vmem:[#allocation10 + $0x4e8] ss:$16 sps:$4 sm:$0xff]   ;;  %v5606_v15 = vld [vmem:[#allocation10 + $0x30c] ss:$16 sps:$4 sm:$0xff]  }
 0x1de   : > { %2942 = vmatprep.subr.bf16.mxu1 %v5519_v35  ;;  %v5609_v35 = vld [vmem:[#allocation10 + $0x50c] ss:$16 sps:$4 sm:$0xff]  }
 0x1e0   : > { %2902 = vmatpush1.bf16.msra.mxu0 %v5514_v55  ;;  %v5604_v55 = vld [vmem:[#allocation10 + $0x308] ss:$16 sps:$4 sm:$0xff]  }
 0x1e1   : > { %2943 = vmatpush1.bf16.msra.mxu1 %v5517_v62  ;;  %2903 = vmatprep.subr.bf16.mxu0 %v5522_v2  ;;  %v5607_v62 = vld [vmem:[#allocation10 + $0x508] ss:$16 sps:$4 sm:$0xff]   ;;  %v5612_v2 = vld [vmem:[#allocation10 + $0x32c] ss:$16 sps:$4 sm:$0xff]  }
 0x1e2   : > { %2944 = vmatprep.subr.bf16.mxu1 %v5525_v57  ;;  %v5615_v57 = vld [vmem:[#allocation10 + $0x52c] ss:$16 sps:$4 sm:$0xff]  }
 0x1e4   : > { %2904 = vmatpush1.bf16.msra.mxu0 %v5520_v11  ;;  %v5610_v11 = vld [vmem:[#allocation10 + $0x328] ss:$16 sps:$4 sm:$0xff]  }
 0x1e5   : > { %2945 = vmatpush1.bf16.msra.mxu1 %v5523_v17  ;;  %2905 = vmatprep.subr.bf16.mxu0 %v5528_v8  ;;  %v5613_v17 = vld [vmem:[#allocation10 + $0x528] ss:$16 sps:$4 sm:$0xff]   ;;  %v5618_v8 = vld [vmem:[#allocation10 + $0x34c] ss:$16 sps:$4 sm:$0xff]  }
 0x1e6   : > { %2946 = vmatprep.subr.bf16.mxu1 %v5531_v36  ;;  %v5621_v36 = vld [vmem:[#allocation10 + $0x54c] ss:$16 sps:$4 sm:$0xff]  }
 0x1e8   : > { %2906 = vmatpush1.bf16.msra.mxu0 %v5526_v39  ;;  %v5616_v39 = vld [vmem:[#allocation10 + $0x348] ss:$16 sps:$4 sm:$0xff]  }
 0x1e9   : > { %2947 = vmatpush1.bf16.msra.mxu1 %v5529_v14  ;;  %2907 = vmatprep.subr.bf16.mxu0 %v5534_v51  ;;  %v5619_v14 = vld [vmem:[#allocation10 + $0x548] ss:$16 sps:$4 sm:$0xff]   ;;  %v5624_v51 = vld [vmem:[#allocation10 + $0x36c] ss:$16 sps:$4 sm:$0xff]  }
 0x1ea   : > { %2948 = vmatprep.subr.bf16.mxu1 %v5537_v30  ;;  %v5627_v30 = vld [vmem:[#allocation10 + $0x56c] ss:$16 sps:$4 sm:$0xff]  }
 0x1ec   : > { %2908 = vmatpush1.bf16.msra.mxu0 %v5532_v50  ;;  %v5622_v50 = vld [vmem:[#allocation10 + $0x368] ss:$16 sps:$4 sm:$0xff]  }
 0x1ed   : > { %2949 = vmatpush1.bf16.msra.mxu1 %v5535_v32  ;;  %2909 = vmatprep.subr.bf16.mxu0 %v5540_v40  ;;  %v5625_v32 = vld [vmem:[#allocation10 + $0x568] ss:$16 sps:$4 sm:$0xff]   ;;  %v5630_v40 = vld [vmem:[#allocation10 + $0x38c] ss:$16 sps:$4 sm:$0xff]  }
 0x1ee   : > { %2950 = vmatprep.subr.bf16.mxu1 %v5543_v46  ;;  %v5633_v46 = vld [vmem:[#allocation10 + $0x58c] ss:$16 sps:$4 sm:$0xff]  }
 0x1f0   : > { %2910 = vmatpush1.bf16.msra.mxu0 %v5538_v26  ;;  %v5628_v26 = vld [vmem:[#allocation10 + $0x388] ss:$16 sps:$4 sm:$0xff]  }
 0x1f1   : > { %2951 = vmatpush1.bf16.msra.mxu1 %v5541_v3  ;;  %2911 = vmatprep.subr.bf16.mxu0 %v5546_v63  ;;  %v5631_v3 = vld [vmem:[#allocation10 + $0x588] ss:$16 sps:$4 sm:$0xff]   ;;  %v5636_v63 = vld [vmem:[#allocation10 + $0x3ac] ss:$16 sps:$4 sm:$0xff]  }
 0x1f2   : > { %2952 = vmatprep.subr.bf16.mxu1 %v5549_v56  ;;  %v5639_v56 = vld [vmem:[#allocation10 + $0x5ac] ss:$16 sps:$4 sm:$0xff]  }
 0x1f4   : > { %2912 = vmatpush1.bf16.msra.mxu0 %v5544_v45  ;;  %v5634_v45 = vld [vmem:[#allocation10 + $0x3a8] ss:$16 sps:$4 sm:$0xff]  }
 0x1f5   : > { %2953 = vmatpush1.bf16.msra.mxu1 %v5547_v19  ;;  %2913 = vmatprep.subr.bf16.mxu0 %v5552_v38  ;;  %v5637_v19 = vld [vmem:[#allocation10 + $0x5a8] ss:$16 sps:$4 sm:$0xff]   ;;  %v5645_v38 = vld [vmem:[#allocation10 + $0x5cc] ss:$16 sps:$4 sm:$0xff]  }
 0x1f6   : > { %2954 = vmatprep.subr.bf16.mxu1 %v5555_v0  ;;  %v5640_v0 = vld [vmem:[#allocation10 + $0x3c8] ss:$16 sps:$4 sm:$0xff]  }
 0x1f8   : > { %2914 = vmatpush1.bf16.msra.mxu0 %v5550_v23  ;;  %v5648_v23 = vld [vmem:[#allocation10 + $0x3ec] ss:$16 sps:$4 sm:$0xff]  }
 0x1f9   : > { %2955 = vmatpush1.bf16.msra.mxu1 %v5553_v10  ;;  %2965 = vmatprep.subr.bf16.mxu0 %v5558_v54  ;;  %v5651_v10 = vld [vmem:[#allocation10 + $0x5ec] ss:$16 sps:$4 sm:$0xff]  }
 0x1fa   : > { %3006 = vmatprep.subr.bf16.mxu1 %v5561_v24  ;;  %v1422_v54 = vld [vmem:[#allocation2 + $0x8] sm:$0xff]  ;;  %v1424_v24 = vld [vmem:[#allocation2 + $0x18] sm:$0xff] }
 0x1fb   : > { %2916 = vmatmul.mubr.bf16.vlgmr.msra.gmra.mrb[4].mxu0 %v7465_v5 }
 0x1fc   : > { %2957 = vmatmul.mubr.bf16.vlgmr.msra.gmra.mrb[4].mxu1 %v7456_v7  ;;  %2966 = vmatpush1.bf16.msra.mxu0 %v5556_v48  ;;  %v5579_v7 = vld [vmem:[#allocation10 + $0x46c] ss:$16 sps:$4 sm:$0xff]   ;;  %v5646_v48 = vld [vmem:[#allocation10 + $0x3e8] ss:$16 sps:$4 sm:$0xff]  }
 0x1fd   : > { %3007 = vmatpush1.bf16.msra.mxu1 %v5559_v60  ;;  %2967 = vmatprep.subr.bf16.mxu0 %v5564_v16  ;;  %v5649_v60 = vld [vmem:[#allocation10 + $0x5e8] ss:$16 sps:$4 sm:$0xff]   ;;  %v5654_v16 = vld [vmem:[#allocation9 + $0x4] ss:$16 sps:$4 sm:$0xff]  }
 0x1fe   : > { %3008 = vmatprep.subr.bf16.mxu1 %v5567_v25  ;;  %2997 = vmatprep.mubr.bf16.mxu0 %v7453_v20  ;;  %v5580_v20 = vld [vmem:[#allocation10 + $0x288] ss:$16 sps:$4 sm:$0xff]   ;;  %v5657_v25 = vld [vmem:[#allocation9 + $0x204] ss:$16 sps:$4 sm:$0xff]  }
 0x1ff   : > { %3038 = vmatprep.mubr.bf16.mxu1 %v7462_v29  ;;  %v5597_v29 = vld [vmem:[#allocation10 + $0x4cc] ss:$16 sps:$4 sm:$0xff]  }
 0x200   : > { %2968 = vmatpush1.bf16.msra.mxu0 %v5562_v42  ;;  %v1428_v42 = vmul.f32 0.0625, %v1422_v54  ;;  %v5738_v54 = vld [vmem:[#allocation9 + $0x1c4] ss:$16 sps:$4 sm:$0xff]  }
 0x201   : > { %3009 = vmatpush1.bf16.msra.mxu1 %v5565_v58  ;;  %2969 = vmatprep.subr.bf16.mxu0 %v5570_v31  ;;  %v1430_v58 = vmul.f32 0.0625, %v1424_v24  ;;  %v5652_v31 = vld [vmem:[#allocation9] ss:$16 sps:$4 sm:$0xff]   ;;  %v5741_v24 = vld [vmem:[#allocation9 + $0x3c4] ss:$16 sps:$4 sm:$0xff]  }
 0x202   : > { %3010 = vmatprep.subr.bf16.mxu1 %v5573_v49  ;;  %v5655_v49 = vld [vmem:[#allocation9 + $0x200] ss:$16 sps:$4 sm:$0xff]  }
 0x204   : > { %2970 = vmatpush1.bf16.msra.mxu0 %v5568_v47  ;;  %v5660_v47 = vld [vmem:[#allocation9 + $0x24] ss:$16 sps:$4 sm:$0xff]  }
 0x205   : > { %3011 = vmatpush1.bf16.msra.mxu1 %v5571_v4  ;;  %2971 = vmatprep.subr.bf16.mxu0 %v5576_v61  ;;  %v5663_v4 = vld [vmem:[#allocation9 + $0x224] ss:$16 sps:$4 sm:$0xff]   ;;  %v7471_v61 = vpack.c.bf16 %v1428_v42, %v1428_v42 }
 0x206   : > { %3012 = vmatprep.subr.bf16.mxu1 %v5579_v7  ;;  %v7473_v7 = vpack.c.bf16 %v1430_v58, %v1430_v58  ;;  %v1423_v42 = vld [vmem:[#allocation2 + $0x10] sm:$0xff] }
 0x207   : > { %v5747_v58 = vld [vmem:[#allocation9 + $0x3e4] ss:$16 sps:$4 sm:$0xff]  }
 0x208   : > { %2972 = vmatpush1.bf16.msra.mxu0 %v5574_v52  ;;  %v5658_v52 = vld [vmem:[#allocation9 + $0x20] ss:$16 sps:$4 sm:$0xff]  }
 0x209   : > { %3013 = vmatpush1.bf16.msra.mxu1 %v5577_v13  ;;  %2973 = vmatprep.subr.bf16.mxu0 %v5582_v18  ;;  %v5661_v13 = vld [vmem:[#allocation9 + $0x220] ss:$16 sps:$4 sm:$0xff]   ;;  %v5666_v18 = vld [vmem:[#allocation9 + $0x44] ss:$16 sps:$4 sm:$0xff]  }
 0x20a   : > { %3014 = vmatprep.subr.bf16.mxu1 %v5585_v6  ;;  %v5669_v6 = vld [vmem:[#allocation9 + $0x244] ss:$16 sps:$4 sm:$0xff]  }
 0x20c   : > { %2974 = vmatpush1.bf16.msra.mxu0 %v5580_v20  ;;  %v5664_v20 = vld [vmem:[#allocation9 + $0x40] ss:$16 sps:$4 sm:$0xff]  }
 0x20d   : > { %3015 = vmatpush1.bf16.msra.mxu1 %v5583_v33  ;;  %2975 = vmatprep.subr.bf16.mxu0 %v5588_v43  ;;  %v5667_v33 = vld [vmem:[#allocation9 + $0x240] ss:$16 sps:$4 sm:$0xff]  }
 0x20e   : > { %3016 = vmatprep.subr.bf16.mxu1 %v5591_v12  ;;  %v5670_v43 = vld [vmem:[#allocation9 + $0x60] ss:$16 sps:$4 sm:$0xff]  }
 0x20f   : > { %v5673_v12 = vld [vmem:[#allocation9 + $0x260] ss:$16 sps:$4 sm:$0xff]  }
 0x210   : > { %2976 = vmatpush1.bf16.msra.mxu0 %v5586_v1  ;;  %v5678_v1 = vld [vmem:[#allocation9 + $0x84] ss:$16 sps:$4 sm:$0xff]  }
 0x211   : > { %3017 = vmatpush1.bf16.msra.mxu1 %v5589_v9  ;;  %2977 = vmatprep.subr.bf16.mxu0 %v5594_v28  ;;  %v5681_v9 = vld [vmem:[#allocation9 + $0x284] ss:$16 sps:$4 sm:$0xff]   ;;  %v5676_v28 = vld [vmem:[#allocation9 + $0x80] ss:$16 sps:$4 sm:$0xff]  }
 0x212   : > { %3018 = vmatprep.subr.bf16.mxu1 %v5597_v29  ;;  %v5679_v29 = vld [vmem:[#allocation9 + $0x280] ss:$16 sps:$4 sm:$0xff]  }
 0x214   : > { %2978 = vmatpush1.bf16.msra.mxu0 %v5592_v53  ;;  %v5684_v53 = vld [vmem:[#allocation9 + $0xa4] ss:$16 sps:$4 sm:$0xff]  }
 0x215   : > { %3019 = vmatpush1.bf16.msra.mxu1 %v5595_v34  ;;  %2979 = vmatprep.subr.bf16.mxu0 %v5600_v21  ;;  %v5687_v34 = vld [vmem:[#allocation9 + $0x2a4] ss:$16 sps:$4 sm:$0xff]   ;;  %v5682_v21 = vld [vmem:[#allocation9 + $0xa0] ss:$16 sps:$4 sm:$0xff]  }
 0x216   : > { %3020 = vmatprep.subr.bf16.mxu1 %v5603_v59  ;;  %v5685_v59 = vld [vmem:[#allocation9 + $0x2a0] ss:$16 sps:$4 sm:$0xff]  }
 0x218   : > { %2980 = vmatpush1.bf16.msra.mxu0 %v5598_v37  ;;  %v5690_v37 = vld [vmem:[#allocation9 + $0xc4] ss:$16 sps:$4 sm:$0xff]  }
 0x219   : > { %3021 = vmatpush1.bf16.msra.mxu1 %v5601_v22  ;;  %2981 = vmatprep.subr.bf16.mxu0 %v5606_v15  ;;  %v5693_v22 = vld [vmem:[#allocation9 + $0x2c4] ss:$16 sps:$4 sm:$0xff]   ;;  %v5688_v15 = vld [vmem:[#allocation9 + $0xc0] ss:$16 sps:$4 sm:$0xff]  }
 0x21a   : > { %3022 = vmatprep.subr.bf16.mxu1 %v5609_v35  ;;  %v5691_v35 = vld [vmem:[#allocation9 + $0x2c0] ss:$16 sps:$4 sm:$0xff]  }
 0x21c   : > { %2982 = vmatpush1.bf16.msra.mxu0 %v5604_v55  ;;  %v5696_v55 = vld [vmem:[#allocation9 + $0xe4] ss:$16 sps:$4 sm:$0xff]  }
 0x21d   : > { %3023 = vmatpush1.bf16.msra.mxu1 %v5607_v62  ;;  %2983 = vmatprep.subr.bf16.mxu0 %v5612_v2  ;;  %v5699_v62 = vld [vmem:[#allocation9 + $0x2e4] ss:$16 sps:$4 sm:$0xff]   ;;  %v5694_v2 = vld [vmem:[#allocation9 + $0xe0] ss:$16 sps:$4 sm:$0xff]  }
 0x21e   : > { %3024 = vmatprep.subr.bf16.mxu1 %v5615_v57  ;;  %v5697_v57 = vld [vmem:[#allocation9 + $0x2e0] ss:$16 sps:$4 sm:$0xff]  }
 0x220   : > { %2984 = vmatpush1.bf16.msra.mxu0 %v5610_v11  ;;  %v5702_v11 = vld [vmem:[#allocation9 + $0x104] ss:$16 sps:$4 sm:$0xff]  }
 0x221   : > { %3025 = vmatpush1.bf16.msra.mxu1 %v5613_v17  ;;  %2985 = vmatprep.subr.bf16.mxu0 %v5618_v8  ;;  %v5705_v17 = vld [vmem:[#allocation9 + $0x304] ss:$16 sps:$4 sm:$0xff]   ;;  %v5700_v8 = vld [vmem:[#allocation9 + $0x100] ss:$16 sps:$4 sm:$0xff]  }
 0x222   : > { %3026 = vmatprep.subr.bf16.mxu1 %v5621_v36  ;;  %v5703_v36 = vld [vmem:[#allocation9 + $0x300] ss:$16 sps:$4 sm:$0xff]  }
 0x224   : > { %2986 = vmatpush1.bf16.msra.mxu0 %v5616_v39  ;;  %v5708_v39 = vld [vmem:[#allocation9 + $0x124] ss:$16 sps:$4 sm:$0xff]  }
 0x225   : > { %3027 = vmatpush1.bf16.msra.mxu1 %v5619_v14  ;;  %2987 = vmatprep.subr.bf16.mxu0 %v5624_v51  ;;  %v5711_v14 = vld [vmem:[#allocation9 + $0x324] ss:$16 sps:$4 sm:$0xff]   ;;  %v5706_v51 = vld [vmem:[#allocation9 + $0x120] ss:$16 sps:$4 sm:$0xff]  }
 0x226   : > { %3028 = vmatprep.subr.bf16.mxu1 %v5627_v30  ;;  %v5709_v30 = vld [vmem:[#allocation9 + $0x320] ss:$16 sps:$4 sm:$0xff]  }
 0x228   : > { %2988 = vmatpush1.bf16.msra.mxu0 %v5622_v50  ;;  %v5714_v50 = vld [vmem:[#allocation9 + $0x144] ss:$16 sps:$4 sm:$0xff]  }
 0x229   : > { %3029 = vmatpush1.bf16.msra.mxu1 %v5625_v32  ;;  %2989 = vmatprep.subr.bf16.mxu0 %v5630_v40  ;;  %v5717_v32 = vld [vmem:[#allocation9 + $0x344] ss:$16 sps:$4 sm:$0xff]   ;;  %v5712_v40 = vld [vmem:[#allocation9 + $0x140] ss:$16 sps:$4 sm:$0xff]  }
 0x22a   : > { %3030 = vmatprep.subr.bf16.mxu1 %v5633_v46  ;;  %v5715_v46 = vld [vmem:[#allocation9 + $0x340] ss:$16 sps:$4 sm:$0xff]  }
 0x22c   : > { %2990 = vmatpush1.bf16.msra.mxu0 %v5628_v26  ;;  %v5720_v26 = vld [vmem:[#allocation9 + $0x164] ss:$16 sps:$4 sm:$0xff]  }
 0x22d   : > { %3031 = vmatpush1.bf16.msra.mxu1 %v5631_v3  ;;  %2991 = vmatprep.subr.bf16.mxu0 %v5636_v63  ;;  %v5723_v3 = vld [vmem:[#allocation9 + $0x364] ss:$16 sps:$4 sm:$0xff]   ;;  %v5718_v63 = vld [vmem:[#allocation9 + $0x160] ss:$16 sps:$4 sm:$0xff]  }
 0x22e   : > { %3032 = vmatprep.subr.bf16.mxu1 %v5639_v56  ;;  %v5721_v56 = vld [vmem:[#allocation9 + $0x360] ss:$16 sps:$4 sm:$0xff]  }
 0x230   : > { %2992 = vmatpush1.bf16.msra.mxu0 %v5634_v45  ;;  %v5726_v45 = vld [vmem:[#allocation9 + $0x184] ss:$16 sps:$4 sm:$0xff]  }
 0x231   : > { %3033 = vmatpush1.bf16.msra.mxu1 %v5637_v19  ;;  %2993 = vmatprep.subr.bf16.mxu0 %v5642_v44  ;;  %v5729_v19 = vld [vmem:[#allocation9 + $0x384] ss:$16 sps:$4 sm:$0xff]   ;;  %v5724_v44 = vld [vmem:[#allocation9 + $0x180] ss:$16 sps:$4 sm:$0xff]  }
 0x232   : > { %3034 = vmatprep.subr.bf16.mxu1 %v5645_v38  ;;  %v5727_v38 = vld [vmem:[#allocation9 + $0x380] ss:$16 sps:$4 sm:$0xff]  }
 0x234   : > { %2994 = vmatpush1.bf16.msra.mxu0 %v5640_v0  ;;  %v5732_v0 = vld [vmem:[#allocation9 + $0x1a4] ss:$16 sps:$4 sm:$0xff]  }
 0x235   : > { %3035 = vmatpush1.bf16.msra.mxu1 %v5643_v27  ;;  %2995 = vmatprep.subr.bf16.mxu0 %v5648_v23  ;;  %v5735_v27 = vld [vmem:[#allocation9 + $0x3a4] ss:$16 sps:$4 sm:$0xff]   ;;  %v5730_v23 = vld [vmem:[#allocation9 + $0x1a0] ss:$16 sps:$4 sm:$0xff]  }
 0x236   : > { %3036 = vmatprep.subr.bf16.mxu1 %v5651_v10  ;;  %v5733_v10 = vld [vmem:[#allocation9 + $0x3a0] ss:$16 sps:$4 sm:$0xff]  }
 0x238   : > { %2996 = vmatpush1.bf16.msra.mxu0 %v5646_v48  ;;  %v5736_v48 = vld [vmem:[#allocation9 + $0x1c0] ss:$16 sps:$4 sm:$0xff]  }
 0x239   : > { %3037 = vmatpush1.bf16.msra.mxu1 %v5649_v60  ;;  %4007 = vmatprep.subr.bf16.mxu0 %v5654_v16  ;;  %v5739_v60 = vld [vmem:[#allocation9 + $0x3c0] ss:$16 sps:$4 sm:$0xff]   ;;  %v5744_v16 = vld [vmem:[#allocation9 + $0x1e4] ss:$16 sps:$4 sm:$0xff]  }
 0x23a   : > { %4048 = vmatprep.subr.bf16.mxu1 %v5657_v25  ;;  %v1421_v25 = vld [vmem:[#allocation2] sm:$0xff] }
 0x23b   : > { %2998 = vmatmul.mubr.bf16.vlgmr.msra.gmra.mrb[8].mxu0 %v7458_v41  ;;  %v5672_v41 = vld [vmem:[#allocation9 + $0x64] ss:$16 sps:$4 sm:$0xff]  }
 0x23c   : > { %3039 = vmatmul.mubr.bf16.vlgmr.msra.gmra.mrb[8].mxu1 %v7465_v5  ;;  %4008 = vmatpush1.bf16.msra.mxu0 %v5652_v31  ;;  %v5675_v5 = vld [vmem:[#allocation9 + $0x264] ss:$16 sps:$4 sm:$0xff]   ;;  %v5742_v31 = vld [vmem:[#allocation9 + $0x1e0] ss:$16 sps:$4 sm:$0xff]  }
 0x23d   : > { %4049 = vmatpush1.bf16.msra.mxu1 %v5655_v49  ;;  %4009 = vmatprep.subr.bf16.mxu0 %v5660_v47  ;;  %v5745_v49 = vld [vmem:[#allocation9 + $0x3e0] ss:$16 sps:$4 sm:$0xff]   ;;  %v1427_v47 = vmul.f32 0.0625, %v1421_v25  ;;  %v5813_v25 = vld [vmem:[#allocation9 + $0x14c] ss:$16 sps:$4 sm:$0xff]  }
 0x23e   : > { %4050 = vmatprep.subr.bf16.mxu1 %v5663_v4  ;;  %4039 = vmatprep.mubr.bf16.mxu0 %v7471_v61  ;;  %v1429_v4 = vmul.f32 0.0625, %v1423_v42  ;;  %v5808_v42 = vld [vmem:[#allocation9 + $0x540] ss:$16 sps:$4 sm:$0xff]  }
 0x23f   : > { %4080 = vmatprep.mubr.bf16.mxu1 %v7473_v7 }
 0x240   : > { %4010 = vmatpush1.bf16.msra.mxu0 %v5658_v52  ;;  %v1426_v52 = vld [vmem:[#allocation2 + $0x28] sm:$0xff] }
 0x241   : > { %4051 = vmatpush1.bf16.msra.mxu1 %v5661_v13  ;;  %4011 = vmatprep.subr.bf16.mxu0 %v5666_v18  ;;  %v5750_v13 = vld [vmem:[#allocation9 + $0x404] ss:$16 sps:$4 sm:$0xff]   ;;  %v5753_v18 = vld [vmem:[#allocation9 + $0xc] ss:$16 sps:$4 sm:$0xff]  }
 0x242   : > { %4052 = vmatprep.subr.bf16.mxu1 %v5669_v6  ;;  %v1432_v6 = vmul.f32 0.0625, %v1426_v52  ;;  %v5822_v52 = vld [vmem:[#allocation9 + $0x584] ss:$16 sps:$4 sm:$0xff]  }
 0x244   : > { %4012 = vmatpush1.bf16.msra.mxu0 %v5664_v20  ;;  %v7479_v20 = vpack.c.bf16 %v1427_v47, %v1427_v47  ;;  %v5814_v47 = vld [vmem:[#allocation9 + $0x560] ss:$16 sps:$4 sm:$0xff]  }
 0x245   : > { %4053 = vmatpush1.bf16.msra.mxu1 %v5667_v33  ;;  %4013 = vmatprep.subr.bf16.mxu0 %v5672_v41  ;;  %v7481_v33 = vpack.c.bf16 %v1429_v4, %v1429_v4  ;;  %v5748_v41 = vld [vmem:[#allocation9 + $0x400] ss:$16 sps:$4 sm:$0xff]   ;;  %v5817_v4 = vld [vmem:[#allocation9 + $0x168] ss:$16 sps:$4 sm:$0xff]  }
 0x246   : > { %4054 = vmatprep.subr.bf16.mxu1 %v5675_v5  ;;  %v5751_v5 = vld [vmem:[#allocation9 + $0x8] ss:$16 sps:$4 sm:$0xff]  }
 0x248   : > { %4014 = vmatpush1.bf16.msra.mxu0 %v5670_v43  ;;  %v5756_v43 = vld [vmem:[#allocation9 + $0x424] ss:$16 sps:$4 sm:$0xff]  }
 0x249   : > { %4055 = vmatpush1.bf16.msra.mxu1 %v5673_v12  ;;  %4015 = vmatprep.subr.bf16.mxu0 %v5678_v1  ;;  %v5759_v12 = vld [vmem:[#allocation9 + $0x2c] ss:$16 sps:$4 sm:$0xff]   ;;  %v5754_v1 = vld [vmem:[#allocation9 + $0x420] ss:$16 sps:$4 sm:$0xff]  }
 0x24a   : > { %4056 = vmatprep.subr.bf16.mxu1 %v5681_v9  ;;  %v5757_v9 = vld [vmem:[#allocation9 + $0x28] ss:$16 sps:$4 sm:$0xff]  }
 0x24c   : > { %4016 = vmatpush1.bf16.msra.mxu0 %v5676_v28  ;;  %v7483_v28 = vpack.c.bf16 %v1432_v6, %v1432_v6  ;;  %v5823_v6 = vld [vmem:[#allocation9 + $0x188] ss:$16 sps:$4 sm:$0xff]  }
 0x24d   : > { %4057 = vmatpush1.bf16.msra.mxu1 %v5679_v29  ;;  %4017 = vmatprep.subr.bf16.mxu0 %v5684_v53  ;;  %v5762_v29 = vld [vmem:[#allocation9 + $0x444] ss:$16 sps:$4 sm:$0xff]   ;;  %v5765_v53 = vld [vmem:[#allocation9 + $0x4c] ss:$16 sps:$4 sm:$0xff]  }
 0x24e   : > { %4058 = vmatprep.subr.bf16.mxu1 %v5687_v34  ;;  %v5760_v34 = vld [vmem:[#allocation9 + $0x440] ss:$16 sps:$4 sm:$0xff]  }
 0x250   : > { %4018 = vmatpush1.bf16.msra.mxu0 %v5682_v21  ;;  %v5763_v21 = vld [vmem:[#allocation9 + $0x48] ss:$16 sps:$4 sm:$0xff]  }
 0x251   : > { %4059 = vmatpush1.bf16.msra.mxu1 %v5685_v59  ;;  %4019 = vmatprep.subr.bf16.mxu0 %v5690_v37  ;;  %v5768_v59 = vld [vmem:[#allocation9 + $0x464] ss:$16 sps:$4 sm:$0xff]   ;;  %v5771_v37 = vld [vmem:[#allocation9 + $0x6c] ss:$16 sps:$4 sm:$0xff]  }
 0x252   : > { %4060 = vmatprep.subr.bf16.mxu1 %v5693_v22  ;;  %v5766_v22 = vld [vmem:[#allocation9 + $0x460] ss:$16 sps:$4 sm:$0xff]  }
 0x254   : > { %4020 = vmatpush1.bf16.msra.mxu0 %v5688_v15  ;;  %v5769_v15 = vld [vmem:[#allocation9 + $0x68] ss:$16 sps:$4 sm:$0xff]  }
 0x255   : > { %4061 = vmatpush1.bf16.msra.mxu1 %v5691_v35  ;;  %4021 = vmatprep.subr.bf16.mxu0 %v5696_v55  ;;  %v5774_v35 = vld [vmem:[#allocation9 + $0x484] ss:$16 sps:$4 sm:$0xff]   ;;  %v5777_v55 = vld [vmem:[#allocation9 + $0x8c] ss:$16 sps:$4 sm:$0xff]  }
 0x256   : > { %4062 = vmatprep.subr.bf16.mxu1 %v5699_v62  ;;  %v5772_v62 = vld [vmem:[#allocation9 + $0x480] ss:$16 sps:$4 sm:$0xff]  }
 0x258   : > { %4022 = vmatpush1.bf16.msra.mxu0 %v5694_v2  ;;  %v5775_v2 = vld [vmem:[#allocation9 + $0x88] ss:$16 sps:$4 sm:$0xff]  }
 0x259   : > { %4063 = vmatpush1.bf16.msra.mxu1 %v5697_v57  ;;  %4023 = vmatprep.subr.bf16.mxu0 %v5702_v11  ;;  %v5780_v57 = vld [vmem:[#allocation9 + $0x4a4] ss:$16 sps:$4 sm:$0xff]   ;;  %v5783_v11 = vld [vmem:[#allocation9 + $0xac] ss:$16 sps:$4 sm:$0xff]  }
 0x25a   : > { %4064 = vmatprep.subr.bf16.mxu1 %v5705_v17  ;;  %v5781_v17 = vld [vmem:[#allocation9 + $0xa8] ss:$16 sps:$4 sm:$0xff]  }
 0x25c   : > { %4024 = vmatpush1.bf16.msra.mxu0 %v5700_v8  ;;  %v5786_v8 = vld [vmem:[#allocation9 + $0x4c4] ss:$16 sps:$4 sm:$0xff]  }
 0x25d   : > { %4065 = vmatpush1.bf16.msra.mxu1 %v5703_v36  ;;  %4025 = vmatprep.subr.bf16.mxu0 %v5708_v39  ;;  %v5789_v36 = vld [vmem:[#allocation9 + $0xcc] ss:$16 sps:$4 sm:$0xff]  }
 0x25e   : > { %4066 = vmatprep.subr.bf16.mxu1 %v5711_v14 }
 0x260   : > { %4026 = vmatpush1.bf16.msra.mxu0 %v5706_v51  ;;  %v5784_v51 = vld [vmem:[#allocation9 + $0x4c0] ss:$16 sps:$4 sm:$0xff]  }
 0x261   : > { %4067 = vmatpush1.bf16.msra.mxu1 %v5709_v30  ;;  %4027 = vmatprep.subr.bf16.mxu0 %v5714_v50  ;;  %v5787_v30 = vld [vmem:[#allocation9 + $0xc8] ss:$16 sps:$4 sm:$0xff]  }
 0x262   : > { %4068 = vmatprep.subr.bf16.mxu1 %v5717_v32 }
 0x264   : > { %4028 = vmatpush1.bf16.msra.mxu0 %v5712_v40 }
 0x265   : > { %4069 = vmatpush1.bf16.msra.mxu1 %v5715_v46  ;;  %4029 = vmatprep.subr.bf16.mxu0 %v5720_v26  ;;  %v5792_v46 = vld [vmem:[#allocation9 + $0x4e4] ss:$16 sps:$4 sm:$0xff]   ;;  %v5795_v26 = vld [vmem:[#allocation9 + $0xec] ss:$16 sps:$4 sm:$0xff]  }
 0x266   : > { %4070 = vmatprep.subr.bf16.mxu1 %v5723_v3 }
 0x268   : > { %4030 = vmatpush1.bf16.msra.mxu0 %v5718_v63 }
 0x269   : > { %4071 = vmatpush1.bf16.msra.mxu1 %v5721_v56  ;;  %4031 = vmatprep.subr.bf16.mxu0 %v5726_v45 }
 0x26a   : > { %4072 = vmatprep.subr.bf16.mxu1 %v5729_v19 }
 0x26c   : > { %4032 = vmatpush1.bf16.msra.mxu0 %v5724_v44  ;;  %v5790_v44 = vld [vmem:[#allocation9 + $0x4e0] ss:$16 sps:$4 sm:$0xff]  }
 0x26d   : > { %4073 = vmatpush1.bf16.msra.mxu1 %v5727_v38  ;;  %4033 = vmatprep.subr.bf16.mxu0 %v5732_v0  ;;  %v5793_v38 = vld [vmem:[#allocation9 + $0xe8] ss:$16 sps:$4 sm:$0xff]   ;;  %v5798_v0 = vld [vmem:[#allocation9 + $0x504] ss:$16 sps:$4 sm:$0xff]  }
 0x26e   : > { %4074 = vmatprep.subr.bf16.mxu1 %v5735_v27  ;;  %v5801_v27 = vld [vmem:[#allocation9 + $0x10c] ss:$16 sps:$4 sm:$0xff]  }
 0x270   : > { %4034 = vmatpush1.bf16.msra.mxu0 %v5730_v23  ;;  %v5796_v23 = vld [vmem:[#allocation9 + $0x500] ss:$16 sps:$4 sm:$0xff]  }
 0x271   : > { %4075 = vmatpush1.bf16.msra.mxu1 %v5733_v10  ;;  %4035 = vmatprep.subr.bf16.mxu0 %v5738_v54  ;;  %v5799_v10 = vld [vmem:[#allocation9 + $0x108] ss:$16 sps:$4 sm:$0xff]   ;;  %v5804_v54 = vld [vmem:[#allocation9 + $0x524] ss:$16 sps:$4 sm:$0xff]  }
 0x272   : > { %4076 = vmatprep.subr.bf16.mxu1 %v5741_v24  ;;  %v5807_v24 = vld [vmem:[#allocation9 + $0x12c] ss:$16 sps:$4 sm:$0xff]  }
 0x274   : > { %4036 = vmatpush1.bf16.msra.mxu0 %v5736_v48  ;;  %v5802_v48 = vld [vmem:[#allocation9 + $0x520] ss:$16 sps:$4 sm:$0xff]  }
 0x275   : > { %4077 = vmatpush1.bf16.msra.mxu1 %v5739_v60  ;;  %4037 = vmatprep.subr.bf16.mxu0 %v5744_v16  ;;  %v5805_v60 = vld [vmem:[#allocation9 + $0x128] ss:$16 sps:$4 sm:$0xff]   ;;  %v5810_v16 = vld [vmem:[#allocation9 + $0x544] ss:$16 sps:$4 sm:$0xff]  }
 0x276   : > { %4078 = vmatprep.subr.bf16.mxu1 %v5747_v58  ;;  %v5811_v58 = vld [vmem:[#allocation9 + $0x148] ss:$16 sps:$4 sm:$0xff]  }
 0x278   : > { %4038 = vmatpush1.bf16.msra.mxu0 %v5742_v31  ;;  %v5816_v31 = vld [vmem:[#allocation9 + $0x564] ss:$16 sps:$4 sm:$0xff]  }
 0x279   : > { %4079 = vmatpush1.bf16.msra.mxu1 %v5745_v49  ;;  %4089 = vmatprep.subr.bf16.mxu0 %v5750_v13  ;;  %v5819_v49 = vld [vmem:[#allocation9 + $0x16c] ss:$16 sps:$4 sm:$0xff]  }
 0x27a   : > { %4130 = vmatprep.subr.bf16.mxu1 %v5753_v18  ;;  %v5825_v13 = vld [vmem:[#allocation9 + $0x18c] ss:$16 sps:$4 sm:$0xff]   ;;  %v5820_v18 = vld [vmem:[#allocation9 + $0x580] ss:$16 sps:$4 sm:$0xff]  }
 0x27b   : > { %4040 = vmatmul.mubr.bf16.vlgmr.msra.gmra.mrb[12].mxu0 %v7479_v20 }
 0x27c   : > { %4081 = vmatmul.mubr.bf16.vlgmr.msra.gmra.mrb[12].mxu1 %v7481_v33  ;;  %4090 = vmatpush1.bf16.msra.mxu0 %v5748_v41  ;;  %v5828_v41 = vld [vmem:[#allocation9 + $0x5a4] ss:$16 sps:$4 sm:$0xff]  }
 0x27d   : > { %4131 = vmatpush1.bf16.msra.mxu1 %v5751_v5  ;;  %4091 = vmatprep.subr.bf16.mxu0 %v5756_v43  ;;  %v5831_v5 = vld [vmem:[#allocation9 + $0x1ac] ss:$16 sps:$4 sm:$0xff]   ;;  %v5826_v43 = vld [vmem:[#allocation9 + $0x5a0] ss:$16 sps:$4 sm:$0xff]  }
 0x27e   : > { %4132 = vmatprep.subr.bf16.mxu1 %v5759_v12  ;;  %4121 = vmatprep.mubr.bf16.mxu0 %v7483_v28  ;;  %v5829_v12 = vld [vmem:[#allocation9 + $0x1a8] ss:$16 sps:$4 sm:$0xff]  }
 0x27f   : > { %4162 = vmatprep.mubr.bf16.mxu1 %v7471_v61  ;;  %v5778_v61 = vld [vmem:[#allocation9 + $0x4a0] ss:$16 sps:$4 sm:$0xff]  }
 0x280   : > { %4092 = vmatpush1.bf16.msra.mxu0 %v5754_v1  ;;  %v5834_v1 = vld [vmem:[#allocation9 + $0x5c4] ss:$16 sps:$4 sm:$0xff]  }
 0x281   : > { %4133 = vmatpush1.bf16.msra.mxu1 %v5757_v9  ;;  %4093 = vmatprep.subr.bf16.mxu0 %v5762_v29  ;;  %v5837_v9 = vld [vmem:[#allocation9 + $0x1cc] ss:$16 sps:$4 sm:$0xff]   ;;  %v5832_v29 = vld [vmem:[#allocation9 + $0x5c0] ss:$16 sps:$4 sm:$0xff]  }
 0x282   : > { %4134 = vmatprep.subr.bf16.mxu1 %v5765_v53  ;;  %v5835_v53 = vld [vmem:[#allocation9 + $0x1c8] ss:$16 sps:$4 sm:$0xff]  }
 0x284   : > { %4094 = vmatpush1.bf16.msra.mxu0 %v5760_v34  ;;  %v1425_v34 = vld [vmem:[#allocation2 + $0x20] sm:$0xff] }
 0x285   : > { %4135 = vmatpush1.bf16.msra.mxu1 %v5763_v21  ;;  %4095 = vmatprep.subr.bf16.mxu0 %v5768_v59  ;;  %v5840_v21 = vld [vmem:[#allocation9 + $0x5e4] ss:$16 sps:$4 sm:$0xff]   ;;  %v5843_v59 = vld [vmem:[#allocation9 + $0x1ec] ss:$16 sps:$4 sm:$0xff]  }
 0x286   : > { %4136 = vmatprep.subr.bf16.mxu1 %v5771_v37  ;;  %v1431_v37 = vmul.f32 0.0625, %v1425_v34  ;;  %v5910_v34 = vld [vmem:[#allocation9 + $0x368] ss:$16 sps:$4 sm:$0xff]  }
 0x288   : > { %4096 = vmatpush1.bf16.msra.mxu0 %v5766_v22  ;;  %v5838_v22 = vld [vmem:[#allocation9 + $0x5e0] ss:$16 sps:$4 sm:$0xff]  }
 0x289   : > { %4137 = vmatpush1.bf16.msra.mxu1 %v5769_v15  ;;  %4097 = vmatprep.subr.bf16.mxu0 %v5774_v35  ;;  %v5841_v15 = vld [vmem:[#allocation9 + $0x1e8] ss:$16 sps:$4 sm:$0xff]   ;;  %v5846_v35 = vld [vmem:[#allocation9 + $0x20c] ss:$16 sps:$4 sm:$0xff]  }
 0x28a   : > { %4138 = vmatprep.subr.bf16.mxu1 %v5777_v55  ;;  %v5849_v55 = vld [vmem:[#allocation9 + $0x40c] ss:$16 sps:$4 sm:$0xff]  }
 0x28c   : > { %4098 = vmatpush1.bf16.msra.mxu0 %v5772_v62  ;;  %v7493_v62 = vpack.c.bf16 %v1431_v37, %v1431_v37  ;;  %v5921_v37 = vld [vmem:[#allocation9 + $0x58c] ss:$16 sps:$4 sm:$0xff]  }
 0x28d   : > { %4139 = vmatpush1.bf16.msra.mxu1 %v5775_v2  ;;  %4099 = vmatprep.subr.bf16.mxu0 %v5780_v57  ;;  %v5844_v2 = vld [vmem:[#allocation9 + $0x208] ss:$16 sps:$4 sm:$0xff]  }
 0x28e   : > { %4140 = vmatprep.subr.bf16.mxu1 %v5783_v11  ;;  %v2835_v39 = vpop.f32.mrb[0].mxu0  ;;  %v5847_v57 = vld [vmem:[#allocation9 + $0x408] ss:$16 sps:$4 sm:$0xff]   ;;  %v5852_v11 = vld [vmem:[#allocation9 + $0x22c] ss:$16 sps:$4 sm:$0xff]  }
 0x28f   : > { %v2876_v14 = vpop.f32.mrb[0].mxu1  ;;  %v2837_v32 = vpop.f32.mrb[1].mxu0 }
 0x290   : > { %v7489_v50 = vadd.f32 %v2876_v14, %v2835_v39  ;;  %v2878_v40 = vpop.f32.mrb[1].mxu1  ;;  %v2839_v63 = vpop.f32.mrb[2].mxu0  ;;  %4100 = vmatpush1.bf16.msra.mxu0 %v5778_v61  ;;  %v5855_v61 = vld [vmem:[#allocation9 + $0x42c] ss:$16 sps:$4 sm:$0xff]   ;;  %v5856_v14 = vld [vmem:[#allocation9 + $0x248] ss:$16 sps:$4 sm:$0xff]  }
 0x291   : > { %v7491_v3 = vadd.f32 %v2878_v40, %v2837_v32  ;;  %v2880_v56 = vpop.f32.mrb[2].mxu1  ;;  %4141 = vmatpush1.bf16.msra.mxu1 %v5781_v17  ;;  %v2840_v45 = vpop.f32.mrb[3].mxu0  ;;  %4101 = vmatprep.subr.bf16.mxu0 %v5786_v8  ;;  %v5850_v17 = vld [vmem:[#allocation9 + $0x228] ss:$16 sps:$4 sm:$0xff]   ;;  %v5861_v39 = vld [vmem:[#allocation9 + $0x44c] ss:$16 sps:$4 sm:$0xff]  }
 0x292   : > { %v2881_v19 = vpop.f32.mrb[3].mxu1  ;;  %4142 = vmatprep.subr.bf16.mxu1 %v5789_v36  ;;  %v5853_v8 = vld [vmem:[#allocation9 + $0x428] ss:$16 sps:$4 sm:$0xff]   ;;  %v5858_v36 = vld [vmem:[#allocation9 + $0x24c] ss:$16 sps:$4 sm:$0xff]  }
 0x293   : > { %v5862_v32 = vld [vmem:[#allocation9 + $0x268] ss:$16 sps:$4 sm:$0xff]   ;;  %v5876_v63 = vld [vmem:[#allocation9 + $0x2ac] ss:$16 sps:$4 sm:$0xff]  }
 0x294   : > { %4102 = vmatpush1.bf16.msra.mxu0 %v5784_v51  ;;  %v5859_v51 = vld [vmem:[#allocation9 + $0x448] ss:$16 sps:$4 sm:$0xff]   ;;  %v5879_v56 = vld [vmem:[#allocation9 + $0x4ac] ss:$16 sps:$4 sm:$0xff]  }
 0x295   : > { %4143 = vmatpush1.bf16.msra.mxu1 %v5787_v30  ;;  %4103 = vmatprep.subr.bf16.mxu0 %v5792_v46  ;;  %v5864_v30 = vld [vmem:[#allocation9 + $0x26c] ss:$16 sps:$4 sm:$0xff]   ;;  %v5865_v40 = vld [vmem:[#allocation9 + $0x468] ss:$16 sps:$4 sm:$0xff]  }
 0x296   : > { %4144 = vmatprep.subr.bf16.mxu1 %v5795_v26  ;;  %v5870_v46 = vld [vmem:[#allocation9 + $0x28c] ss:$16 sps:$4 sm:$0xff]   ;;  %v5874_v45 = vld [vmem:[#allocation9 + $0x2a8] ss:$16 sps:$4 sm:$0xff]  }
 0x297   : > { %v5873_v26 = vld [vmem:[#allocation9 + $0x48c] ss:$16 sps:$4 sm:$0xff]   ;;  %v5877_v19 = vld [vmem:[#allocation9 + $0x4a8] ss:$16 sps:$4 sm:$0xff]  }
 0x298   : > { %4104 = vmatpush1.bf16.msra.mxu0 %v5790_v44  ;;  %v5882_v44 = vld [vmem:[#allocation9 + $0x2cc] ss:$16 sps:$4 sm:$0xff]  }
 0x299   : > { %4145 = vmatpush1.bf16.msra.mxu1 %v5793_v38  ;;  %4105 = vmatprep.subr.bf16.mxu0 %v5798_v0  ;;  %v5885_v38 = vld [vmem:[#allocation9 + $0x4cc] ss:$16 sps:$4 sm:$0xff]  }
 0x29a   : > { %4146 = vmatprep.subr.bf16.mxu1 %v5801_v27 }
 0x29c   : > { %4106 = vmatpush1.bf16.msra.mxu0 %v5796_v23 }
 0x29d   : > { %4147 = vmatpush1.bf16.msra.mxu1 %v5799_v10  ;;  %4107 = vmatprep.subr.bf16.mxu0 %v5804_v54 }
 0x29e   : > { %4148 = vmatprep.subr.bf16.mxu1 %v5807_v24 }
 0x2a0   : > { %4108 = vmatpush1.bf16.msra.mxu0 %v5802_v48 }
 0x2a1   : > { %4149 = vmatpush1.bf16.msra.mxu1 %v5805_v60  ;;  %4109 = vmatprep.subr.bf16.mxu0 %v5810_v16  ;;  %v5880_v16 = vld [vmem:[#allocation9 + $0x2c8] ss:$16 sps:$4 sm:$0xff]  }
 0x2a2   : > { %4150 = vmatprep.subr.bf16.mxu1 %v5813_v25  ;;  %v5883_v25 = vld [vmem:[#allocation9 + $0x4c8] ss:$16 sps:$4 sm:$0xff]  }
 0x2a4   : > { %4110 = vmatpush1.bf16.msra.mxu0 %v5808_v42 }
 0x2a5   : > { %4151 = vmatpush1.bf16.msra.mxu1 %v5811_v58  ;;  %4111 = vmatprep.subr.bf16.mxu0 %v5816_v31  ;;  %v5888_v31 = vld [vmem:[#allocation9 + $0x2ec] ss:$16 sps:$4 sm:$0xff]  }
 0x2a6   : > { %4152 = vmatprep.subr.bf16.mxu1 %v5819_v49  ;;  %v5891_v49 = vld [vmem:[#allocation9 + $0x4ec] ss:$16 sps:$4 sm:$0xff]  }
 0x2a8   : > { %4112 = vmatpush1.bf16.msra.mxu0 %v5814_v47  ;;  %v5889_v47 = vld [vmem:[#allocation9 + $0x4e8] ss:$16 sps:$4 sm:$0xff]  }
 0x2a9   : > { %4153 = vmatpush1.bf16.msra.mxu1 %v5817_v4  ;;  %4113 = vmatprep.subr.bf16.mxu0 %v5822_v52  ;;  %v5897_v4 = vld [vmem:[#allocation9 + $0x50c] ss:$16 sps:$4 sm:$0xff]   ;;  %v5892_v52 = vld [vmem:[#allocation9 + $0x308] ss:$16 sps:$4 sm:$0xff]  }
 0x2aa   : > { %4154 = vmatprep.subr.bf16.mxu1 %v5825_v13  ;;  %v5895_v13 = vld [vmem:[#allocation9 + $0x508] ss:$16 sps:$4 sm:$0xff]  }
 0x2ac   : > { %4114 = vmatpush1.bf16.msra.mxu0 %v5820_v18  ;;  %v5900_v18 = vld [vmem:[#allocation9 + $0x32c] ss:$16 sps:$4 sm:$0xff]  }
 0x2ad   : > { %4155 = vmatpush1.bf16.msra.mxu1 %v5823_v6  ;;  %4115 = vmatprep.subr.bf16.mxu0 %v5828_v41  ;;  %v5903_v6 = vld [vmem:[#allocation9 + $0x52c] ss:$16 sps:$4 sm:$0xff]   ;;  %v5898_v41 = vld [vmem:[#allocation9 + $0x328] ss:$16 sps:$4 sm:$0xff]  }
 0x2ae   : > { %4156 = vmatprep.subr.bf16.mxu1 %v5831_v5  ;;  %v5901_v5 = vld [vmem:[#allocation9 + $0x528] ss:$16 sps:$4 sm:$0xff]  }
 0x2b0   : > { %4116 = vmatpush1.bf16.msra.mxu0 %v5826_v43  ;;  %v5906_v43 = vld [vmem:[#allocation9 + $0x34c] ss:$16 sps:$4 sm:$0xff]  }
 0x2b1   : > { %4157 = vmatpush1.bf16.msra.mxu1 %v5829_v12  ;;  %4117 = vmatprep.subr.bf16.mxu0 %v5834_v1  ;;  %v5909_v12 = vld [vmem:[#allocation9 + $0x54c] ss:$16 sps:$4 sm:$0xff]   ;;  %v5904_v1 = vld [vmem:[#allocation9 + $0x348] ss:$16 sps:$4 sm:$0xff]  }
 0x2b2   : > { %4158 = vmatprep.subr.bf16.mxu1 %v5837_v9  ;;  %v5907_v9 = vld [vmem:[#allocation9 + $0x548] ss:$16 sps:$4 sm:$0xff]  }
 0x2b4   : > { %4118 = vmatpush1.bf16.msra.mxu0 %v5832_v29  ;;  %v5912_v29 = vld [vmem:[#allocation9 + $0x36c] ss:$16 sps:$4 sm:$0xff]  }
 0x2b5   : > { %4159 = vmatpush1.bf16.msra.mxu1 %v5835_v53  ;;  %4119 = vmatprep.subr.bf16.mxu0 %v5840_v21  ;;  %v5915_v53 = vld [vmem:[#allocation9 + $0x56c] ss:$16 sps:$4 sm:$0xff]   ;;  %v5913_v21 = vld [vmem:[#allocation9 + $0x568] ss:$16 sps:$4 sm:$0xff]  }
 0x2b6   : > { %4160 = vmatprep.subr.bf16.mxu1 %v5843_v59  ;;  %v5918_v59 = vld [vmem:[#allocation9 + $0x38c] ss:$16 sps:$4 sm:$0xff]  }
 0x2b8   : > { %4120 = vmatpush1.bf16.msra.mxu0 %v5838_v22  ;;  %v5916_v22 = vld [vmem:[#allocation9 + $0x388] ss:$16 sps:$4 sm:$0xff]  }
 0x2b9   : > { %4161 = vmatpush1.bf16.msra.mxu1 %v5841_v15  ;;  %4171 = vmatprep.subr.bf16.mxu0 %v5846_v35  ;;  %v5919_v15 = vld [vmem:[#allocation9 + $0x588] ss:$16 sps:$4 sm:$0xff]   ;;  %v5924_v35 = vld [vmem:[#allocation9 + $0x3ac] ss:$16 sps:$4 sm:$0xff]  }
 0x2ba   : > { %4212 = vmatprep.subr.bf16.mxu1 %v5849_v55  ;;  %v5927_v55 = vld [vmem:[#allocation9 + $0x5ac] ss:$16 sps:$4 sm:$0xff]  }
 0x2bb   : > { %4122 = vmatmul.mubr.bf16.vlgmr.msra.gmra.mrb[16].mxu0 %v7493_v62 }
 0x2bc   : > { %4163 = vmatmul.mubr.bf16.vlgmr.msra.gmra.mrb[16].mxu1 %v7479_v20  ;;  %4172 = vmatpush1.bf16.msra.mxu0 %v5844_v2  ;;  %v5867_v20 = vld [vmem:[#allocation9 + $0x46c] ss:$16 sps:$4 sm:$0xff]   ;;  %v5922_v2 = vld [vmem:[#allocation9 + $0x3a8] ss:$16 sps:$4 sm:$0xff]  }
 0x2bd   : > { %4213 = vmatpush1.bf16.msra.mxu1 %v5847_v57  ;;  %4173 = vmatprep.subr.bf16.mxu0 %v5852_v11  ;;  %v5925_v57 = vld [vmem:[#allocation9 + $0x5a8] ss:$16 sps:$4 sm:$0xff]   ;;  %v5930_v11 = vld [vmem:[#allocation9 + $0x3cc] ss:$16 sps:$4 sm:$0xff]  }
 0x2be   : > { %4214 = vmatprep.subr.bf16.mxu1 %v5855_v61  ;;  %4203 = vmatprep.mubr.bf16.mxu0 %v7473_v7  ;;  %v5868_v7 = vld [vmem:[#allocation9 + $0x288] ss:$16 sps:$4 sm:$0xff]   ;;  %v5933_v61 = vld [vmem:[#allocation9 + $0x5cc] ss:$16 sps:$4 sm:$0xff]  }
 0x2bf   : > { %4244 = vmatprep.mubr.bf16.mxu1 %v7483_v28  ;;  %v5871_v28 = vld [vmem:[#allocation9 + $0x488] ss:$16 sps:$4 sm:$0xff]  }
 0x2c0   : > { %4174 = vmatpush1.bf16.msra.mxu0 %v5850_v17  ;;  %v5928_v17 = vld [vmem:[#allocation9 + $0x3c8] ss:$16 sps:$4 sm:$0xff]  }
 0x2c1   : > { %4215 = vmatpush1.bf16.msra.mxu1 %v5853_v8  ;;  %4175 = vmatprep.subr.bf16.mxu0 %v5858_v36  ;;  %v5931_v8 = vld [vmem:[#allocation9 + $0x5c8] ss:$16 sps:$4 sm:$0xff]   ;;  %v5936_v36 = vld [vmem:[#allocation9 + $0x3ec] ss:$16 sps:$4 sm:$0xff]  }
 0x2c2   : > { %4216 = vmatprep.subr.bf16.mxu1 %v5861_v39  ;;  %v5939_v39 = vld [vmem:[#allocation9 + $0x5ec] ss:$16 sps:$4 sm:$0xff]  }
 0x2c4   : > { %4176 = vmatpush1.bf16.msra.mxu0 %v5856_v14  ;;  %v5934_v14 = vld [vmem:[#allocation9 + $0x3e8] ss:$16 sps:$4 sm:$0xff]  }
 0x2c5   : > { %4217 = vmatpush1.bf16.msra.mxu1 %v5859_v51  ;;  %4177 = vmatprep.subr.bf16.mxu0 %v5864_v30  ;;  %v5937_v51 = vld [vmem:[#allocation9 + $0x5e8] ss:$16 sps:$4 sm:$0xff]   ;;  %v5940_v30 = vld [vmem:[%s7656_s5 + $0x40] sm:$0xff]  }
 0x2c6   : > { %4218 = vmatprep.subr.bf16.mxu1 %v5867_v20  ;;  %v5941_v20 = vld [vmem:[%s7656_s5] sm:$0xff]  }
 0x2c8   : > { %4178 = vmatpush1.bf16.msra.mxu0 %v5862_v32  ;;  %v5942_v32 = vld [vmem:[%s7656_s5 + $0x48] sm:$0xff]  }
 0x2c9   : > { %4219 = vmatpush1.bf16.msra.mxu1 %v5865_v40  ;;  %4179 = vmatprep.subr.bf16.mxu0 %v5870_v46  ;;  %v5943_v40 = vld [vmem:[%s7656_s5 + $0x8] sm:$0xff]   ;;  %v5944_v46 = vld [vmem:[%s7656_s5 + $0x50] sm:$0xff]  }
 0x2ca   : > { %4220 = vmatprep.subr.bf16.mxu1 %v5873_v26  ;;  %v5945_v26 = vld [vmem:[%s7656_s5 + $0x10] sm:$0xff]  }
 0x2cc   : > { %4180 = vmatpush1.bf16.msra.mxu0 %v5868_v7  ;;  %v5948_v7 = vld [vmem:[%s7656_s5 + $0x60] sm:$0xff]  }
 0x2cd   : > { %4221 = vmatpush1.bf16.msra.mxu1 %v5871_v28  ;;  %4181 = vmatprep.subr.bf16.mxu0 %v5876_v63  ;;  %v5949_v28 = vld [vmem:[%s7656_s5 + $0x20] sm:$0xff]   ;;  %v5950_v63 = vld [vmem:[%s7656_s5 + $0x68] sm:$0xff]  }
 0x2ce   : > { %4222 = vmatprep.subr.bf16.mxu1 %v5879_v56  ;;  %v2917_v0 = vpop.f32.mrb[4].mxu0  ;;  %v5951_v56 = vld [vmem:[%s7656_s5 + $0x28] sm:$0xff]  }
 0x2cf   : > { %v7499_v27 = vpop.f32.mrb[4].mxu1  ;;  %v7502_v23 = vadd.f32 %v2917_v0, %v7489_v50  ;;  %v2919_v10 = vpop.f32.mrb[5].mxu0  ;;  %v5886_v50 = vld [vmem:[#allocation9 + $0x2e8] ss:$16 sps:$4 sm:$0xff]  }
 0x2d0   : > { %v7504_v54 = vpop.f32.mrb[5].mxu1  ;;  %v7507_v24 = vadd.f32 %v2919_v10, %v7491_v3  ;;  %v2921_v48 = vpop.f32.mrb[6].mxu0  ;;  %4182 = vmatpush1.bf16.msra.mxu0 %v5874_v45  ;;  %v5894_v3 = vld [vmem:[#allocation9 + $0x30c] ss:$16 sps:$4 sm:$0xff]   ;;  %v5952_v45 = vld [vmem:[%s7656_s5 + $0x70] sm:$0xff]  }
 0x2d1   : > { %v2962_v60 = vpop.f32.mrb[6].mxu1  ;;  %4223 = vmatpush1.bf16.msra.mxu1 %v5877_v19  ;;  %v2922_v42 = vpop.f32.mrb[7].mxu0  ;;  %4183 = vmatprep.subr.bf16.mxu0 %v5882_v44 }
 0x2d2   : > { %v2963_v58 = vpop.f32.mrb[7].mxu1  ;;  %4224 = vmatprep.subr.bf16.mxu1 %v5885_v38 }
 0x2d4   : > { %4184 = vmatpush1.bf16.msra.mxu0 %v5880_v16 }
 0x2d5   : > { %4225 = vmatpush1.bf16.msra.mxu1 %v5883_v25  ;;  %4185 = vmatprep.subr.bf16.mxu0 %v5888_v31  ;;  %v5953_v25 = vld [vmem:[%s7656_s5 + $0x30] sm:$0xff]  }
 0x2d6   : > { %4226 = vmatprep.subr.bf16.mxu1 %v5891_v49 }
 0x2d8   : > { %4186 = vmatpush1.bf16.msra.mxu0 %v5886_v50  ;;  %v5956_v50 = vld [vmem:[%s7656_s5 + $0xc0] sm:$0xff]  }
 0x2d9   : > { %4227 = vmatpush1.bf16.msra.mxu1 %v5889_v47  ;;  %4187 = vmatprep.subr.bf16.mxu0 %v5894_v3  ;;  %v5957_v47 = vld [vmem:[%s7656_s5 + $0x80] sm:$0xff]   ;;  %v5958_v3 = vld [vmem:[%s7656_s5 + $0xc8] sm:$0xff]  }
 0x2da   : > { %4228 = vmatprep.subr.bf16.mxu1 %v5897_v4  ;;  %v5959_v4 = vld [vmem:[%s7656_s5 + $0x88] sm:$0xff]  }
 0x2dc   : > { %4188 = vmatpush1.bf16.msra.mxu0 %v5892_v52  ;;  %v5960_v52 = vld [vmem:[%s7656_s5 + $0xd0] sm:$0xff]  }
 0x2dd   : > { %4229 = vmatpush1.bf16.msra.mxu1 %v5895_v13  ;;  %4189 = vmatprep.subr.bf16.mxu0 %v5900_v18  ;;  %v5961_v13 = vld [vmem:[%s7656_s5 + $0x90] sm:$0xff]   ;;  %v5962_v18 = vld [vmem:[%s7656_s5 + $0xd8] sm:$0xff]  }
 0x2de   : > { %4230 = vmatprep.subr.bf16.mxu1 %v5903_v6  ;;  %v5963_v6 = vld [vmem:[%s7656_s5 + $0x98] sm:$0xff]  }
 0x2e0   : > { %4190 = vmatpush1.bf16.msra.mxu0 %v5898_v41  ;;  %v5964_v41 = vld [vmem:[%s7656_s5 + $0xe0] sm:$0xff]  }
 0x2e1   : > { %4231 = vmatpush1.bf16.msra.mxu1 %v5901_v5  ;;  %4191 = vmatprep.subr.bf16.mxu0 %v5906_v43  ;;  %v5965_v5 = vld [vmem:[%s7656_s5 + $0xa0] sm:$0xff]   ;;  %v5966_v43 = vld [vmem:[%s7656_s5 + $0xe8] sm:$0xff]  }
 0x2e2   : > { %4232 = vmatprep.subr.bf16.mxu1 %v5909_v12  ;;  %v5967_v12 = vld [vmem:[%s7656_s5 + $0xa8] sm:$0xff]  }
 0x2e4   : > { %4192 = vmatpush1.bf16.msra.mxu0 %v5904_v1 }
 0x2e5   : > { %4233 = vmatpush1.bf16.msra.mxu1 %v5907_v9  ;;  %4193 = vmatprep.subr.bf16.mxu0 %v5912_v29 }
 0x2e6   : > { %4234 = vmatprep.subr.bf16.mxu1 %v5915_v53 }
 0x2e8   : > { %4194 = vmatpush1.bf16.msra.mxu0 %v5910_v34 }
 0x2e9   : > { %4235 = vmatpush1.bf16.msra.mxu1 %v5913_v21  ;;  %4195 = vmatprep.subr.bf16.mxu0 %v5918_v59  ;;  %v5968_v21 = vld [vmem:[%s7656_s5 + $0xf0] sm:$0xff]  }
 0x2ea   : > { %4236 = vmatprep.subr.bf16.mxu1 %v5921_v37 }
 0x2ec   : > { %4196 = vmatpush1.bf16.msra.mxu0 %v5916_v22 }
 0x2ed   : > { %4237 = vmatpush1.bf16.msra.mxu1 %v5919_v15  ;;  %4197 = vmatprep.subr.bf16.mxu0 %v5924_v35  ;;  %v5969_v15 = vld [vmem:[%s7656_s5 + $0xb0] sm:$0xff]  }
 0x2ee   : > { %4238 = vmatprep.subr.bf16.mxu1 %v5927_v55 }
 0x2f0   : > { %4198 = vmatpush1.bf16.msra.mxu0 %v5922_v2 }
 0x2f1   : > { %4239 = vmatpush1.bf16.msra.mxu1 %v5925_v57  ;;  %4199 = vmatprep.subr.bf16.mxu0 %v5930_v11  ;;  %v4255_v11 = vlaneseq }
 0x2f2   : > { %4240 = vmatprep.subr.bf16.mxu1 %v5933_v61 }
 0x2f3   : > { %v4256_v61 = vshrl.u32 %v4255_v11, 7 }
 0x2f4   : > { %4200 = vmatpush1.bf16.msra.mxu0 %v5928_v17 }
 0x2f5   : > { %4241 = vmatpush1.bf16.msra.mxu1 %v5931_v8  ;;  %4201 = vmatprep.subr.bf16.mxu0 %v5936_v36  ;;  %v4257_v17 = vsub.s32 0, %v4256_v61  ;;  %v4253_v8 = vld [vmem:[%s7851_s14] sm:$0xf]  ;;  %v4261_v36 = vsub.s32 1, %v4256_v61 }
 0x2f6   : > { %4242 = vmatprep.subr.bf16.mxu1 %v5939_v39 }
 0x2f7   : > { %v4258_v39 = vrot.slane %v4253_v8, %v4257_v17 }
 0x2f8   : > { %4202 = vmatpush1.bf16.msra.mxu0 %v5934_v14 }
 0x2f9   : > { %4243 = vmatpush1.bf16.msra.mxu1 %v5937_v51  ;;  %5210 = vmatprep.subr.bf16.mxu0 %v5940_v30  ;;  %v4262_v30 = vrot.slane %v4253_v8, %v4261_v36 }
 0x2fa   : > { %5232 = vmatprep.subr.bf16.mxu1 %v5956_v50 }
 0x2fb   : > { %4204 = vmatmul.mubr.bf16.vlgmr.msra.gmra.mrb[20].mxu0 %v7481_v33  ;;  %v5946_v33 = vld [vmem:[%s7656_s5 + $0x58] sm:$0xff]  }
 0x2fc   : > { %4245 = vmatmul.mubr.bf16.vlgmr.msra.gmra.mrb[20].mxu1 %v7493_v62  ;;  %5211 = vmatpush3.bf16.msra.mxu0 %v5941_v20  ;;  %v5947_v62 = vld [vmem:[%s7656_s5 + $0x18] sm:$0xff]  }
 0x2fd   : > { %5212 = vmatprep.subr.bf16.mxu0 %v5942_v32  ;;  %5233 = vmatpush3.bf16.msra.mxu1 %v5957_v47 }
 0x2fe   : > { %5234 = vmatprep.subr.bf16.mxu1 %v5958_v3 }
 0x300   : > { %5213 = vmatpush3.bf16.msra.mxu0 %v5943_v40 }
 0x301   : > { %5214 = vmatprep.subr.bf16.mxu0 %v5944_v46  ;;  %5235 = vmatpush3.bf16.msra.mxu1 %v5959_v4 }
 0x302   : > { %5236 = vmatprep.subr.bf16.mxu1 %v5960_v52 }
 0x304   : > { %5215 = vmatpush3.bf16.msra.mxu0 %v5945_v26 }
 0x305   : > { %5216 = vmatprep.subr.bf16.mxu0 %v5946_v33  ;;  %5237 = vmatpush3.bf16.msra.mxu1 %v5961_v13 }
 0x306   : > { %5238 = vmatprep.subr.bf16.mxu1 %v5962_v18 }
 0x308   : > { %5217 = vmatpush3.bf16.msra.mxu0 %v5947_v62 }
 0x309   : > { %5218 = vmatprep.subr.bf16.mxu0 %v5948_v7  ;;  %5239 = vmatpush3.bf16.msra.mxu1 %v5963_v6 }
 0x30a   : > { %5240 = vmatprep.subr.bf16.mxu1 %v5964_v41 }
 0x30c   : > { %5219 = vmatpush3.bf16.msra.mxu0 %v5949_v28 }
 0x30d   : > { %5220 = vmatprep.subr.bf16.mxu0 %v5950_v63  ;;  %5241 = vmatpush3.bf16.msra.mxu1 %v5965_v5 }
 0x30e   : > { %v2999_v19 = vpop.f32.mrb[8].mxu0  ;;  %5242 = vmatprep.subr.bf16.mxu1 %v5966_v43 }
 0x30f   : > { %v3040_v44 = vpop.f32.mrb[8].mxu1  ;;  %v3000_v38 = vadd.f32 %v2999_v19, %v7499_v27  ;;  %v3001_v0 = vpop.f32.mrb[9].mxu0  ;;  %v5954_v27 = vld [vmem:[%s7656_s5 + $0x78] sm:$0xff]  }
 0x310   : > { %v3042_v10 = vpop.f32.mrb[9].mxu1  ;;  %v3002_v48 = vadd.f32 %v3001_v0, %v7504_v54  ;;  %v3003_v60 = vpop.f32.mrb[10].mxu0  ;;  %5221 = vmatpush3.bf16.msra.mxu0 %v5951_v56  ;;  %v5955_v54 = vld [vmem:[%s7656_s5 + $0x38] sm:$0xff]   ;;  %v4269_v0 = vsub.s32 3, %v4256_v61 }
 0x311   : > { %v3044_v16 = vpop.f32.mrb[10].mxu1  ;;  %v7555_v42 = vadd.f32 %v3040_v44, %v3000_v38  ;;  %v3004_v58 = vpop.f32.mrb[11].mxu0  ;;  %5222 = vmatprep.subr.bf16.mxu0 %v5952_v45  ;;  %5243 = vmatpush3.bf16.msra.mxu1 %v5967_v12  ;;  %v4265_v38 = vsub.s32 2, %v4256_v61 }
 0x312   : > { %v3045_v31 = vpop.f32.mrb[11].mxu1  ;;  %v7560_v49 = vadd.f32 %v3042_v10, %v3002_v48  ;;  %5244 = vmatprep.subr.bf16.mxu1 %v5968_v21 }
 0x313   : > { %v4266_v16 = vrot.slane %v4253_v8, %v4265_v38  ;;  %v4270_v31 = vrot.slane %v4253_v8, %v4269_v0 }
 0x314   : > { %5223 = vmatpush3.bf16.msra.mxu0 %v5953_v25 }
 0x315   : > { %5224 = vmatprep.subr.bf16.mxu0 %v5954_v27  ;;  %5245 = vmatpush3.bf16.msra.mxu1 %v5969_v15 }
 0x318   : > { %5225 = vmatpush3.bf16.msra.mxu0 %v5955_v54 }
 0x34e   : > { %v4041_v1 = vpop.f32.mrb[12].mxu0 }
 0x34f   : > { %v4082_v9 = vpop.f32.mrb[12].mxu1  ;;  %v4042_v29 = vadd.f32 %v4041_v1, %v7502_v23  ;;  %v4043_v53 = vpop.f32.mrb[13].mxu0  ;;  %v5970_v23 = vld [vmem:[%s7656_s5 + $0xf8] sm:$0xff]   ;;  %v4626_v1 = vld [vmem:[%s7852_s2] sm:$0x1] }
 0x350   : > { %v4084_v34 = vpop.f32.mrb[13].mxu1  ;;  %v4044_v59 = vadd.f32 %v4043_v53, %v7507_v24  ;;  %v4045_v37 = vpop.f32.mrb[14].mxu0  ;;  %v5971_v24 = vld [vmem:[%s7656_s5 + $0xb8] sm:$0xff]   ;;  %5246 = vmatprep.subr.bf16.mxu1 %v5970_v23 }
 0x351   : > { %v4086_v22 = vpop.f32.mrb[14].mxu1  ;;  %v4083_v35 = vadd.f32 %v4082_v9, %v4042_v29  ;;  %v4046_v55 = vpop.f32.mrb[15].mxu0  ;;  %5247 = vmatpush3.bf16.msra.mxu1 %v5971_v24  ;;  %v4627_v9 = vunpack.c.l.bf16 %v4626_v1  ;;  %v5174_v29 = vld [vmem:[%s7853_s6] ss:$0 sm:$0xff] }
 0x352   : > { %v4087_v2 = vpop.f32.mrb[15].mxu1  ;;  %v4085_v57 = vadd.f32 %v4084_v34, %v4044_v59 }
 0x353   : > { %v4631_v22 = vrot.slane %v4627_v9, %v4257_v17 }
 0x38e   : > { %v4123_v14 = vpop.f32.mrb[16].mxu0 }
 0x38f   : > { %v4164_v51 = vpop.f32.mrb[16].mxu1  ;;  %v4124_v20 = vadd.f32 %v4123_v14, %v4083_v35  ;;  %v4125_v40 = vpop.f32.mrb[17].mxu0 }
 0x390   : > { %v4165_v32 = vadd.f32 %v4164_v51, %v7555_v42  ;;  %v4166_v46 = vpop.f32.mrb[17].mxu1  ;;  %v4126_v26 = vadd.f32 %v4125_v40, %v4085_v57  ;;  %v4127_v62 = vpop.f32.mrb[18].mxu0  ;;  %v4638_v57 = vstv %s4637_s11 }
 0x391   : > { %v4167_v33 = vadd.f32 %v4166_v46, %v7560_v49  ;;  %v4168_v7 = vpop.f32.mrb[18].mxu1  ;;  %v4275_v28 = vadd.f32 %v4258_v39, %v4124_v20  ;;  %v4128_v63 = vpop.f32.mrb[19].mxu0 }
 0x392   : > { %v4169_v56 = vpop.f32.mrb[19].mxu1  ;;  %v4276_v45 = vadd.f32 %v4262_v30, %v4126_v26 }
 0x393   : > { %v4279_v44 = vpack.c.bf16 %v4275_v28, %v4275_v28 }
 0x394   : > { %v4280_v19 = vpack.c.bf16 %v4276_v45, %v4276_v45 }
 0x396   : > { %4578 = vmatprep.mubr.bf16.mxu0 %v4280_v19 }
 0x397   : > { %4579 = vmatmul.mubr.bf16.vlgmr.msra.gmra.mrb[24].mxu0 %v4279_v44 }
 0x3ce   : > { %v4205_v10 = vpop.f32.mrb[20].mxu0 }
 0x3cf   : > { %v4246_v48 = vpop.f32.mrb[20].mxu1  ;;  %v4206_v60 = vadd.f32 %v4205_v10, %v4165_v32  ;;  %v4207_v25 = vpop.f32.mrb[21].mxu0 }
 0x3d0   : > { %v4248_v42 = vpop.f32.mrb[21].mxu1  ;;  %v4208_v58 = vadd.f32 %v4207_v25, %v4167_v33  ;;  %v4209_v27 = vpop.f32.mrb[22].mxu0 }
 0x3d1   : > { %v4250_v49 = vpop.f32.mrb[22].mxu1  ;;  %v4247_v54 = vadd.f32 %v4246_v48, %v4206_v60  ;;  %v4210_v50 = vpop.f32.mrb[23].mxu0 }
 0x3d2   : > { %v4251_v47 = vpop.f32.mrb[23].mxu1  ;;  %v4249_v3 = vadd.f32 %v4248_v42, %v4208_v58 }
 0x3d3   : > { %v4277_v4 = vadd.f32 %v4266_v16, %v4247_v54 }
 0x3d4   : > { %v4278_v52 = vadd.f32 %v4270_v31, %v4249_v3 }
 0x3d5   : > { %v4281_v18 = vpack.c.bf16 %v4277_v4, %v4277_v4 }
 0x3d6   : > { %v4282_v13 = vpack.c.bf16 %v4278_v52, %v4278_v52 }
 0x3d8   : > { %4618 = vmatprep.mubr.bf16.mxu1 %v4282_v13 }
 0x3d9   : > { %4619 = vmatmul.mubr.bf16.vlgmr.msra.gmra.mrb[24].mxu1 %v4281_v18 }
 0x46a   : > { %v5226_v6 = vpop.f32.mrb[24].mxu0 }
 0x46b   : > { %v5227_v41 = vpop.f32.mrb[25].mxu0 }
 0x46c   : > { %v5228_v5 = vadd.f32 %v5227_v41, %v5226_v6  ;;  %v5229_v43 = vpop.f32.mrb[26].mxu0 }
 0x46d   : > { %v5230_v12 = vpop.f32.mrb[27].mxu0 }
 0x46e   : > { %v4581_v21 = vadd.f32 %v5228_v5, %v5174_v29 }
 0x4ac   : > { %v5248_v53 = vpop.f32.mrb[24].mxu1 }
 0x4ad   : > { %v5249_v34 = vpop.f32.mrb[25].mxu1 }
 0x4ae   : > { %v5250_v59 = vadd.f32 %v5249_v34, %v5248_v53  ;;  %v5251_v37 = vpop.f32.mrb[26].mxu1 }
 0x4af   : > { %v5252_v15 = vpop.f32.mrb[27].mxu1 }
 0x4b0   : > { %v4621_v35 = vadd.f32 %v5250_v59, %v4581_v21 }
 0x4b2   : > { %v4632_v55 = vmul.f32 %v4631_v22, %v4621_v35 }
 0x4b4   : > { %v4634_v2 = vsel %vm4633_vm7, %v4632_v55, 0.0 }
 0x4b5   : > { %4635 = vadd.xlane.f32.xlu0 %v4634_v2 }
 0x542   : > { %v4636_v23 = vpop.xlane.xlu0 %4635 }
 0x543   : > { %v4639_v24 = vadd.f32 %v4638_v57, %v4636_v23 }
 0x545   : > { %v5207_v11 = vmul.f32 -1.442695, %v4639_v24 }
 0x547   : > { %5972 = vpow2.f32 %v5207_v11 }
 0x551   : > { %v5973_v61 = vpop.eup %5972 }
 0x552   : > { %v4643_v8 = vadd.f32 1.0, %v5973_v61 }
 0x554   : > { %5974 = vrcp.f32 %v4643_v8 }
 0x55e   : > { %v5975_v36 = vpop.eup %5974 }
 0x55f   : > { %4647 = vst.msk [vmem:[%s6501_s27] sm:$0xff] %vm4646_vm8, %v5975_v36 }
 0x560 PF: > { %s27_s8 = sadd.s32 1, %s6170_s8   ;;  %s7854_s15 = sld [smem:[#allocation16_spill]] }
 0x561   : > { %p24_p7 = scmp.ge.s32.totalorder %s27_s8, 6   ;;  %s7855_s4 = sld [smem:[#allocation17_spill]] }
 0x562   : > { %s7856_s17 = sld [smem:[#allocation18_spill]]  ;;  %s7857_s11 = smov %s6146_s12 }
 0x563   : > { %s7858_s12 = smov %s6150_s13  ;;  %s7859_s13 = smov %s6398_s23 }
 0x564   : > { %s7860_s14 = smov %s6162_s16  ;;  %26 = sbr.rel (!%p24_p7) target bundleno = 16 (0x10), region = 125 }
 0x567   : > { %s7861_s16 = smov %s7855_s4 }
 0x56b   :  { %4667 = vsyncpa [#allocation6], 1 }
 0x56c   :  { %4669 = vsyncpa [#allocation6 + $0x1], 1 }
 0x56d   :  { %4670 = vsyncpa [#allocation8], 1 }
 0x56e   :  { %4672 = vsyncpa [#allocation8 + $0x1], 1 }
 0x56f   :  { %4673 = vsyncpa [#allocation11], 1 }

</bundles_post_ra>
